<compile_context>
chip_gen: v6e
topology: v6e:2x2x1
jax: 0.10.0
libtpu: 0.0.40
codegen_flags: <defaults>
</compile_context>

<pallas_src>
import jax
import jax.numpy as jnp
from jax.experimental import pallas as pl
from jax.experimental.pallas import tpu as pltpu

# ---- module-consistent hyperparameters (scaled-down, same structure) --------
N_EMBD = 64          # n_embd (scaled down from 512)
N_HEAD = 4           # n_head
HEAD_SIZE = N_EMBD // N_HEAD
N_LAYER = 2          # n_layer (scaled down from 6)
BLOCK_SIZE = 16      # block_size (max sequence length)
VOCAB_SIZE = 65      # vocab_size
VOCAB_PAD = 128      # lm_head / tok_emb padded to a lane-dense 128
LN_EPS = 1e-5
NEG_BIG = -1e30      # large negative instead of -inf (safe: diagonal unmasked)


def _layernorm(x, gamma, beta):
    """x: (M, C) f32; gamma/beta: (1, C) f32. Matches torch.nn.LayerNorm."""
    mu = jnp.mean(x, axis=-1, keepdims=True)
    xc = x - mu
    var = jnp.mean(xc * xc, axis=-1, keepdims=True)
    return xc * jax.lax.rsqrt(var + LN_EPS) * gamma + beta


# ---------------------------------------------------------------------------
# Fused kernel: embedding + all transformer blocks + final LN + lm_head.
# Single grid step; activations carried as (B*T, C).
# ---------------------------------------------------------------------------
def _make_kernel(B, T):
    BT = B * T
    C = N_EMBD
    HS = HEAD_SIZE
    inv_sqrt_hs = 1.0 / (HS ** 0.5)

    def kernel(idx_ref, tok_ref, pos_ref,
               ln1_g_ref, ln1_b_ref, wq_ref, wk_ref, wv_ref, wproj_ref, bproj_ref,
               ln2_g_ref, ln2_b_ref, w1_ref, b1_ref, w2_ref, b2_ref,
               lnf_g_ref, lnf_b_ref, wlm_ref, blm_ref,
               o_ref):
        # ---- in-kernel embedding: one-hot gather on the MXU + positional add ----
        idx = idx_ref[...]                                            # (BT, 1) int32
        vocab_iota = jax.lax.broadcasted_iota(jnp.int32, (BT, VOCAB_PAD), 1)
        onehot = (vocab_iota == idx).astype(jnp.float32)              # (BT, 128)
        x = jnp.dot(onehot, tok_ref[...],
                    preferred_element_type=jnp.float32)               # (BT, C) f32
        pos = pos_ref[0:T, :]                                         # (T, C)
        x = x + jnp.concatenate([pos] * B, axis=0)                    # tile positions over batch

        # ---- additive causal mask, built once, reused across layers/heads ----
        row = jax.lax.broadcasted_iota(jnp.int32, (T, T), 0)
        col = jax.lax.broadcasted_iota(jnp.int32, (T, T), 1)
        mask_bias = jnp.where(col <= row, 0.0, NEG_BIG).astype(jnp.float32)[None]  # (1,T,T)

        for l in range(N_LAYER):          # static unroll; weights stay VMEM-resident
            # ================= self-attention: x = x + proj(heads(ln1(x))) ======
            xln = _layernorm(x, ln1_g_ref[l], ln1_b_ref[l])           # f32
            xln_bf = xln.astype(jnp.bfloat16)

            sa = bproj_ref[l]             # (1, C) projection bias, broadcasts below
            for h in range(N_HEAD):       # per-head weight blocks: no lane slicing
                q = jnp.dot(xln_bf, wq_ref[l, h],
                            preferred_element_type=jnp.float32)       # (BT, hs)
                k = jnp.dot(xln_bf, wk_ref[l, h],
                            preferred_element_type=jnp.float32)
                v = jnp.dot(xln_bf, wv_ref[l, h],
                            preferred_element_type=jnp.float32)

                # batched-over-B attention; bf16 MXU operands, f32 softmax math
                qb = (q * inv_sqrt_hs).reshape(B, T, HS).astype(jnp.bfloat16)
                kb = k.reshape(B, T, HS).astype(jnp.bfloat16)
                vb = v.reshape(B, T, HS).astype(jnp.bfloat16)

                s = jnp.einsum('bqd,bkd->bqk', qb, kb,
                               preferred_element_type=jnp.float32)    # (B,T,T) f32
                s = s + mask_bias
                m = jnp.max(s, axis=-1, keepdims=True)
                e = jnp.exp(s - m)
                p = e * pl.reciprocal(jnp.sum(e, axis=-1, keepdims=True),
                                      approx=True)                    # EUP slot
                o = jnp.einsum('bqk,bkd->bqd', p.astype(jnp.bfloat16), vb,
                               preferred_element_type=jnp.float32)    # (B,T,hs)

                # output projection block-decomposed per head -> no concatenate
                o_bf = o.reshape(BT, HS).astype(jnp.bfloat16)
                sa = sa + jnp.dot(o_bf, wproj_ref[l, h],
                                  preferred_element_type=jnp.float32)  # (BT, C)
            x = x + sa

            # ================= feed-forward: x = x + W2(relu(W1(ln2(x)))) =======
            xln2 = _layernorm(x, ln2_g_ref[l], ln2_b_ref[l])
            h1 = jnp.dot(xln2.astype(jnp.bfloat16), w1_ref[l],
                         preferred_element_type=jnp.float32) + b1_ref[l]
            h1 = jnp.maximum(h1, 0.0)                                 # ReLU
            ff = jnp.dot(h1.astype(jnp.bfloat16), w2_ref[l],
                         preferred_element_type=jnp.float32) + b2_ref[l]
            x = x + ff

        # ---- final LayerNorm + lm_head (128-lane padded, lane-dense store) ----
        xn = _layernorm(x, lnf_g_ref[...], lnf_b_ref[...])
        o_ref[...] = jnp.dot(xn.astype(jnp.bfloat16), wlm_ref[...],
                             preferred_element_type=jnp.float32) + blm_ref[...]

    return kernel


# ---------------------------------------------------------------------------
# Wrapper: one pallas_call, single grid step, everything VMEM-resident.
# ---------------------------------------------------------------------------
def gpt_forward(params, idx):
    """idx: int32 [B, T] token indices. Returns logits [B, T, VOCAB_SIZE]."""
    B, T = idx.shape
    assert T <= BLOCK_SIZE
    BT = B * T

    idx2d = idx.reshape(BT, 1).astype(jnp.int32)

    weights = (params["tok_emb"], params["pos_emb"],
               params["ln1_g"], params["ln1_b"],
               params["wq"], params["wk"], params["wv"],
               params["wproj"], params["bproj"],
               params["ln2_g"], params["ln2_b"],
               params["w1"], params["b1"], params["w2"], params["b2"],
               params["lnf_g"], params["lnf_b"], params["w_lm"], params["b_lm"])

    def whole(a):
        nd = a.ndim
        return pl.BlockSpec(a.shape, lambda i, _n=nd: (0,) * _n)

    logits_padded = pl.pallas_call(
        _make_kernel(B, T),
        out_shape=jax.ShapeDtypeStruct((BT, VOCAB_PAD), jnp.float32),
        grid=(1,),                                   # single step: overhead-bound kernel
        in_specs=[whole(idx2d)] + [whole(w) for w in weights],
        out_specs=pl.BlockSpec((BT, VOCAB_PAD), lambda i: (0, 0)),
        compiler_params=pltpu.CompilerParams(
            dimension_semantics=("arbitrary",),
            vmem_limit_bytes=32 * 1024 * 1024),
    )(idx2d, *weights)

    return logits_padded.reshape(B, T, VOCAB_PAD)[:, :, :VOCAB_SIZE]


# ---------------------------------------------------------------------------
# Parameter init (matches the module's _init_weights):
#   Linear / Embedding weights ~ N(0, 0.02), Linear biases = 0,
#   LayerNorm weight = 1, bias = 0.
# Matmul weights are stored [in, out] (transpose of torch.nn.Linear storage),
# pre-split per attention head, and cast once to bf16; LN params / biases /
# embeddings stay f32.
# ---------------------------------------------------------------------------
def init_params(key):
    def nrm(k, shape):
        return 0.02 * jax.random.normal(k, shape, jnp.float32)

    keys = iter(jax.random.split(key, 3 + 6 * N_LAYER))
    params = {}

    tok = nrm(next(keys), (VOCAB_SIZE, N_EMBD))
    params["tok_emb"] = jnp.pad(tok, ((0, VOCAB_PAD - VOCAB_SIZE), (0, 0)))   # (128, C) f32
    params["pos_emb"] = nrm(next(keys), (BLOCK_SIZE, N_EMBD))                 # (16, C) f32

    w_lm = nrm(next(keys), (N_EMBD, VOCAB_SIZE))
    params["w_lm"] = jnp.pad(w_lm, ((0, 0), (0, VOCAB_PAD - VOCAB_SIZE))).astype(jnp.bfloat16)
    params["b_lm"] = jnp.zeros((1, VOCAB_PAD), jnp.float32)
    params["lnf_g"] = jnp.ones((1, N_EMBD), jnp.float32)
    params["lnf_b"] = jnp.zeros((1, N_EMBD), jnp.float32)

    wq, wk, wv, wproj, w1, w2 = [], [], [], [], [], []
    for _ in range(N_LAYER):
        # per-head weight blocks (H, C, hs); proj row-blocks (H, hs, C)
        wq.append(nrm(next(keys), (N_HEAD, N_EMBD, HEAD_SIZE)).astype(jnp.bfloat16))
        wk.append(nrm(next(keys), (N_HEAD, N_EMBD, HEAD_SIZE)).astype(jnp.bfloat16))
        wv.append(nrm(next(keys), (N_HEAD, N_EMBD, HEAD_SIZE)).astype(jnp.bfloat16))
        wproj.append(nrm(next(keys), (N_HEAD, HEAD_SIZE, N_EMBD)).astype(jnp.bfloat16))
        w1.append(nrm(next(keys), (N_EMBD, 4 * N_EMBD)).astype(jnp.bfloat16))
        w2.append(nrm(next(keys), (4 * N_EMBD, N_EMBD)).astype(jnp.bfloat16))

    stack = lambda xs: jnp.stack(xs, axis=0)
    L = N_LAYER
    params.update(
        wq=stack(wq), wk=stack(wk), wv=stack(wv), wproj=stack(wproj),
        bproj=jnp.zeros((L, 1, N_EMBD), jnp.float32),
        ln1_g=jnp.ones((L, 1, N_EMBD), jnp.float32),
        ln1_b=jnp.zeros((L, 1, N_EMBD), jnp.float32),
        ln2_g=jnp.ones((L, 1, N_EMBD), jnp.float32),
        ln2_b=jnp.zeros((L, 1, N_EMBD), jnp.float32),
        w1=stack(w1),
        b1=jnp.zeros((L, 1, 4 * N_EMBD), jnp.float32),
        w2=stack(w2),
        b2=jnp.zeros((L, 1, N_EMBD), jnp.float32),
    )
    return params


if __name__ == "__main__":
    key = jax.random.PRNGKey(0)
    pkey, ikey = jax.random.split(key)
    params = init_params(pkey)

    B, T = 2, 8
    idx = jax.random.randint(ikey, (B, T), 0, VOCAB_SIZE, dtype=jnp.int32)

    logits = gpt_forward(params, idx)
    jax.block_until_ready(logits)
    assert logits.shape == (B, T, VOCAB_SIZE), logits.shape
    assert bool(jnp.all(jnp.isfinite(logits)))
    print("KERNEL_OK")
</pallas_src>

<mosaic_0001>
module attributes {stable_mosaic.version = 11 : i64} {
  func.func @kernel(%arg0: i32, %arg1: memref<16x1xi32, #tpu.memory_space<vmem>>, %arg2: memref<128x64xf32, #tpu.memory_space<vmem>>, %arg3: memref<16x64xf32, #tpu.memory_space<vmem>>, %arg4: memref<2x1x64xf32, #tpu.memory_space<vmem>>, %arg5: memref<2x1x64xf32, #tpu.memory_space<vmem>>, %arg6: memref<2x4x64x16xbf16, #tpu.memory_space<vmem>>, %arg7: memref<2x4x64x16xbf16, #tpu.memory_space<vmem>>, %arg8: memref<2x4x64x16xbf16, #tpu.memory_space<vmem>>, %arg9: memref<2x4x16x64xbf16, #tpu.memory_space<vmem>>, %arg10: memref<2x1x64xf32, #tpu.memory_space<vmem>>, %arg11: memref<2x1x64xf32, #tpu.memory_space<vmem>>, %arg12: memref<2x1x64xf32, #tpu.memory_space<vmem>>, %arg13: memref<2x64x256xbf16, #tpu.memory_space<vmem>>, %arg14: memref<2x1x256xf32, #tpu.memory_space<vmem>>, %arg15: memref<2x256x64xbf16, #tpu.memory_space<vmem>>, %arg16: memref<2x1x64xf32, #tpu.memory_space<vmem>>, %arg17: memref<1x64xf32, #tpu.memory_space<vmem>>, %arg18: memref<1x64xf32, #tpu.memory_space<vmem>>, %arg19: memref<64x128xbf16, #tpu.memory_space<vmem>>, %arg20: memref<1x128xf32, #tpu.memory_space<vmem>>, %arg21: memref<16x128xf32, #tpu.memory_space<vmem>>) attributes {dimension_semantics = [#tpu.dimension_semantics<arbitrary>], iteration_bounds = array<i64: 1>, scalar_prefetch = 0 : i64, scratch_operands = 0 : i64, tpu.core_type = #tpu.core_type<tc>, window_params = [{pipeline_mode = #tpu.pipeline_mode<synchronous>, transform_indices = @transform_0, window_bounds = array<i64: 16, 1>}, {pipeline_mode = #tpu.pipeline_mode<synchronous>, transform_indices = @transform_1, window_bounds = array<i64: 128, 64>}, {pipeline_mode = #tpu.pipeline_mode<synchronous>, transform_indices = @transform_2, window_bounds = array<i64: 16, 64>}, {pipeline_mode = #tpu.pipeline_mode<synchronous>, transform_indices = @transform_3, window_bounds = array<i64: 2, 1, 64>}, {pipeline_mode = #tpu.pipeline_mode<synchronous>, transform_indices = @transform_4, window_bounds = array<i64: 2, 1, 64>}, {pipeline_mode = #tpu.pipeline_mode<synchronous>, transform_indices = @transform_5, window_bounds = array<i64: 2, 4, 64, 16>}, {pipeline_mode = #tpu.pipeline_mode<synchronous>, transform_indices = @transform_6, window_bounds = array<i64: 2, 4, 64, 16>}, {pipeline_mode = #tpu.pipeline_mode<synchronous>, transform_indices = @transform_7, window_bounds = array<i64: 2, 4, 64, 16>}, {pipeline_mode = #tpu.pipeline_mode<synchronous>, transform_indices = @transform_8, window_bounds = array<i64: 2, 4, 16, 64>}, {pipeline_mode = #tpu.pipeline_mode<synchronous>, transform_indices = @transform_9, window_bounds = array<i64: 2, 1, 64>}, {pipeline_mode = #tpu.pipeline_mode<synchronous>, transform_indices = @transform_10, window_bounds = array<i64: 2, 1, 64>}, {pipeline_mode = #tpu.pipeline_mode<synchronous>, transform_indices = @transform_11, window_bounds = array<i64: 2, 1, 64>}, {pipeline_mode = #tpu.pipeline_mode<synchronous>, transform_indices = @transform_12, window_bounds = array<i64: 2, 64, 256>}, {pipeline_mode = #tpu.pipeline_mode<synchronous>, transform_indices = @transform_13, window_bounds = array<i64: 2, 1, 256>}, {pipeline_mode = #tpu.pipeline_mode<synchronous>, transform_indices = @transform_14, window_bounds = array<i64: 2, 256, 64>}, {pipeline_mode = #tpu.pipeline_mode<synchronous>, transform_indices = @transform_15, window_bounds = array<i64: 2, 1, 64>}, {pipeline_mode = #tpu.pipeline_mode<synchronous>, transform_indices = @transform_16, window_bounds = array<i64: 1, 64>}, {pipeline_mode = #tpu.pipeline_mode<synchronous>, transform_indices = @transform_17, window_bounds = array<i64: 1, 64>}, {pipeline_mode = #tpu.pipeline_mode<synchronous>, transform_indices = @transform_18, window_bounds = array<i64: 64, 128>}, {pipeline_mode = #tpu.pipeline_mode<synchronous>, transform_indices = @transform_19, window_bounds = array<i64: 1, 128>}, {pipeline_mode = #tpu.pipeline_mode<synchronous>, transform_indices = @transform_20, window_bounds = array<i64: 16, 128>}]} {
    %c0 = arith.constant 0 : index
    %c0_0 = arith.constant 0 : index
    %0 = vector.load %arg1[%c0, %c0_0] : memref<16x1xi32, #tpu.memory_space<vmem>>, vector<16x1xi32>
    %1 = tpu.iota {dimensions = array<i32: 1>} : vector<16x128xi32>
    %2 = vector.broadcast %0 : vector<16x1xi32> to vector<16x128xi32>
    %3 = arith.cmpi eq, %1, %2 : vector<16x128xi32>
    %4 = arith.extui %3 : vector<16x128xi1> to vector<16x128xi32>
    %5 = arith.sitofp %4 : vector<16x128xi32> to vector<16x128xf32>
    %c0_1 = arith.constant 0 : index
    %c0_2 = arith.constant 0 : index
    %6 = vector.load %arg2[%c0_1, %c0_2] : memref<128x64xf32, #tpu.memory_space<vmem>>, vector<128x64xf32>
    %cst = arith.constant dense<0.000000e+00> : vector<16x64xf32>
    %7 = tpu.matmul %5, %6, %cst {dimension_numbers = #tpu.dot_dimension_numbers<[1], [0], [0], [1], [0, 0, 1, 1], [], []>} : vector<16x128xf32>, vector<128x64xf32>, vector<16x64xf32> -> vector<16x64xf32>
    %c0_3 = arith.constant 0 : index
    %c0_4 = arith.constant 0 : index
    %8 = vector.load %arg3[%c0_3, %c0_4] : memref<16x64xf32, #tpu.memory_space<vmem>>, vector<8x64xf32>
    %9 = tpu.concatenate %8, %8 in 0 : vector<8x64xf32>, vector<8x64xf32> -> vector<16x64xf32>
    %10 = arith.addf %7, %9 : vector<16x64xf32>
    %11 = tpu.iota {dimensions = array<i32: 0>} : vector<8x8xi32>
    %12 = tpu.iota {dimensions = array<i32: 1>} : vector<8x8xi32>
    %13 = arith.cmpi sle, %12, %11 : vector<8x8xi32>
    %cst_5 = arith.constant 0.000000e+00 : f32
    %cst_6 = arith.constant -1.000000e+30 : f32
    %14 = vector.broadcast %cst_5 : f32 to vector<8x8xf32>
    %15 = vector.broadcast %cst_6 : f32 to vector<8x8xf32>
    %16 = arith.select %13, %14, %15 : vector<8x8xi1>, vector<8x8xf32>
    %17 = vector.shape_cast %16 : vector<8x8xf32> to vector<1x8x8xf32>
    %c0_7 = arith.constant 0 : index
    %c0_8 = arith.constant 0 : index
    %c0_9 = arith.constant 0 : index
    %18 = vector.load %arg4[%c0_7, %c0_8, %c0_9] : memref<2x1x64xf32, #tpu.memory_space<vmem>>, vector<1x1x64xf32>
    %19 = vector.shape_cast %18 : vector<1x1x64xf32> to vector<1x64xf32>
    %c0_10 = arith.constant 0 : index
    %c0_11 = arith.constant 0 : index
    %c0_12 = arith.constant 0 : index
    %20 = vector.load %arg5[%c0_10, %c0_11, %c0_12] : memref<2x1x64xf32, #tpu.memory_space<vmem>>, vector<1x1x64xf32>
    %21 = vector.shape_cast %20 : vector<1x1x64xf32> to vector<1x64xf32>
    %cst_13 = arith.constant dense<0.000000e+00> : vector<16xf32>
    %22 = vector.multi_reduction <add>, %10, %cst_13 [1] : vector<16x64xf32> to vector<16xf32>
    %23 = vector.shape_cast %22 : vector<16xf32> to vector<16x1xf32>
    %cst_14 = arith.constant 6.400000e+01 : f32
    %24 = vector.broadcast %cst_14 : f32 to vector<16x1xf32>
    %25 = arith.divf %23, %24 : vector<16x1xf32>
    %26 = vector.broadcast %25 : vector<16x1xf32> to vector<16x64xf32>
    %27 = arith.subf %10, %26 : vector<16x64xf32>
    %28 = arith.mulf %27, %27 : vector<16x64xf32>
    %cst_15 = arith.constant dense<0.000000e+00> : vector<16xf32>
    %29 = vector.multi_reduction <add>, %28, %cst_15 [1] : vector<16x64xf32> to vector<16xf32>
    %30 = vector.shape_cast %29 : vector<16xf32> to vector<16x1xf32>
    %cst_16 = arith.constant 6.400000e+01 : f32
    %31 = vector.broadcast %cst_16 : f32 to vector<16x1xf32>
    %32 = arith.divf %30, %31 : vector<16x1xf32>
    %cst_17 = arith.constant 9.99999974E-6 : f32
    %33 = vector.broadcast %cst_17 : f32 to vector<16x1xf32>
    %34 = arith.addf %32, %33 : vector<16x1xf32>
    %35 = math.rsqrt %34 : vector<16x1xf32>
    %36 = vector.broadcast %35 : vector<16x1xf32> to vector<16x64xf32>
    %37 = arith.mulf %27, %36 : vector<16x64xf32>
    %38 = vector.broadcast %19 : vector<1x64xf32> to vector<16x64xf32>
    %39 = arith.mulf %37, %38 : vector<16x64xf32>
    %40 = vector.broadcast %21 : vector<1x64xf32> to vector<16x64xf32>
    %41 = arith.addf %39, %40 : vector<16x64xf32>
    %42 = arith.truncf %41 : vector<16x64xf32> to vector<16x64xbf16>
    %c0_18 = arith.constant 0 : index
    %c0_19 = arith.constant 0 : index
    %c0_20 = arith.constant 0 : index
    %43 = vector.load %arg10[%c0_18, %c0_19, %c0_20] : memref<2x1x64xf32, #tpu.memory_space<vmem>>, vector<1x1x64xf32>
    %44 = vector.shape_cast %43 : vector<1x1x64xf32> to vector<1x64xf32>
    %c0_21 = arith.constant 0 : index
    %c0_22 = arith.constant 0 : index
    %c0_23 = arith.constant 0 : index
    %c0_24 = arith.constant 0 : index
    %45 = vector.load %arg6[%c0_21, %c0_22, %c0_23, %c0_24] : memref<2x4x64x16xbf16, #tpu.memory_space<vmem>>, vector<1x1x64x16xbf16>
    %46 = vector.shape_cast %45 : vector<1x1x64x16xbf16> to vector<64x16xbf16>
    %cst_25 = arith.constant dense<0.000000e+00> : vector<16x16xf32>
    %47 = tpu.matmul %42, %46, %cst_25 {dimension_numbers = #tpu.dot_dimension_numbers<[1], [0], [0], [1], [0, 0, 1, 1], [], []>} : vector<16x64xbf16>, vector<64x16xbf16>, vector<16x16xf32> -> vector<16x16xf32>
    %c0_26 = arith.constant 0 : index
    %c0_27 = arith.constant 0 : index
    %c0_28 = arith.constant 0 : index
    %c0_29 = arith.constant 0 : index
    %48 = vector.load %arg7[%c0_26, %c0_27, %c0_28, %c0_29] : memref<2x4x64x16xbf16, #tpu.memory_space<vmem>>, vector<1x1x64x16xbf16>
    %49 = vector.shape_cast %48 : vector<1x1x64x16xbf16> to vector<64x16xbf16>
    %cst_30 = arith.constant dense<0.000000e+00> : vector<16x16xf32>
    %50 = tpu.matmul %42, %49, %cst_30 {dimension_numbers = #tpu.dot_dimension_numbers<[1], [0], [0], [1], [0, 0, 1, 1], [], []>} : vector<16x64xbf16>, vector<64x16xbf16>, vector<16x16xf32> -> vector<16x16xf32>
    %c0_31 = arith.constant 0 : index
    %c0_32 = arith.constant 0 : index
    %c0_33 = arith.constant 0 : index
    %c0_34 = arith.constant 0 : index
    %51 = vector.load %arg8[%c0_31, %c0_32, %c0_33, %c0_34] : memref<2x4x64x16xbf16, #tpu.memory_space<vmem>>, vector<1x1x64x16xbf16>
    %52 = vector.shape_cast %51 : vector<1x1x64x16xbf16> to vector<64x16xbf16>
    %cst_35 = arith.constant dense<0.000000e+00> : vector<16x16xf32>
    %53 = tpu.matmul %42, %52, %cst_35 {dimension_numbers = #tpu.dot_dimension_numbers<[1], [0], [0], [1], [0, 0, 1, 1], [], []>} : vector<16x64xbf16>, vector<64x16xbf16>, vector<16x16xf32> -> vector<16x16xf32>
    %cst_36 = arith.constant 2.500000e-01 : f32
    %54 = vector.broadcast %cst_36 : f32 to vector<16x16xf32>
    %55 = arith.mulf %47, %54 : vector<16x16xf32>
    %56 = vector.shape_cast %55 : vector<16x16xf32> to vector<2x8x16xf32>
    %57 = arith.truncf %56 : vector<2x8x16xf32> to vector<2x8x16xbf16>
    %58 = vector.shape_cast %50 : vector<16x16xf32> to vector<2x8x16xf32>
    %59 = arith.truncf %58 : vector<2x8x16xf32> to vector<2x8x16xbf16>
    %60 = vector.shape_cast %53 : vector<16x16xf32> to vector<2x8x16xf32>
    %61 = arith.truncf %60 : vector<2x8x16xf32> to vector<2x8x16xbf16>
    "tpu.trace_start"() <{level = 10 : i32, message = "bqd,bkd->bqk"}> : () -> ()
    %cst_37 = arith.constant dense<0.000000e+00> : vector<2x8x8xf32>
    %62 = tpu.matmul %57, %59, %cst_37 {dimension_numbers = #tpu.dot_dimension_numbers<[2], [2], [1], [1], [0, 0, 0, 1, 1, 1], [0], [0]>} : vector<2x8x16xbf16>, vector<2x8x16xbf16>, vector<2x8x8xf32> -> vector<2x8x8xf32>
    "tpu.trace_stop"() : () -> ()
    %63 = vector.broadcast %17 : vector<1x8x8xf32> to vector<2x8x8xf32>
    %64 = arith.addf %62, %63 : vector<2x8x8xf32>
    %cst_38 = arith.constant dense<0xFF800000> : vector<2x8xf32>
    %65 = vector.multi_reduction <maximumf>, %64, %cst_38 [2] : vector<2x8x8xf32> to vector<2x8xf32>
    %66 = vector.shape_cast %65 : vector<2x8xf32> to vector<2x8x1xf32>
    %67 = vector.broadcast %66 : vector<2x8x1xf32> to vector<2x8x8xf32>
    %68 = arith.subf %64, %67 : vector<2x8x8xf32>
    %69 = math.exp %68 : vector<2x8x8xf32>
    %cst_39 = arith.constant dense<0.000000e+00> : vector<2x8xf32>
    %70 = vector.multi_reduction <add>, %69, %cst_39 [2] : vector<2x8x8xf32> to vector<2x8xf32>
    %71 = vector.shape_cast %70 : vector<2x8xf32> to vector<2x8x1xf32>
    %72 = tpu.reciprocal %71 {approx = true} : vector<2x8x1xf32> -> vector<2x8x1xf32>
    %73 = vector.broadcast %72 : vector<2x8x1xf32> to vector<2x8x8xf32>
    %74 = arith.mulf %69, %73 : vector<2x8x8xf32>
    %75 = arith.truncf %74 : vector<2x8x8xf32> to vector<2x8x8xbf16>
    "tpu.trace_start"() <{level = 10 : i32, message = "bqk,bkd->bqd"}> : () -> ()
    %cst_40 = arith.constant dense<0.000000e+00> : vector<2x8x16xf32>
    %76 = tpu.matmul %75, %61, %cst_40 {dimension_numbers = #tpu.dot_dimension_numbers<[2], [1], [1], [2], [0, 0, 0, 1, 1, 2], [0], [0]>} : vector<2x8x8xbf16>, vector<2x8x16xbf16>, vector<2x8x16xf32> -> vector<2x8x16xf32>
    "tpu.trace_stop"() : () -> ()
    %77 = vector.shape_cast %76 : vector<2x8x16xf32> to vector<16x16xf32>
    %78 = arith.truncf %77 : vector<16x16xf32> to vector<16x16xbf16>
    %c0_41 = arith.constant 0 : index
    %c0_42 = arith.constant 0 : index
    %c0_43 = arith.constant 0 : index
    %c0_44 = arith.constant 0 : index
    %79 = vector.load %arg9[%c0_41, %c0_42, %c0_43, %c0_44] : memref<2x4x16x64xbf16, #tpu.memory_space<vmem>>, vector<1x1x16x64xbf16>
    %80 = vector.shape_cast %79 : vector<1x1x16x64xbf16> to vector<16x64xbf16>
    %cst_45 = arith.constant dense<0.000000e+00> : vector<16x64xf32>
    %81 = tpu.matmul %78, %80, %cst_45 {dimension_numbers = #tpu.dot_dimension_numbers<[1], [0], [0], [1], [0, 0, 1, 1], [], []>} : vector<16x16xbf16>, vector<16x64xbf16>, vector<16x64xf32> -> vector<16x64xf32>
    %82 = vector.broadcast %44 : vector<1x64xf32> to vector<16x64xf32>
    %83 = arith.addf %82, %81 : vector<16x64xf32>
    %c0_46 = arith.constant 0 : index
    %c1 = arith.constant 1 : index
    %c0_47 = arith.constant 0 : index
    %c0_48 = arith.constant 0 : index
    %84 = vector.load %arg6[%c0_46, %c1, %c0_47, %c0_48] : memref<2x4x64x16xbf16, #tpu.memory_space<vmem>>, vector<1x1x64x16xbf16>
    %85 = vector.shape_cast %84 : vector<1x1x64x16xbf16> to vector<64x16xbf16>
    %cst_49 = arith.constant dense<0.000000e+00> : vector<16x16xf32>
    %86 = tpu.matmul %42, %85, %cst_49 {dimension_numbers = #tpu.dot_dimension_numbers<[1], [0], [0], [1], [0, 0, 1, 1], [], []>} : vector<16x64xbf16>, vector<64x16xbf16>, vector<16x16xf32> -> vector<16x16xf32>
    %c0_50 = arith.constant 0 : index
    %c1_51 = arith.constant 1 : index
    %c0_52 = arith.constant 0 : index
    %c0_53 = arith.constant 0 : index
    %87 = vector.load %arg7[%c0_50, %c1_51, %c0_52, %c0_53] : memref<2x4x64x16xbf16, #tpu.memory_space<vmem>>, vector<1x1x64x16xbf16>
    %88 = vector.shape_cast %87 : vector<1x1x64x16xbf16> to vector<64x16xbf16>
    %cst_54 = arith.constant dense<0.000000e+00> : vector<16x16xf32>
    %89 = tpu.matmul %42, %88, %cst_54 {dimension_numbers = #tpu.dot_dimension_numbers<[1], [0], [0], [1], [0, 0, 1, 1], [], []>} : vector<16x64xbf16>, vector<64x16xbf16>, vector<16x16xf32> -> vector<16x16xf32>
    %c0_55 = arith.constant 0 : index
    %c1_56 = arith.constant 1 : index
    %c0_57 = arith.constant 0 : index
    %c0_58 = arith.constant 0 : index
    %90 = vector.load %arg8[%c0_55, %c1_56, %c0_57, %c0_58] : memref<2x4x64x16xbf16, #tpu.memory_space<vmem>>, vector<1x1x64x16xbf16>
    %91 = vector.shape_cast %90 : vector<1x1x64x16xbf16> to vector<64x16xbf16>
    %cst_59 = arith.constant dense<0.000000e+00> : vector<16x16xf32>
    %92 = tpu.matmul %42, %91, %cst_59 {dimension_numbers = #tpu.dot_dimension_numbers<[1], [0], [0], [1], [0, 0, 1, 1], [], []>} : vector<16x64xbf16>, vector<64x16xbf16>, vector<16x16xf32> -> vector<16x16xf32>
    %cst_60 = arith.constant 2.500000e-01 : f32
    %93 = vector.broadcast %cst_60 : f32 to vector<16x16xf32>
    %94 = arith.mulf %86, %93 : vector<16x16xf32>
    %95 = vector.shape_cast %94 : vector<16x16xf32> to vector<2x8x16xf32>
    %96 = arith.truncf %95 : vector<2x8x16xf32> to vector<2x8x16xbf16>
    %97 = vector.shape_cast %89 : vector<16x16xf32> to vector<2x8x16xf32>
    %98 = arith.truncf %97 : vector<2x8x16xf32> to vector<2x8x16xbf16>
    %99 = vector.shape_cast %92 : vector<16x16xf32> to vector<2x8x16xf32>
    %100 = arith.truncf %99 : vector<2x8x16xf32> to vector<2x8x16xbf16>
    "tpu.trace_start"() <{level = 10 : i32, message = "bqd,bkd->bqk"}> : () -> ()
    %cst_61 = arith.constant dense<0.000000e+00> : vector<2x8x8xf32>
    %101 = tpu.matmul %96, %98, %cst_61 {dimension_numbers = #tpu.dot_dimension_numbers<[2], [2], [1], [1], [0, 0, 0, 1, 1, 1], [0], [0]>} : vector<2x8x16xbf16>, vector<2x8x16xbf16>, vector<2x8x8xf32> -> vector<2x8x8xf32>
    "tpu.trace_stop"() : () -> ()
    %102 = vector.broadcast %17 : vector<1x8x8xf32> to vector<2x8x8xf32>
    %103 = arith.addf %101, %102 : vector<2x8x8xf32>
    %cst_62 = arith.constant dense<0xFF800000> : vector<2x8xf32>
    %104 = vector.multi_reduction <maximumf>, %103, %cst_62 [2] : vector<2x8x8xf32> to vector<2x8xf32>
    %105 = vector.shape_cast %104 : vector<2x8xf32> to vector<2x8x1xf32>
    %106 = vector.broadcast %105 : vector<2x8x1xf32> to vector<2x8x8xf32>
    %107 = arith.subf %103, %106 : vector<2x8x8xf32>
    %108 = math.exp %107 : vector<2x8x8xf32>
    %cst_63 = arith.constant dense<0.000000e+00> : vector<2x8xf32>
    %109 = vector.multi_reduction <add>, %108, %cst_63 [2] : vector<2x8x8xf32> to vector<2x8xf32>
    %110 = vector.shape_cast %109 : vector<2x8xf32> to vector<2x8x1xf32>
    %111 = tpu.reciprocal %110 {approx = true} : vector<2x8x1xf32> -> vector<2x8x1xf32>
    %112 = vector.broadcast %111 : vector<2x8x1xf32> to vector<2x8x8xf32>
    %113 = arith.mulf %108, %112 : vector<2x8x8xf32>
    %114 = arith.truncf %113 : vector<2x8x8xf32> to vector<2x8x8xbf16>
    "tpu.trace_start"() <{level = 10 : i32, message = "bqk,bkd->bqd"}> : () -> ()
    %cst_64 = arith.constant dense<0.000000e+00> : vector<2x8x16xf32>
    %115 = tpu.matmul %114, %100, %cst_64 {dimension_numbers = #tpu.dot_dimension_numbers<[2], [1], [1], [2], [0, 0, 0, 1, 1, 2], [0], [0]>} : vector<2x8x8xbf16>, vector<2x8x16xbf16>, vector<2x8x16xf32> -> vector<2x8x16xf32>
    "tpu.trace_stop"() : () -> ()
    %116 = vector.shape_cast %115 : vector<2x8x16xf32> to vector<16x16xf32>
    %117 = arith.truncf %116 : vector<16x16xf32> to vector<16x16xbf16>
    %c0_65 = arith.constant 0 : index
    %c1_66 = arith.constant 1 : index
    %c0_67 = arith.constant 0 : index
    %c0_68 = arith.constant 0 : index
    %118 = vector.load %arg9[%c0_65, %c1_66, %c0_67, %c0_68] : memref<2x4x16x64xbf16, #tpu.memory_space<vmem>>, vector<1x1x16x64xbf16>
    %119 = vector.shape_cast %118 : vector<1x1x16x64xbf16> to vector<16x64xbf16>
    %cst_69 = arith.constant dense<0.000000e+00> : vector<16x64xf32>
    %120 = tpu.matmul %117, %119, %cst_69 {dimension_numbers = #tpu.dot_dimension_numbers<[1], [0], [0], [1], [0, 0, 1, 1], [], []>} : vector<16x16xbf16>, vector<16x64xbf16>, vector<16x64xf32> -> vector<16x64xf32>
    %121 = arith.addf %83, %120 : vector<16x64xf32>
    %c0_70 = arith.constant 0 : index
    %c2 = arith.constant 2 : index
    %c0_71 = arith.constant 0 : index
    %c0_72 = arith.constant 0 : index
    %122 = vector.load %arg6[%c0_70, %c2, %c0_71, %c0_72] : memref<2x4x64x16xbf16, #tpu.memory_space<vmem>>, vector<1x1x64x16xbf16>
    %123 = vector.shape_cast %122 : vector<1x1x64x16xbf16> to vector<64x16xbf16>
    %cst_73 = arith.constant dense<0.000000e+00> : vector<16x16xf32>
    %124 = tpu.matmul %42, %123, %cst_73 {dimension_numbers = #tpu.dot_dimension_numbers<[1], [0], [0], [1], [0, 0, 1, 1], [], []>} : vector<16x64xbf16>, vector<64x16xbf16>, vector<16x16xf32> -> vector<16x16xf32>
    %c0_74 = arith.constant 0 : index
    %c2_75 = arith.constant 2 : index
    %c0_76 = arith.constant 0 : index
    %c0_77 = arith.constant 0 : index
    %125 = vector.load %arg7[%c0_74, %c2_75, %c0_76, %c0_77] : memref<2x4x64x16xbf16, #tpu.memory_space<vmem>>, vector<1x1x64x16xbf16>
    %126 = vector.shape_cast %125 : vector<1x1x64x16xbf16> to vector<64x16xbf16>
    %cst_78 = arith.constant dense<0.000000e+00> : vector<16x16xf32>
    %127 = tpu.matmul %42, %126, %cst_78 {dimension_numbers = #tpu.dot_dimension_numbers<[1], [0], [0], [1], [0, 0, 1, 1], [], []>} : vector<16x64xbf16>, vector<64x16xbf16>, vector<16x16xf32> -> vector<16x16xf32>
    %c0_79 = arith.constant 0 : index
    %c2_80 = arith.constant 2 : index
    %c0_81 = arith.constant 0 : index
    %c0_82 = arith.constant 0 : index
    %128 = vector.load %arg8[%c0_79, %c2_80, %c0_81, %c0_82] : memref<2x4x64x16xbf16, #tpu.memory_space<vmem>>, vector<1x1x64x16xbf16>
    %129 = vector.shape_cast %128 : vector<1x1x64x16xbf16> to vector<64x16xbf16>
    %cst_83 = arith.constant dense<0.000000e+00> : vector<16x16xf32>
    %130 = tpu.matmul %42, %129, %cst_83 {dimension_numbers = #tpu.dot_dimension_numbers<[1], [0], [0], [1], [0, 0, 1, 1], [], []>} : vector<16x64xbf16>, vector<64x16xbf16>, vector<16x16xf32> -> vector<16x16xf32>
    %cst_84 = arith.constant 2.500000e-01 : f32
    %131 = vector.broadcast %cst_84 : f32 to vector<16x16xf32>
    %132 = arith.mulf %124, %131 : vector<16x16xf32>
    %133 = vector.shape_cast %132 : vector<16x16xf32> to vector<2x8x16xf32>
    %134 = arith.truncf %133 : vector<2x8x16xf32> to vector<2x8x16xbf16>
    %135 = vector.shape_cast %127 : vector<16x16xf32> to vector<2x8x16xf32>
    %136 = arith.truncf %135 : vector<2x8x16xf32> to vector<2x8x16xbf16>
    %137 = vector.shape_cast %130 : vector<16x16xf32> to vector<2x8x16xf32>
    %138 = arith.truncf %137 : vector<2x8x16xf32> to vector<2x8x16xbf16>
    "tpu.trace_start"() <{level = 10 : i32, message = "bqd,bkd->bqk"}> : () -> ()
    %cst_85 = arith.constant dense<0.000000e+00> : vector<2x8x8xf32>
    %139 = tpu.matmul %134, %136, %cst_85 {dimension_numbers = #tpu.dot_dimension_numbers<[2], [2], [1], [1], [0, 0, 0, 1, 1, 1], [0], [0]>} : vector<2x8x16xbf16>, vector<2x8x16xbf16>, vector<2x8x8xf32> -> vector<2x8x8xf32>
    "tpu.trace_stop"() : () -> ()
    %140 = vector.broadcast %17 : vector<1x8x8xf32> to vector<2x8x8xf32>
    %141 = arith.addf %139, %140 : vector<2x8x8xf32>
    %cst_86 = arith.constant dense<0xFF800000> : vector<2x8xf32>
    %142 = vector.multi_reduction <maximumf>, %141, %cst_86 [2] : vector<2x8x8xf32> to vector<2x8xf32>
    %143 = vector.shape_cast %142 : vector<2x8xf32> to vector<2x8x1xf32>
    %144 = vector.broadcast %143 : vector<2x8x1xf32> to vector<2x8x8xf32>
    %145 = arith.subf %141, %144 : vector<2x8x8xf32>
    %146 = math.exp %145 : vector<2x8x8xf32>
    %cst_87 = arith.constant dense<0.000000e+00> : vector<2x8xf32>
    %147 = vector.multi_reduction <add>, %146, %cst_87 [2] : vector<2x8x8xf32> to vector<2x8xf32>
    %148 = vector.shape_cast %147 : vector<2x8xf32> to vector<2x8x1xf32>
    %149 = tpu.reciprocal %148 {approx = true} : vector<2x8x1xf32> -> vector<2x8x1xf32>
    %150 = vector.broadcast %149 : vector<2x8x1xf32> to vector<2x8x8xf32>
    %151 = arith.mulf %146, %150 : vector<2x8x8xf32>
    %152 = arith.truncf %151 : vector<2x8x8xf32> to vector<2x8x8xbf16>
    "tpu.trace_start"() <{level = 10 : i32, message = "bqk,bkd->bqd"}> : () -> ()
    %cst_88 = arith.constant dense<0.000000e+00> : vector<2x8x16xf32>
    %153 = tpu.matmul %152, %138, %cst_88 {dimension_numbers = #tpu.dot_dimension_numbers<[2], [1], [1], [2], [0, 0, 0, 1, 1, 2], [0], [0]>} : vector<2x8x8xbf16>, vector<2x8x16xbf16>, vector<2x8x16xf32> -> vector<2x8x16xf32>
    "tpu.trace_stop"() : () -> ()
    %154 = vector.shape_cast %153 : vector<2x8x16xf32> to vector<16x16xf32>
    %155 = arith.truncf %154 : vector<16x16xf32> to vector<16x16xbf16>
    %c0_89 = arith.constant 0 : index
    %c2_90 = arith.constant 2 : index
    %c0_91 = arith.constant 0 : index
    %c0_92 = arith.constant 0 : index
    %156 = vector.load %arg9[%c0_89, %c2_90, %c0_91, %c0_92] : memref<2x4x16x64xbf16, #tpu.memory_space<vmem>>, vector<1x1x16x64xbf16>
    %157 = vector.shape_cast %156 : vector<1x1x16x64xbf16> to vector<16x64xbf16>
    %cst_93 = arith.constant dense<0.000000e+00> : vector<16x64xf32>
    %158 = tpu.matmul %155, %157, %cst_93 {dimension_numbers = #tpu.dot_dimension_numbers<[1], [0], [0], [1], [0, 0, 1, 1], [], []>} : vector<16x16xbf16>, vector<16x64xbf16>, vector<16x64xf32> -> vector<16x64xf32>
    %159 = arith.addf %121, %158 : vector<16x64xf32>
    %c0_94 = arith.constant 0 : index
    %c3 = arith.constant 3 : index
    %c0_95 = arith.constant 0 : index
    %c0_96 = arith.constant 0 : index
    %160 = vector.load %arg6[%c0_94, %c3, %c0_95, %c0_96] : memref<2x4x64x16xbf16, #tpu.memory_space<vmem>>, vector<1x1x64x16xbf16>
    %161 = vector.shape_cast %160 : vector<1x1x64x16xbf16> to vector<64x16xbf16>
    %cst_97 = arith.constant dense<0.000000e+00> : vector<16x16xf32>
    %162 = tpu.matmul %42, %161, %cst_97 {dimension_numbers = #tpu.dot_dimension_numbers<[1], [0], [0], [1], [0, 0, 1, 1], [], []>} : vector<16x64xbf16>, vector<64x16xbf16>, vector<16x16xf32> -> vector<16x16xf32>
    %c0_98 = arith.constant 0 : index
    %c3_99 = arith.constant 3 : index
    %c0_100 = arith.constant 0 : index
    %c0_101 = arith.constant 0 : index
    %163 = vector.load %arg7[%c0_98, %c3_99, %c0_100, %c0_101] : memref<2x4x64x16xbf16, #tpu.memory_space<vmem>>, vector<1x1x64x16xbf16>
    %164 = vector.shape_cast %163 : vector<1x1x64x16xbf16> to vector<64x16xbf16>
    %cst_102 = arith.constant dense<0.000000e+00> : vector<16x16xf32>
    %165 = tpu.matmul %42, %164, %cst_102 {dimension_numbers = #tpu.dot_dimension_numbers<[1], [0], [0], [1], [0, 0, 1, 1], [], []>} : vector<16x64xbf16>, vector<64x16xbf16>, vector<16x16xf32> -> vector<16x16xf32>
    %c0_103 = arith.constant 0 : index
    %c3_104 = arith.constant 3 : index
    %c0_105 = arith.constant 0 : index
    %c0_106 = arith.constant 0 : index
    %166 = vector.load %arg8[%c0_103, %c3_104, %c0_105, %c0_106] : memref<2x4x64x16xbf16, #tpu.memory_space<vmem>>, vector<1x1x64x16xbf16>
    %167 = vector.shape_cast %166 : vector<1x1x64x16xbf16> to vector<64x16xbf16>
    %cst_107 = arith.constant dense<0.000000e+00> : vector<16x16xf32>
    %168 = tpu.matmul %42, %167, %cst_107 {dimension_numbers = #tpu.dot_dimension_numbers<[1], [0], [0], [1], [0, 0, 1, 1], [], []>} : vector<16x64xbf16>, vector<64x16xbf16>, vector<16x16xf32> -> vector<16x16xf32>
    %cst_108 = arith.constant 2.500000e-01 : f32
    %169 = vector.broadcast %cst_108 : f32 to vector<16x16xf32>
    %170 = arith.mulf %162, %169 : vector<16x16xf32>
    %171 = vector.shape_cast %170 : vector<16x16xf32> to vector<2x8x16xf32>
    %172 = arith.truncf %171 : vector<2x8x16xf32> to vector<2x8x16xbf16>
    %173 = vector.shape_cast %165 : vector<16x16xf32> to vector<2x8x16xf32>
    %174 = arith.truncf %173 : vector<2x8x16xf32> to vector<2x8x16xbf16>
    %175 = vector.shape_cast %168 : vector<16x16xf32> to vector<2x8x16xf32>
    %176 = arith.truncf %175 : vector<2x8x16xf32> to vector<2x8x16xbf16>
    "tpu.trace_start"() <{level = 10 : i32, message = "bqd,bkd->bqk"}> : () -> ()
    %cst_109 = arith.constant dense<0.000000e+00> : vector<2x8x8xf32>
    %177 = tpu.matmul %172, %174, %cst_109 {dimension_numbers = #tpu.dot_dimension_numbers<[2], [2], [1], [1], [0, 0, 0, 1, 1, 1], [0], [0]>} : vector<2x8x16xbf16>, vector<2x8x16xbf16>, vector<2x8x8xf32> -> vector<2x8x8xf32>
    "tpu.trace_stop"() : () -> ()
    %178 = vector.broadcast %17 : vector<1x8x8xf32> to vector<2x8x8xf32>
    %179 = arith.addf %177, %178 : vector<2x8x8xf32>
    %cst_110 = arith.constant dense<0xFF800000> : vector<2x8xf32>
    %180 = vector.multi_reduction <maximumf>, %179, %cst_110 [2] : vector<2x8x8xf32> to vector<2x8xf32>
    %181 = vector.shape_cast %180 : vector<2x8xf32> to vector<2x8x1xf32>
    %182 = vector.broadcast %181 : vector<2x8x1xf32> to vector<2x8x8xf32>
    %183 = arith.subf %179, %182 : vector<2x8x8xf32>
    %184 = math.exp %183 : vector<2x8x8xf32>
    %cst_111 = arith.constant dense<0.000000e+00> : vector<2x8xf32>
    %185 = vector.multi_reduction <add>, %184, %cst_111 [2] : vector<2x8x8xf32> to vector<2x8xf32>
    %186 = vector.shape_cast %185 : vector<2x8xf32> to vector<2x8x1xf32>
    %187 = tpu.reciprocal %186 {approx = true} : vector<2x8x1xf32> -> vector<2x8x1xf32>
    %188 = vector.broadcast %187 : vector<2x8x1xf32> to vector<2x8x8xf32>
    %189 = arith.mulf %184, %188 : vector<2x8x8xf32>
    %190 = arith.truncf %189 : vector<2x8x8xf32> to vector<2x8x8xbf16>
    "tpu.trace_start"() <{level = 10 : i32, message = "bqk,bkd->bqd"}> : () -> ()
    %cst_112 = arith.constant dense<0.000000e+00> : vector<2x8x16xf32>
    %191 = tpu.matmul %190, %176, %cst_112 {dimension_numbers = #tpu.dot_dimension_numbers<[2], [1], [1], [2], [0, 0, 0, 1, 1, 2], [0], [0]>} : vector<2x8x8xbf16>, vector<2x8x16xbf16>, vector<2x8x16xf32> -> vector<2x8x16xf32>
    "tpu.trace_stop"() : () -> ()
    %192 = vector.shape_cast %191 : vector<2x8x16xf32> to vector<16x16xf32>
    %193 = arith.truncf %192 : vector<16x16xf32> to vector<16x16xbf16>
    %c0_113 = arith.constant 0 : index
    %c3_114 = arith.constant 3 : index
    %c0_115 = arith.constant 0 : index
    %c0_116 = arith.constant 0 : index
    %194 = vector.load %arg9[%c0_113, %c3_114, %c0_115, %c0_116] : memref<2x4x16x64xbf16, #tpu.memory_space<vmem>>, vector<1x1x16x64xbf16>
    %195 = vector.shape_cast %194 : vector<1x1x16x64xbf16> to vector<16x64xbf16>
    %cst_117 = arith.constant dense<0.000000e+00> : vector<16x64xf32>
    %196 = tpu.matmul %193, %195, %cst_117 {dimension_numbers = #tpu.dot_dimension_numbers<[1], [0], [0], [1], [0, 0, 1, 1], [], []>} : vector<16x16xbf16>, vector<16x64xbf16>, vector<16x64xf32> -> vector<16x64xf32>
    %197 = arith.addf %159, %196 : vector<16x64xf32>
    %198 = arith.addf %10, %197 : vector<16x64xf32>
    %c0_118 = arith.constant 0 : index
    %c0_119 = arith.constant 0 : index
    %c0_120 = arith.constant 0 : index
    %199 = vector.load %arg11[%c0_118, %c0_119, %c0_120] : memref<2x1x64xf32, #tpu.memory_space<vmem>>, vector<1x1x64xf32>
    %200 = vector.shape_cast %199 : vector<1x1x64xf32> to vector<1x64xf32>
    %c0_121 = arith.constant 0 : index
    %c0_122 = arith.constant 0 : index
    %c0_123 = arith.constant 0 : index
    %201 = vector.load %arg12[%c0_121, %c0_122, %c0_123] : memref<2x1x64xf32, #tpu.memory_space<vmem>>, vector<1x1x64xf32>
    %202 = vector.shape_cast %201 : vector<1x1x64xf32> to vector<1x64xf32>
    %cst_124 = arith.constant dense<0.000000e+00> : vector<16xf32>
    %203 = vector.multi_reduction <add>, %198, %cst_124 [1] : vector<16x64xf32> to vector<16xf32>
    %204 = vector.shape_cast %203 : vector<16xf32> to vector<16x1xf32>
    %cst_125 = arith.constant 6.400000e+01 : f32
    %205 = vector.broadcast %cst_125 : f32 to vector<16x1xf32>
    %206 = arith.divf %204, %205 : vector<16x1xf32>
    %207 = vector.broadcast %206 : vector<16x1xf32> to vector<16x64xf32>
    %208 = arith.subf %198, %207 : vector<16x64xf32>
    %209 = arith.mulf %208, %208 : vector<16x64xf32>
    %cst_126 = arith.constant dense<0.000000e+00> : vector<16xf32>
    %210 = vector.multi_reduction <add>, %209, %cst_126 [1] : vector<16x64xf32> to vector<16xf32>
    %211 = vector.shape_cast %210 : vector<16xf32> to vector<16x1xf32>
    %cst_127 = arith.constant 6.400000e+01 : f32
    %212 = vector.broadcast %cst_127 : f32 to vector<16x1xf32>
    %213 = arith.divf %211, %212 : vector<16x1xf32>
    %cst_128 = arith.constant 9.99999974E-6 : f32
    %214 = vector.broadcast %cst_128 : f32 to vector<16x1xf32>
    %215 = arith.addf %213, %214 : vector<16x1xf32>
    %216 = math.rsqrt %215 : vector<16x1xf32>
    %217 = vector.broadcast %216 : vector<16x1xf32> to vector<16x64xf32>
    %218 = arith.mulf %208, %217 : vector<16x64xf32>
    %219 = vector.broadcast %200 : vector<1x64xf32> to vector<16x64xf32>
    %220 = arith.mulf %218, %219 : vector<16x64xf32>
    %221 = vector.broadcast %202 : vector<1x64xf32> to vector<16x64xf32>
    %222 = arith.addf %220, %221 : vector<16x64xf32>
    %223 = arith.truncf %222 : vector<16x64xf32> to vector<16x64xbf16>
    %c0_129 = arith.constant 0 : index
    %c0_130 = arith.constant 0 : index
    %c0_131 = arith.constant 0 : index
    %224 = vector.load %arg13[%c0_129, %c0_130, %c0_131] : memref<2x64x256xbf16, #tpu.memory_space<vmem>>, vector<1x64x256xbf16>
    %225 = vector.shape_cast %224 : vector<1x64x256xbf16> to vector<64x256xbf16>
    %cst_132 = arith.constant dense<0.000000e+00> : vector<16x256xf32>
    %226 = tpu.matmul %223, %225, %cst_132 {dimension_numbers = #tpu.dot_dimension_numbers<[1], [0], [0], [1], [0, 0, 1, 1], [], []>} : vector<16x64xbf16>, vector<64x256xbf16>, vector<16x256xf32> -> vector<16x256xf32>
    %c0_133 = arith.constant 0 : index
    %c0_134 = arith.constant 0 : index
    %c0_135 = arith.constant 0 : index
    %227 = vector.load %arg14[%c0_133, %c0_134, %c0_135] : memref<2x1x256xf32, #tpu.memory_space<vmem>>, vector<1x1x256xf32>
    %228 = vector.shape_cast %227 : vector<1x1x256xf32> to vector<1x256xf32>
    %229 = vector.broadcast %228 : vector<1x256xf32> to vector<16x256xf32>
    %230 = arith.addf %226, %229 : vector<16x256xf32>
    %cst_136 = arith.constant 0.000000e+00 : f32
    %231 = vector.broadcast %cst_136 : f32 to vector<16x256xf32>
    %232 = arith.maximumf %230, %231 : vector<16x256xf32>
    %233 = arith.truncf %232 : vector<16x256xf32> to vector<16x256xbf16>
    %c0_137 = arith.constant 0 : index
    %c0_138 = arith.constant 0 : index
    %c0_139 = arith.constant 0 : index
    %234 = vector.load %arg15[%c0_137, %c0_138, %c0_139] : memref<2x256x64xbf16, #tpu.memory_space<vmem>>, vector<1x256x64xbf16>
    %235 = vector.shape_cast %234 : vector<1x256x64xbf16> to vector<256x64xbf16>
    %cst_140 = arith.constant dense<0.000000e+00> : vector<16x64xf32>
    %236 = tpu.matmul %233, %235, %cst_140 {dimension_numbers = #tpu.dot_dimension_numbers<[1], [0], [0], [1], [0, 0, 1, 1], [], []>} : vector<16x256xbf16>, vector<256x64xbf16>, vector<16x64xf32> -> vector<16x64xf32>
    %c0_141 = arith.constant 0 : index
    %c0_142 = arith.constant 0 : index
    %c0_143 = arith.constant 0 : index
    %237 = vector.load %arg16[%c0_141, %c0_142, %c0_143] : memref<2x1x64xf32, #tpu.memory_space<vmem>>, vector<1x1x64xf32>
    %238 = vector.shape_cast %237 : vector<1x1x64xf32> to vector<1x64xf32>
    %239 = vector.broadcast %238 : vector<1x64xf32> to vector<16x64xf32>
    %240 = arith.addf %236, %239 : vector<16x64xf32>
    %241 = arith.addf %198, %240 : vector<16x64xf32>
    %c1_144 = arith.constant 1 : index
    %c0_145 = arith.constant 0 : index
    %c0_146 = arith.constant 0 : index
    %242 = vector.load %arg4[%c1_144, %c0_145, %c0_146] : memref<2x1x64xf32, #tpu.memory_space<vmem>>, vector<1x1x64xf32>
    %243 = vector.shape_cast %242 : vector<1x1x64xf32> to vector<1x64xf32>
    %c1_147 = arith.constant 1 : index
    %c0_148 = arith.constant 0 : index
    %c0_149 = arith.constant 0 : index
    %244 = vector.load %arg5[%c1_147, %c0_148, %c0_149] : memref<2x1x64xf32, #tpu.memory_space<vmem>>, vector<1x1x64xf32>
    %245 = vector.shape_cast %244 : vector<1x1x64xf32> to vector<1x64xf32>
    %cst_150 = arith.constant dense<0.000000e+00> : vector<16xf32>
    %246 = vector.multi_reduction <add>, %241, %cst_150 [1] : vector<16x64xf32> to vector<16xf32>
    %247 = vector.shape_cast %246 : vector<16xf32> to vector<16x1xf32>
    %cst_151 = arith.constant 6.400000e+01 : f32
    %248 = vector.broadcast %cst_151 : f32 to vector<16x1xf32>
    %249 = arith.divf %247, %248 : vector<16x1xf32>
    %250 = vector.broadcast %249 : vector<16x1xf32> to vector<16x64xf32>
    %251 = arith.subf %241, %250 : vector<16x64xf32>
    %252 = arith.mulf %251, %251 : vector<16x64xf32>
    %cst_152 = arith.constant dense<0.000000e+00> : vector<16xf32>
    %253 = vector.multi_reduction <add>, %252, %cst_152 [1] : vector<16x64xf32> to vector<16xf32>
    %254 = vector.shape_cast %253 : vector<16xf32> to vector<16x1xf32>
    %cst_153 = arith.constant 6.400000e+01 : f32
    %255 = vector.broadcast %cst_153 : f32 to vector<16x1xf32>
    %256 = arith.divf %254, %255 : vector<16x1xf32>
    %cst_154 = arith.constant 9.99999974E-6 : f32
    %257 = vector.broadcast %cst_154 : f32 to vector<16x1xf32>
    %258 = arith.addf %256, %257 : vector<16x1xf32>
    %259 = math.rsqrt %258 : vector<16x1xf32>
    %260 = vector.broadcast %259 : vector<16x1xf32> to vector<16x64xf32>
    %261 = arith.mulf %251, %260 : vector<16x64xf32>
    %262 = vector.broadcast %243 : vector<1x64xf32> to vector<16x64xf32>
    %263 = arith.mulf %261, %262 : vector<16x64xf32>
    %264 = vector.broadcast %245 : vector<1x64xf32> to vector<16x64xf32>
    %265 = arith.addf %263, %264 : vector<16x64xf32>
    %266 = arith.truncf %265 : vector<16x64xf32> to vector<16x64xbf16>
    %c1_155 = arith.constant 1 : index
    %c0_156 = arith.constant 0 : index
    %c0_157 = arith.constant 0 : index
    %267 = vector.load %arg10[%c1_155, %c0_156, %c0_157] : memref<2x1x64xf32, #tpu.memory_space<vmem>>, vector<1x1x64xf32>
    %268 = vector.shape_cast %267 : vector<1x1x64xf32> to vector<1x64xf32>
    %c1_158 = arith.constant 1 : index
    %c0_159 = arith.constant 0 : index
    %c0_160 = arith.constant 0 : index
    %c0_161 = arith.constant 0 : index
    %269 = vector.load %arg6[%c1_158, %c0_159, %c0_160, %c0_161] : memref<2x4x64x16xbf16, #tpu.memory_space<vmem>>, vector<1x1x64x16xbf16>
    %270 = vector.shape_cast %269 : vector<1x1x64x16xbf16> to vector<64x16xbf16>
    %cst_162 = arith.constant dense<0.000000e+00> : vector<16x16xf32>
    %271 = tpu.matmul %266, %270, %cst_162 {dimension_numbers = #tpu.dot_dimension_numbers<[1], [0], [0], [1], [0, 0, 1, 1], [], []>} : vector<16x64xbf16>, vector<64x16xbf16>, vector<16x16xf32> -> vector<16x16xf32>
    %c1_163 = arith.constant 1 : index
    %c0_164 = arith.constant 0 : index
    %c0_165 = arith.constant 0 : index
    %c0_166 = arith.constant 0 : index
    %272 = vector.load %arg7[%c1_163, %c0_164, %c0_165, %c0_166] : memref<2x4x64x16xbf16, #tpu.memory_space<vmem>>, vector<1x1x64x16xbf16>
    %273 = vector.shape_cast %272 : vector<1x1x64x16xbf16> to vector<64x16xbf16>
    %cst_167 = arith.constant dense<0.000000e+00> : vector<16x16xf32>
    %274 = tpu.matmul %266, %273, %cst_167 {dimension_numbers = #tpu.dot_dimension_numbers<[1], [0], [0], [1], [0, 0, 1, 1], [], []>} : vector<16x64xbf16>, vector<64x16xbf16>, vector<16x16xf32> -> vector<16x16xf32>
    %c1_168 = arith.constant 1 : index
    %c0_169 = arith.constant 0 : index
    %c0_170 = arith.constant 0 : index
    %c0_171 = arith.constant 0 : index
    %275 = vector.load %arg8[%c1_168, %c0_169, %c0_170, %c0_171] : memref<2x4x64x16xbf16, #tpu.memory_space<vmem>>, vector<1x1x64x16xbf16>
    %276 = vector.shape_cast %275 : vector<1x1x64x16xbf16> to vector<64x16xbf16>
    %cst_172 = arith.constant dense<0.000000e+00> : vector<16x16xf32>
    %277 = tpu.matmul %266, %276, %cst_172 {dimension_numbers = #tpu.dot_dimension_numbers<[1], [0], [0], [1], [0, 0, 1, 1], [], []>} : vector<16x64xbf16>, vector<64x16xbf16>, vector<16x16xf32> -> vector<16x16xf32>
    %cst_173 = arith.constant 2.500000e-01 : f32
    %278 = vector.broadcast %cst_173 : f32 to vector<16x16xf32>
    %279 = arith.mulf %271, %278 : vector<16x16xf32>
    %280 = vector.shape_cast %279 : vector<16x16xf32> to vector<2x8x16xf32>
    %281 = arith.truncf %280 : vector<2x8x16xf32> to vector<2x8x16xbf16>
    %282 = vector.shape_cast %274 : vector<16x16xf32> to vector<2x8x16xf32>
    %283 = arith.truncf %282 : vector<2x8x16xf32> to vector<2x8x16xbf16>
    %284 = vector.shape_cast %277 : vector<16x16xf32> to vector<2x8x16xf32>
    %285 = arith.truncf %284 : vector<2x8x16xf32> to vector<2x8x16xbf16>
    "tpu.trace_start"() <{level = 10 : i32, message = "bqd,bkd->bqk"}> : () -> ()
    %cst_174 = arith.constant dense<0.000000e+00> : vector<2x8x8xf32>
    %286 = tpu.matmul %281, %283, %cst_174 {dimension_numbers = #tpu.dot_dimension_numbers<[2], [2], [1], [1], [0, 0, 0, 1, 1, 1], [0], [0]>} : vector<2x8x16xbf16>, vector<2x8x16xbf16>, vector<2x8x8xf32> -> vector<2x8x8xf32>
    "tpu.trace_stop"() : () -> ()
    %287 = vector.broadcast %17 : vector<1x8x8xf32> to vector<2x8x8xf32>
    %288 = arith.addf %286, %287 : vector<2x8x8xf32>
    %cst_175 = arith.constant dense<0xFF800000> : vector<2x8xf32>
    %289 = vector.multi_reduction <maximumf>, %288, %cst_175 [2] : vector<2x8x8xf32> to vector<2x8xf32>
    %290 = vector.shape_cast %289 : vector<2x8xf32> to vector<2x8x1xf32>
    %291 = vector.broadcast %290 : vector<2x8x1xf32> to vector<2x8x8xf32>
    %292 = arith.subf %288, %291 : vector<2x8x8xf32>
    %293 = math.exp %292 : vector<2x8x8xf32>
    %cst_176 = arith.constant dense<0.000000e+00> : vector<2x8xf32>
    %294 = vector.multi_reduction <add>, %293, %cst_176 [2] : vector<2x8x8xf32> to vector<2x8xf32>
    %295 = vector.shape_cast %294 : vector<2x8xf32> to vector<2x8x1xf32>
    %296 = tpu.reciprocal %295 {approx = true} : vector<2x8x1xf32> -> vector<2x8x1xf32>
    %297 = vector.broadcast %296 : vector<2x8x1xf32> to vector<2x8x8xf32>
    %298 = arith.mulf %293, %297 : vector<2x8x8xf32>
    %299 = arith.truncf %298 : vector<2x8x8xf32> to vector<2x8x8xbf16>
    "tpu.trace_start"() <{level = 10 : i32, message = "bqk,bkd->bqd"}> : () -> ()
    %cst_177 = arith.constant dense<0.000000e+00> : vector<2x8x16xf32>
    %300 = tpu.matmul %299, %285, %cst_177 {dimension_numbers = #tpu.dot_dimension_numbers<[2], [1], [1], [2], [0, 0, 0, 1, 1, 2], [0], [0]>} : vector<2x8x8xbf16>, vector<2x8x16xbf16>, vector<2x8x16xf32> -> vector<2x8x16xf32>
    "tpu.trace_stop"() : () -> ()
    %301 = vector.shape_cast %300 : vector<2x8x16xf32> to vector<16x16xf32>
    %302 = arith.truncf %301 : vector<16x16xf32> to vector<16x16xbf16>
    %c1_178 = arith.constant 1 : index
    %c0_179 = arith.constant 0 : index
    %c0_180 = arith.constant 0 : index
    %c0_181 = arith.constant 0 : index
    %303 = vector.load %arg9[%c1_178, %c0_179, %c0_180, %c0_181] : memref<2x4x16x64xbf16, #tpu.memory_space<vmem>>, vector<1x1x16x64xbf16>
    %304 = vector.shape_cast %303 : vector<1x1x16x64xbf16> to vector<16x64xbf16>
    %cst_182 = arith.constant dense<0.000000e+00> : vector<16x64xf32>
    %305 = tpu.matmul %302, %304, %cst_182 {dimension_numbers = #tpu.dot_dimension_numbers<[1], [0], [0], [1], [0, 0, 1, 1], [], []>} : vector<16x16xbf16>, vector<16x64xbf16>, vector<16x64xf32> -> vector<16x64xf32>
    %306 = vector.broadcast %268 : vector<1x64xf32> to vector<16x64xf32>
    %307 = arith.addf %306, %305 : vector<16x64xf32>
    %c1_183 = arith.constant 1 : index
    %c1_184 = arith.constant 1 : index
    %c0_185 = arith.constant 0 : index
    %c0_186 = arith.constant 0 : index
    %308 = vector.load %arg6[%c1_183, %c1_184, %c0_185, %c0_186] : memref<2x4x64x16xbf16, #tpu.memory_space<vmem>>, vector<1x1x64x16xbf16>
    %309 = vector.shape_cast %308 : vector<1x1x64x16xbf16> to vector<64x16xbf16>
    %cst_187 = arith.constant dense<0.000000e+00> : vector<16x16xf32>
    %310 = tpu.matmul %266, %309, %cst_187 {dimension_numbers = #tpu.dot_dimension_numbers<[1], [0], [0], [1], [0, 0, 1, 1], [], []>} : vector<16x64xbf16>, vector<64x16xbf16>, vector<16x16xf32> -> vector<16x16xf32>
    %c1_188 = arith.constant 1 : index
    %c1_189 = arith.constant 1 : index
    %c0_190 = arith.constant 0 : index
    %c0_191 = arith.constant 0 : index
    %311 = vector.load %arg7[%c1_188, %c1_189, %c0_190, %c0_191] : memref<2x4x64x16xbf16, #tpu.memory_space<vmem>>, vector<1x1x64x16xbf16>
    %312 = vector.shape_cast %311 : vector<1x1x64x16xbf16> to vector<64x16xbf16>
    %cst_192 = arith.constant dense<0.000000e+00> : vector<16x16xf32>
    %313 = tpu.matmul %266, %312, %cst_192 {dimension_numbers = #tpu.dot_dimension_numbers<[1], [0], [0], [1], [0, 0, 1, 1], [], []>} : vector<16x64xbf16>, vector<64x16xbf16>, vector<16x16xf32> -> vector<16x16xf32>
    %c1_193 = arith.constant 1 : index
    %c1_194 = arith.constant 1 : index
    %c0_195 = arith.constant 0 : index
    %c0_196 = arith.constant 0 : index
    %314 = vector.load %arg8[%c1_193, %c1_194, %c0_195, %c0_196] : memref<2x4x64x16xbf16, #tpu.memory_space<vmem>>, vector<1x1x64x16xbf16>
    %315 = vector.shape_cast %314 : vector<1x1x64x16xbf16> to vector<64x16xbf16>
    %cst_197 = arith.constant dense<0.000000e+00> : vector<16x16xf32>
    %316 = tpu.matmul %266, %315, %cst_197 {dimension_numbers = #tpu.dot_dimension_numbers<[1], [0], [0], [1], [0, 0, 1, 1], [], []>} : vector<16x64xbf16>, vector<64x16xbf16>, vector<16x16xf32> -> vector<16x16xf32>
    %cst_198 = arith.constant 2.500000e-01 : f32
    %317 = vector.broadcast %cst_198 : f32 to vector<16x16xf32>
    %318 = arith.mulf %310, %317 : vector<16x16xf32>
    %319 = vector.shape_cast %318 : vector<16x16xf32> to vector<2x8x16xf32>
    %320 = arith.truncf %319 : vector<2x8x16xf32> to vector<2x8x16xbf16>
    %321 = vector.shape_cast %313 : vector<16x16xf32> to vector<2x8x16xf32>
    %322 = arith.truncf %321 : vector<2x8x16xf32> to vector<2x8x16xbf16>
    %323 = vector.shape_cast %316 : vector<16x16xf32> to vector<2x8x16xf32>
    %324 = arith.truncf %323 : vector<2x8x16xf32> to vector<2x8x16xbf16>
    "tpu.trace_start"() <{level = 10 : i32, message = "bqd,bkd->bqk"}> : () -> ()
    %cst_199 = arith.constant dense<0.000000e+00> : vector<2x8x8xf32>
    %325 = tpu.matmul %320, %322, %cst_199 {dimension_numbers = #tpu.dot_dimension_numbers<[2], [2], [1], [1], [0, 0, 0, 1, 1, 1], [0], [0]>} : vector<2x8x16xbf16>, vector<2x8x16xbf16>, vector<2x8x8xf32> -> vector<2x8x8xf32>
    "tpu.trace_stop"() : () -> ()
    %326 = vector.broadcast %17 : vector<1x8x8xf32> to vector<2x8x8xf32>
    %327 = arith.addf %325, %326 : vector<2x8x8xf32>
    %cst_200 = arith.constant dense<0xFF800000> : vector<2x8xf32>
    %328 = vector.multi_reduction <maximumf>, %327, %cst_200 [2] : vector<2x8x8xf32> to vector<2x8xf32>
    %329 = vector.shape_cast %328 : vector<2x8xf32> to vector<2x8x1xf32>
    %330 = vector.broadcast %329 : vector<2x8x1xf32> to vector<2x8x8xf32>
    %331 = arith.subf %327, %330 : vector<2x8x8xf32>
    %332 = math.exp %331 : vector<2x8x8xf32>
    %cst_201 = arith.constant dense<0.000000e+00> : vector<2x8xf32>
    %333 = vector.multi_reduction <add>, %332, %cst_201 [2] : vector<2x8x8xf32> to vector<2x8xf32>
    %334 = vector.shape_cast %333 : vector<2x8xf32> to vector<2x8x1xf32>
    %335 = tpu.reciprocal %334 {approx = true} : vector<2x8x1xf32> -> vector<2x8x1xf32>
    %336 = vector.broadcast %335 : vector<2x8x1xf32> to vector<2x8x8xf32>
    %337 = arith.mulf %332, %336 : vector<2x8x8xf32>
    %338 = arith.truncf %337 : vector<2x8x8xf32> to vector<2x8x8xbf16>
    "tpu.trace_start"() <{level = 10 : i32, message = "bqk,bkd->bqd"}> : () -> ()
    %cst_202 = arith.constant dense<0.000000e+00> : vector<2x8x16xf32>
    %339 = tpu.matmul %338, %324, %cst_202 {dimension_numbers = #tpu.dot_dimension_numbers<[2], [1], [1], [2], [0, 0, 0, 1, 1, 2], [0], [0]>} : vector<2x8x8xbf16>, vector<2x8x16xbf16>, vector<2x8x16xf32> -> vector<2x8x16xf32>
    "tpu.trace_stop"() : () -> ()
    %340 = vector.shape_cast %339 : vector<2x8x16xf32> to vector<16x16xf32>
    %341 = arith.truncf %340 : vector<16x16xf32> to vector<16x16xbf16>
    %c1_203 = arith.constant 1 : index
    %c1_204 = arith.constant 1 : index
    %c0_205 = arith.constant 0 : index
    %c0_206 = arith.constant 0 : index
    %342 = vector.load %arg9[%c1_203, %c1_204, %c0_205, %c0_206] : memref<2x4x16x64xbf16, #tpu.memory_space<vmem>>, vector<1x1x16x64xbf16>
    %343 = vector.shape_cast %342 : vector<1x1x16x64xbf16> to vector<16x64xbf16>
    %cst_207 = arith.constant dense<0.000000e+00> : vector<16x64xf32>
    %344 = tpu.matmul %341, %343, %cst_207 {dimension_numbers = #tpu.dot_dimension_numbers<[1], [0], [0], [1], [0, 0, 1, 1], [], []>} : vector<16x16xbf16>, vector<16x64xbf16>, vector<16x64xf32> -> vector<16x64xf32>
    %345 = arith.addf %307, %344 : vector<16x64xf32>
    %c1_208 = arith.constant 1 : index
    %c2_209 = arith.constant 2 : index
    %c0_210 = arith.constant 0 : index
    %c0_211 = arith.constant 0 : index
    %346 = vector.load %arg6[%c1_208, %c2_209, %c0_210, %c0_211] : memref<2x4x64x16xbf16, #tpu.memory_space<vmem>>, vector<1x1x64x16xbf16>
    %347 = vector.shape_cast %346 : vector<1x1x64x16xbf16> to vector<64x16xbf16>
    %cst_212 = arith.constant dense<0.000000e+00> : vector<16x16xf32>
    %348 = tpu.matmul %266, %347, %cst_212 {dimension_numbers = #tpu.dot_dimension_numbers<[1], [0], [0], [1], [0, 0, 1, 1], [], []>} : vector<16x64xbf16>, vector<64x16xbf16>, vector<16x16xf32> -> vector<16x16xf32>
    %c1_213 = arith.constant 1 : index
    %c2_214 = arith.constant 2 : index
    %c0_215 = arith.constant 0 : index
    %c0_216 = arith.constant 0 : index
    %349 = vector.load %arg7[%c1_213, %c2_214, %c0_215, %c0_216] : memref<2x4x64x16xbf16, #tpu.memory_space<vmem>>, vector<1x1x64x16xbf16>
    %350 = vector.shape_cast %349 : vector<1x1x64x16xbf16> to vector<64x16xbf16>
    %cst_217 = arith.constant dense<0.000000e+00> : vector<16x16xf32>
    %351 = tpu.matmul %266, %350, %cst_217 {dimension_numbers = #tpu.dot_dimension_numbers<[1], [0], [0], [1], [0, 0, 1, 1], [], []>} : vector<16x64xbf16>, vector<64x16xbf16>, vector<16x16xf32> -> vector<16x16xf32>
    %c1_218 = arith.constant 1 : index
    %c2_219 = arith.constant 2 : index
    %c0_220 = arith.constant 0 : index
    %c0_221 = arith.constant 0 : index
    %352 = vector.load %arg8[%c1_218, %c2_219, %c0_220, %c0_221] : memref<2x4x64x16xbf16, #tpu.memory_space<vmem>>, vector<1x1x64x16xbf16>
    %353 = vector.shape_cast %352 : vector<1x1x64x16xbf16> to vector<64x16xbf16>
    %cst_222 = arith.constant dense<0.000000e+00> : vector<16x16xf32>
    %354 = tpu.matmul %266, %353, %cst_222 {dimension_numbers = #tpu.dot_dimension_numbers<[1], [0], [0], [1], [0, 0, 1, 1], [], []>} : vector<16x64xbf16>, vector<64x16xbf16>, vector<16x16xf32> -> vector<16x16xf32>
    %cst_223 = arith.constant 2.500000e-01 : f32
    %355 = vector.broadcast %cst_223 : f32 to vector<16x16xf32>
    %356 = arith.mulf %348, %355 : vector<16x16xf32>
    %357 = vector.shape_cast %356 : vector<16x16xf32> to vector<2x8x16xf32>
    %358 = arith.truncf %357 : vector<2x8x16xf32> to vector<2x8x16xbf16>
    %359 = vector.shape_cast %351 : vector<16x16xf32> to vector<2x8x16xf32>
    %360 = arith.truncf %359 : vector<2x8x16xf32> to vector<2x8x16xbf16>
    %361 = vector.shape_cast %354 : vector<16x16xf32> to vector<2x8x16xf32>
    %362 = arith.truncf %361 : vector<2x8x16xf32> to vector<2x8x16xbf16>
    "tpu.trace_start"() <{level = 10 : i32, message = "bqd,bkd->bqk"}> : () -> ()
    %cst_224 = arith.constant dense<0.000000e+00> : vector<2x8x8xf32>
    %363 = tpu.matmul %358, %360, %cst_224 {dimension_numbers = #tpu.dot_dimension_numbers<[2], [2], [1], [1], [0, 0, 0, 1, 1, 1], [0], [0]>} : vector<2x8x16xbf16>, vector<2x8x16xbf16>, vector<2x8x8xf32> -> vector<2x8x8xf32>
    "tpu.trace_stop"() : () -> ()
    %364 = vector.broadcast %17 : vector<1x8x8xf32> to vector<2x8x8xf32>
    %365 = arith.addf %363, %364 : vector<2x8x8xf32>
    %cst_225 = arith.constant dense<0xFF800000> : vector<2x8xf32>
    %366 = vector.multi_reduction <maximumf>, %365, %cst_225 [2] : vector<2x8x8xf32> to vector<2x8xf32>
    %367 = vector.shape_cast %366 : vector<2x8xf32> to vector<2x8x1xf32>
    %368 = vector.broadcast %367 : vector<2x8x1xf32> to vector<2x8x8xf32>
    %369 = arith.subf %365, %368 : vector<2x8x8xf32>
    %370 = math.exp %369 : vector<2x8x8xf32>
    %cst_226 = arith.constant dense<0.000000e+00> : vector<2x8xf32>
    %371 = vector.multi_reduction <add>, %370, %cst_226 [2] : vector<2x8x8xf32> to vector<2x8xf32>
    %372 = vector.shape_cast %371 : vector<2x8xf32> to vector<2x8x1xf32>
    %373 = tpu.reciprocal %372 {approx = true} : vector<2x8x1xf32> -> vector<2x8x1xf32>
    %374 = vector.broadcast %373 : vector<2x8x1xf32> to vector<2x8x8xf32>
    %375 = arith.mulf %370, %374 : vector<2x8x8xf32>
    %376 = arith.truncf %375 : vector<2x8x8xf32> to vector<2x8x8xbf16>
    "tpu.trace_start"() <{level = 10 : i32, message = "bqk,bkd->bqd"}> : () -> ()
    %cst_227 = arith.constant dense<0.000000e+00> : vector<2x8x16xf32>
    %377 = tpu.matmul %376, %362, %cst_227 {dimension_numbers = #tpu.dot_dimension_numbers<[2], [1], [1], [2], [0, 0, 0, 1, 1, 2], [0], [0]>} : vector<2x8x8xbf16>, vector<2x8x16xbf16>, vector<2x8x16xf32> -> vector<2x8x16xf32>
    "tpu.trace_stop"() : () -> ()
    %378 = vector.shape_cast %377 : vector<2x8x16xf32> to vector<16x16xf32>
    %379 = arith.truncf %378 : vector<16x16xf32> to vector<16x16xbf16>
    %c1_228 = arith.constant 1 : index
    %c2_229 = arith.constant 2 : index
    %c0_230 = arith.constant 0 : index
    %c0_231 = arith.constant 0 : index
    %380 = vector.load %arg9[%c1_228, %c2_229, %c0_230, %c0_231] : memref<2x4x16x64xbf16, #tpu.memory_space<vmem>>, vector<1x1x16x64xbf16>
    %381 = vector.shape_cast %380 : vector<1x1x16x64xbf16> to vector<16x64xbf16>
    %cst_232 = arith.constant dense<0.000000e+00> : vector<16x64xf32>
    %382 = tpu.matmul %379, %381, %cst_232 {dimension_numbers = #tpu.dot_dimension_numbers<[1], [0], [0], [1], [0, 0, 1, 1], [], []>} : vector<16x16xbf16>, vector<16x64xbf16>, vector<16x64xf32> -> vector<16x64xf32>
    %383 = arith.addf %345, %382 : vector<16x64xf32>
    %c1_233 = arith.constant 1 : index
    %c3_234 = arith.constant 3 : index
    %c0_235 = arith.constant 0 : index
    %c0_236 = arith.constant 0 : index
    %384 = vector.load %arg6[%c1_233, %c3_234, %c0_235, %c0_236] : memref<2x4x64x16xbf16, #tpu.memory_space<vmem>>, vector<1x1x64x16xbf16>
    %385 = vector.shape_cast %384 : vector<1x1x64x16xbf16> to vector<64x16xbf16>
    %cst_237 = arith.constant dense<0.000000e+00> : vector<16x16xf32>
    %386 = tpu.matmul %266, %385, %cst_237 {dimension_numbers = #tpu.dot_dimension_numbers<[1], [0], [0], [1], [0, 0, 1, 1], [], []>} : vector<16x64xbf16>, vector<64x16xbf16>, vector<16x16xf32> -> vector<16x16xf32>
    %c1_238 = arith.constant 1 : index
    %c3_239 = arith.constant 3 : index
    %c0_240 = arith.constant 0 : index
    %c0_241 = arith.constant 0 : index
    %387 = vector.load %arg7[%c1_238, %c3_239, %c0_240, %c0_241] : memref<2x4x64x16xbf16, #tpu.memory_space<vmem>>, vector<1x1x64x16xbf16>
    %388 = vector.shape_cast %387 : vector<1x1x64x16xbf16> to vector<64x16xbf16>
    %cst_242 = arith.constant dense<0.000000e+00> : vector<16x16xf32>
    %389 = tpu.matmul %266, %388, %cst_242 {dimension_numbers = #tpu.dot_dimension_numbers<[1], [0], [0], [1], [0, 0, 1, 1], [], []>} : vector<16x64xbf16>, vector<64x16xbf16>, vector<16x16xf32> -> vector<16x16xf32>
    %c1_243 = arith.constant 1 : index
    %c3_244 = arith.constant 3 : index
    %c0_245 = arith.constant 0 : index
    %c0_246 = arith.constant 0 : index
    %390 = vector.load %arg8[%c1_243, %c3_244, %c0_245, %c0_246] : memref<2x4x64x16xbf16, #tpu.memory_space<vmem>>, vector<1x1x64x16xbf16>
    %391 = vector.shape_cast %390 : vector<1x1x64x16xbf16> to vector<64x16xbf16>
    %cst_247 = arith.constant dense<0.000000e+00> : vector<16x16xf32>
    %392 = tpu.matmul %266, %391, %cst_247 {dimension_numbers = #tpu.dot_dimension_numbers<[1], [0], [0], [1], [0, 0, 1, 1], [], []>} : vector<16x64xbf16>, vector<64x16xbf16>, vector<16x16xf32> -> vector<16x16xf32>
    %cst_248 = arith.constant 2.500000e-01 : f32
    %393 = vector.broadcast %cst_248 : f32 to vector<16x16xf32>
    %394 = arith.mulf %386, %393 : vector<16x16xf32>
    %395 = vector.shape_cast %394 : vector<16x16xf32> to vector<2x8x16xf32>
    %396 = arith.truncf %395 : vector<2x8x16xf32> to vector<2x8x16xbf16>
    %397 = vector.shape_cast %389 : vector<16x16xf32> to vector<2x8x16xf32>
    %398 = arith.truncf %397 : vector<2x8x16xf32> to vector<2x8x16xbf16>
    %399 = vector.shape_cast %392 : vector<16x16xf32> to vector<2x8x16xf32>
    %400 = arith.truncf %399 : vector<2x8x16xf32> to vector<2x8x16xbf16>
    "tpu.trace_start"() <{level = 10 : i32, message = "bqd,bkd->bqk"}> : () -> ()
    %cst_249 = arith.constant dense<0.000000e+00> : vector<2x8x8xf32>
    %401 = tpu.matmul %396, %398, %cst_249 {dimension_numbers = #tpu.dot_dimension_numbers<[2], [2], [1], [1], [0, 0, 0, 1, 1, 1], [0], [0]>} : vector<2x8x16xbf16>, vector<2x8x16xbf16>, vector<2x8x8xf32> -> vector<2x8x8xf32>
    "tpu.trace_stop"() : () -> ()
    %402 = vector.broadcast %17 : vector<1x8x8xf32> to vector<2x8x8xf32>
    %403 = arith.addf %401, %402 : vector<2x8x8xf32>
    %cst_250 = arith.constant dense<0xFF800000> : vector<2x8xf32>
    %404 = vector.multi_reduction <maximumf>, %403, %cst_250 [2] : vector<2x8x8xf32> to vector<2x8xf32>
    %405 = vector.shape_cast %404 : vector<2x8xf32> to vector<2x8x1xf32>
    %406 = vector.broadcast %405 : vector<2x8x1xf32> to vector<2x8x8xf32>
    %407 = arith.subf %403, %406 : vector<2x8x8xf32>
    %408 = math.exp %407 : vector<2x8x8xf32>
    %cst_251 = arith.constant dense<0.000000e+00> : vector<2x8xf32>
    %409 = vector.multi_reduction <add>, %408, %cst_251 [2] : vector<2x8x8xf32> to vector<2x8xf32>
    %410 = vector.shape_cast %409 : vector<2x8xf32> to vector<2x8x1xf32>
    %411 = tpu.reciprocal %410 {approx = true} : vector<2x8x1xf32> -> vector<2x8x1xf32>
    %412 = vector.broadcast %411 : vector<2x8x1xf32> to vector<2x8x8xf32>
    %413 = arith.mulf %408, %412 : vector<2x8x8xf32>
    %414 = arith.truncf %413 : vector<2x8x8xf32> to vector<2x8x8xbf16>
    "tpu.trace_start"() <{level = 10 : i32, message = "bqk,bkd->bqd"}> : () -> ()
    %cst_252 = arith.constant dense<0.000000e+00> : vector<2x8x16xf32>
    %415 = tpu.matmul %414, %400, %cst_252 {dimension_numbers = #tpu.dot_dimension_numbers<[2], [1], [1], [2], [0, 0, 0, 1, 1, 2], [0], [0]>} : vector<2x8x8xbf16>, vector<2x8x16xbf16>, vector<2x8x16xf32> -> vector<2x8x16xf32>
    "tpu.trace_stop"() : () -> ()
    %416 = vector.shape_cast %415 : vector<2x8x16xf32> to vector<16x16xf32>
    %417 = arith.truncf %416 : vector<16x16xf32> to vector<16x16xbf16>
    %c1_253 = arith.constant 1 : index
    %c3_254 = arith.constant 3 : index
    %c0_255 = arith.constant 0 : index
    %c0_256 = arith.constant 0 : index
    %418 = vector.load %arg9[%c1_253, %c3_254, %c0_255, %c0_256] : memref<2x4x16x64xbf16, #tpu.memory_space<vmem>>, vector<1x1x16x64xbf16>
    %419 = vector.shape_cast %418 : vector<1x1x16x64xbf16> to vector<16x64xbf16>
    %cst_257 = arith.constant dense<0.000000e+00> : vector<16x64xf32>
    %420 = tpu.matmul %417, %419, %cst_257 {dimension_numbers = #tpu.dot_dimension_numbers<[1], [0], [0], [1], [0, 0, 1, 1], [], []>} : vector<16x16xbf16>, vector<16x64xbf16>, vector<16x64xf32> -> vector<16x64xf32>
    %421 = arith.addf %383, %420 : vector<16x64xf32>
    %422 = arith.addf %241, %421 : vector<16x64xf32>
    %c1_258 = arith.constant 1 : index
    %c0_259 = arith.constant 0 : index
    %c0_260 = arith.constant 0 : index
    %423 = vector.load %arg11[%c1_258, %c0_259, %c0_260] : memref<2x1x64xf32, #tpu.memory_space<vmem>>, vector<1x1x64xf32>
    %424 = vector.shape_cast %423 : vector<1x1x64xf32> to vector<1x64xf32>
    %c1_261 = arith.constant 1 : index
    %c0_262 = arith.constant 0 : index
    %c0_263 = arith.constant 0 : index
    %425 = vector.load %arg12[%c1_261, %c0_262, %c0_263] : memref<2x1x64xf32, #tpu.memory_space<vmem>>, vector<1x1x64xf32>
    %426 = vector.shape_cast %425 : vector<1x1x64xf32> to vector<1x64xf32>
    %cst_264 = arith.constant dense<0.000000e+00> : vector<16xf32>
    %427 = vector.multi_reduction <add>, %422, %cst_264 [1] : vector<16x64xf32> to vector<16xf32>
    %428 = vector.shape_cast %427 : vector<16xf32> to vector<16x1xf32>
    %cst_265 = arith.constant 6.400000e+01 : f32
    %429 = vector.broadcast %cst_265 : f32 to vector<16x1xf32>
    %430 = arith.divf %428, %429 : vector<16x1xf32>
    %431 = vector.broadcast %430 : vector<16x1xf32> to vector<16x64xf32>
    %432 = arith.subf %422, %431 : vector<16x64xf32>
    %433 = arith.mulf %432, %432 : vector<16x64xf32>
    %cst_266 = arith.constant dense<0.000000e+00> : vector<16xf32>
    %434 = vector.multi_reduction <add>, %433, %cst_266 [1] : vector<16x64xf32> to vector<16xf32>
    %435 = vector.shape_cast %434 : vector<16xf32> to vector<16x1xf32>
    %cst_267 = arith.constant 6.400000e+01 : f32
    %436 = vector.broadcast %cst_267 : f32 to vector<16x1xf32>
    %437 = arith.divf %435, %436 : vector<16x1xf32>
    %cst_268 = arith.constant 9.99999974E-6 : f32
    %438 = vector.broadcast %cst_268 : f32 to vector<16x1xf32>
    %439 = arith.addf %437, %438 : vector<16x1xf32>
    %440 = math.rsqrt %439 : vector<16x1xf32>
    %441 = vector.broadcast %440 : vector<16x1xf32> to vector<16x64xf32>
    %442 = arith.mulf %432, %441 : vector<16x64xf32>
    %443 = vector.broadcast %424 : vector<1x64xf32> to vector<16x64xf32>
    %444 = arith.mulf %442, %443 : vector<16x64xf32>
    %445 = vector.broadcast %426 : vector<1x64xf32> to vector<16x64xf32>
    %446 = arith.addf %444, %445 : vector<16x64xf32>
    %447 = arith.truncf %446 : vector<16x64xf32> to vector<16x64xbf16>
    %c1_269 = arith.constant 1 : index
    %c0_270 = arith.constant 0 : index
    %c0_271 = arith.constant 0 : index
    %448 = vector.load %arg13[%c1_269, %c0_270, %c0_271] : memref<2x64x256xbf16, #tpu.memory_space<vmem>>, vector<1x64x256xbf16>
    %449 = vector.shape_cast %448 : vector<1x64x256xbf16> to vector<64x256xbf16>
    %cst_272 = arith.constant dense<0.000000e+00> : vector<16x256xf32>
    %450 = tpu.matmul %447, %449, %cst_272 {dimension_numbers = #tpu.dot_dimension_numbers<[1], [0], [0], [1], [0, 0, 1, 1], [], []>} : vector<16x64xbf16>, vector<64x256xbf16>, vector<16x256xf32> -> vector<16x256xf32>
    %c1_273 = arith.constant 1 : index
    %c0_274 = arith.constant 0 : index
    %c0_275 = arith.constant 0 : index
    %451 = vector.load %arg14[%c1_273, %c0_274, %c0_275] : memref<2x1x256xf32, #tpu.memory_space<vmem>>, vector<1x1x256xf32>
    %452 = vector.shape_cast %451 : vector<1x1x256xf32> to vector<1x256xf32>
    %453 = vector.broadcast %452 : vector<1x256xf32> to vector<16x256xf32>
    %454 = arith.addf %450, %453 : vector<16x256xf32>
    %cst_276 = arith.constant 0.000000e+00 : f32
    %455 = vector.broadcast %cst_276 : f32 to vector<16x256xf32>
    %456 = arith.maximumf %454, %455 : vector<16x256xf32>
    %457 = arith.truncf %456 : vector<16x256xf32> to vector<16x256xbf16>
    %c1_277 = arith.constant 1 : index
    %c0_278 = arith.constant 0 : index
    %c0_279 = arith.constant 0 : index
    %458 = vector.load %arg15[%c1_277, %c0_278, %c0_279] : memref<2x256x64xbf16, #tpu.memory_space<vmem>>, vector<1x256x64xbf16>
    %459 = vector.shape_cast %458 : vector<1x256x64xbf16> to vector<256x64xbf16>
    %cst_280 = arith.constant dense<0.000000e+00> : vector<16x64xf32>
    %460 = tpu.matmul %457, %459, %cst_280 {dimension_numbers = #tpu.dot_dimension_numbers<[1], [0], [0], [1], [0, 0, 1, 1], [], []>} : vector<16x256xbf16>, vector<256x64xbf16>, vector<16x64xf32> -> vector<16x64xf32>
    %c1_281 = arith.constant 1 : index
    %c0_282 = arith.constant 0 : index
    %c0_283 = arith.constant 0 : index
    %461 = vector.load %arg16[%c1_281, %c0_282, %c0_283] : memref<2x1x64xf32, #tpu.memory_space<vmem>>, vector<1x1x64xf32>
    %462 = vector.shape_cast %461 : vector<1x1x64xf32> to vector<1x64xf32>
    %463 = vector.broadcast %462 : vector<1x64xf32> to vector<16x64xf32>
    %464 = arith.addf %460, %463 : vector<16x64xf32>
    %465 = arith.addf %422, %464 : vector<16x64xf32>
    %c0_284 = arith.constant 0 : index
    %c0_285 = arith.constant 0 : index
    %466 = vector.load %arg17[%c0_284, %c0_285] : memref<1x64xf32, #tpu.memory_space<vmem>>, vector<1x64xf32>
    %c0_286 = arith.constant 0 : index
    %c0_287 = arith.constant 0 : index
    %467 = vector.load %arg18[%c0_286, %c0_287] : memref<1x64xf32, #tpu.memory_space<vmem>>, vector<1x64xf32>
    %cst_288 = arith.constant dense<0.000000e+00> : vector<16xf32>
    %468 = vector.multi_reduction <add>, %465, %cst_288 [1] : vector<16x64xf32> to vector<16xf32>
    %469 = vector.shape_cast %468 : vector<16xf32> to vector<16x1xf32>
    %cst_289 = arith.constant 6.400000e+01 : f32
    %470 = vector.broadcast %cst_289 : f32 to vector<16x1xf32>
    %471 = arith.divf %469, %470 : vector<16x1xf32>
    %472 = vector.broadcast %471 : vector<16x1xf32> to vector<16x64xf32>
    %473 = arith.subf %465, %472 : vector<16x64xf32>
    %474 = arith.mulf %473, %473 : vector<16x64xf32>
    %cst_290 = arith.constant dense<0.000000e+00> : vector<16xf32>
    %475 = vector.multi_reduction <add>, %474, %cst_290 [1] : vector<16x64xf32> to vector<16xf32>
    %476 = vector.shape_cast %475 : vector<16xf32> to vector<16x1xf32>
    %cst_291 = arith.constant 6.400000e+01 : f32
    %477 = vector.broadcast %cst_291 : f32 to vector<16x1xf32>
    %478 = arith.divf %476, %477 : vector<16x1xf32>
    %cst_292 = arith.constant 9.99999974E-6 : f32
    %479 = vector.broadcast %cst_292 : f32 to vector<16x1xf32>
    %480 = arith.addf %478, %479 : vector<16x1xf32>
    %481 = math.rsqrt %480 : vector<16x1xf32>
    %482 = vector.broadcast %481 : vector<16x1xf32> to vector<16x64xf32>
    %483 = arith.mulf %473, %482 : vector<16x64xf32>
    %484 = vector.broadcast %466 : vector<1x64xf32> to vector<16x64xf32>
    %485 = arith.mulf %483, %484 : vector<16x64xf32>
    %486 = vector.broadcast %467 : vector<1x64xf32> to vector<16x64xf32>
    %487 = arith.addf %485, %486 : vector<16x64xf32>
    %488 = arith.truncf %487 : vector<16x64xf32> to vector<16x64xbf16>
    %c0_293 = arith.constant 0 : index
    %c0_294 = arith.constant 0 : index
    %489 = vector.load %arg19[%c0_293, %c0_294] : memref<64x128xbf16, #tpu.memory_space<vmem>>, vector<64x128xbf16>
    %cst_295 = arith.constant dense<0.000000e+00> : vector<16x128xf32>
    %490 = tpu.matmul %488, %489, %cst_295 {dimension_numbers = #tpu.dot_dimension_numbers<[1], [0], [0], [1], [0, 0, 1, 1], [], []>} : vector<16x64xbf16>, vector<64x128xbf16>, vector<16x128xf32> -> vector<16x128xf32>
    %c0_296 = arith.constant 0 : index
    %c0_297 = arith.constant 0 : index
    %491 = vector.load %arg20[%c0_296, %c0_297] : memref<1x128xf32, #tpu.memory_space<vmem>>, vector<1x128xf32>
    %492 = vector.broadcast %491 : vector<1x128xf32> to vector<16x128xf32>
    %493 = arith.addf %490, %492 : vector<16x128xf32>
    %c0_298 = arith.constant 0 : index
    %c0_299 = arith.constant 0 : index
    %494 = vector.load %arg21[%c0_298, %c0_299] : memref<16x128xf32, #tpu.memory_space<vmem>>, vector<16x128xf32>
    tpu.vector_store %arg21[%c0_298, %c0_299], %493 {strides = array<i32>} : memref<16x128xf32, #tpu.memory_space<vmem>>, vector<16x128xf32>,
    return
  }
  func.func @transform_0(%arg0: i32) -> (i32, i32) {
    %c0_i32 = arith.constant 0 : i32
    %c0_i32_0 = arith.constant 0 : i32
    %c0_i32_1 = arith.constant 0 : i32
    return %c0_i32, %c0_i32_0 : i32, i32
  }
  func.func @transform_1(%arg0: i32) -> (i32, i32) {
    %c0_i32 = arith.constant 0 : i32
    %c0_i32_0 = arith.constant 0 : i32
    %c0_i32_1 = arith.constant 0 : i32
    return %c0_i32, %c0_i32_0 : i32, i32
  }
  func.func @transform_2(%arg0: i32) -> (i32, i32) {
    %c0_i32 = arith.constant 0 : i32
    %c0_i32_0 = arith.constant 0 : i32
    %c0_i32_1 = arith.constant 0 : i32
    return %c0_i32, %c0_i32_0 : i32, i32
  }
  func.func @transform_3(%arg0: i32) -> (i32, i32, i32) {
    %c0_i32 = arith.constant 0 : i32
    %c0_i32_0 = arith.constant 0 : i32
    %c0_i32_1 = arith.constant 0 : i32
    %c0_i32_2 = arith.constant 0 : i32
    return %c0_i32, %c0_i32_0, %c0_i32_1 : i32, i32, i32
  }
  func.func @transform_4(%arg0: i32) -> (i32, i32, i32) {
    %c0_i32 = arith.constant 0 : i32
    %c0_i32_0 = arith.constant 0 : i32
    %c0_i32_1 = arith.constant 0 : i32
    %c0_i32_2 = arith.constant 0 : i32
    return %c0_i32, %c0_i32_0, %c0_i32_1 : i32, i32, i32
  }
  func.func @transform_5(%arg0: i32) -> (i32, i32, i32, i32) {
    %c0_i32 = arith.constant 0 : i32
    %c0_i32_0 = arith.constant 0 : i32
    %c0_i32_1 = arith.constant 0 : i32
    %c0_i32_2 = arith.constant 0 : i32
    %c0_i32_3 = arith.constant 0 : i32
    return %c0_i32, %c0_i32_0, %c0_i32_1, %c0_i32_2 : i32, i32, i32, i32
  }
  func.func @transform_6(%arg0: i32) -> (i32, i32, i32, i32) {
    %c0_i32 = arith.constant 0 : i32
    %c0_i32_0 = arith.constant 0 : i32
    %c0_i32_1 = arith.constant 0 : i32
    %c0_i32_2 = arith.constant 0 : i32
    %c0_i32_3 = arith.constant 0 : i32
    return %c0_i32, %c0_i32_0, %c0_i32_1, %c0_i32_2 : i32, i32, i32, i32
  }
  func.func @transform_7(%arg0: i32) -> (i32, i32, i32, i32) {
    %c0_i32 = arith.constant 0 : i32
    %c0_i32_0 = arith.constant 0 : i32
    %c0_i32_1 = arith.constant 0 : i32
    %c0_i32_2 = arith.constant 0 : i32
    %c0_i32_3 = arith.constant 0 : i32
    return %c0_i32, %c0_i32_0, %c0_i32_1, %c0_i32_2 : i32, i32, i32, i32
  }
  func.func @transform_8(%arg0: i32) -> (i32, i32, i32, i32) {
    %c0_i32 = arith.constant 0 : i32
    %c0_i32_0 = arith.constant 0 : i32
    %c0_i32_1 = arith.constant 0 : i32
    %c0_i32_2 = arith.constant 0 : i32
    %c0_i32_3 = arith.constant 0 : i32
    return %c0_i32, %c0_i32_0, %c0_i32_1, %c0_i32_2 : i32, i32, i32, i32
  }
  func.func @transform_9(%arg0: i32) -> (i32, i32, i32) {
    %c0_i32 = arith.constant 0 : i32
    %c0_i32_0 = arith.constant 0 : i32
    %c0_i32_1 = arith.constant 0 : i32
    %c0_i32_2 = arith.constant 0 : i32
    return %c0_i32, %c0_i32_0, %c0_i32_1 : i32, i32, i32
  }
  func.func @transform_10(%arg0: i32) -> (i32, i32, i32) {
    %c0_i32 = arith.constant 0 : i32
    %c0_i32_0 = arith.constant 0 : i32
    %c0_i32_1 = arith.constant 0 : i32
    %c0_i32_2 = arith.constant 0 : i32
    return %c0_i32, %c0_i32_0, %c0_i32_1 : i32, i32, i32
  }
  func.func @transform_11(%arg0: i32) -> (i32, i32, i32) {
    %c0_i32 = arith.constant 0 : i32
    %c0_i32_0 = arith.constant 0 : i32
    %c0_i32_1 = arith.constant 0 : i32
    %c0_i32_2 = arith.constant 0 : i32
    return %c0_i32, %c0_i32_0, %c0_i32_1 : i32, i32, i32
  }
  func.func @transform_12(%arg0: i32) -> (i32, i32, i32) {
    %c0_i32 = arith.constant 0 : i32
    %c0_i32_0 = arith.constant 0 : i32
    %c0_i32_1 = arith.constant 0 : i32
    %c0_i32_2 = arith.constant 0 : i32
    return %c0_i32, %c0_i32_0, %c0_i32_1 : i32, i32, i32
  }
  func.func @transform_13(%arg0: i32) -> (i32, i32, i32) {
    %c0_i32 = arith.constant 0 : i32
    %c0_i32_0 = arith.constant 0 : i32
    %c0_i32_1 = arith.constant 0 : i32
    %c0_i32_2 = arith.constant 0 : i32
    return %c0_i32, %c0_i32_0, %c0_i32_1 : i32, i32, i32
  }
  func.func @transform_14(%arg0: i32) -> (i32, i32, i32) {
    %c0_i32 = arith.constant 0 : i32
    %c0_i32_0 = arith.constant 0 : i32
    %c0_i32_1 = arith.constant 0 : i32
    %c0_i32_2 = arith.constant 0 : i32
    return %c0_i32, %c0_i32_0, %c0_i32_1 : i32, i32, i32
  }
  func.func @transform_15(%arg0: i32) -> (i32, i32, i32) {
    %c0_i32 = arith.constant 0 : i32
    %c0_i32_0 = arith.constant 0 : i32
    %c0_i32_1 = arith.constant 0 : i32
    %c0_i32_2 = arith.constant 0 : i32
    return %c0_i32, %c0_i32_0, %c0_i32_1 : i32, i32, i32
  }
  func.func @transform_16(%arg0: i32) -> (i32, i32) {
    %c0_i32 = arith.constant 0 : i32
    %c0_i32_0 = arith.constant 0 : i32
    %c0_i32_1 = arith.constant 0 : i32
    return %c0_i32, %c0_i32_0 : i32, i32
  }
  func.func @transform_17(%arg0: i32) -> (i32, i32) {
    %c0_i32 = arith.constant 0 : i32
    %c0_i32_0 = arith.constant 0 : i32
    %c0_i32_1 = arith.constant 0 : i32
    return %c0_i32, %c0_i32_0 : i32, i32
  }
  func.func @transform_18(%arg0: i32) -> (i32, i32) {
    %c0_i32 = arith.constant 0 : i32
    %c0_i32_0 = arith.constant 0 : i32
    %c0_i32_1 = arith.constant 0 : i32
    return %c0_i32, %c0_i32_0 : i32, i32
  }
  func.func @transform_19(%arg0: i32) -> (i32, i32) {
    %c0_i32 = arith.constant 0 : i32
    %c0_i32_0 = arith.constant 0 : i32
    %c0_i32_1 = arith.constant 0 : i32
    return %c0_i32, %c0_i32_0 : i32, i32
  }
  func.func @transform_20(%arg0: i32) -> (i32, i32) {
    %c0_i32 = arith.constant 0 : i32
    %c0_i32_0 = arith.constant 0 : i32
    %c0_i32_1 = arith.constant 0 : i32
    return %c0_i32, %c0_i32_0 : i32, i32
  }
}

</mosaic_0001>

<bundles_post_ra>
// kernel: tpu_custom_call.1
= control target key start
LH: loop header
LB: loop body
LE: loop exit
PB: predicated region body
PF: predicated region fallthrough
CT: control target
= control target key end

     0   :  { %s7921_s0 = inlined_call_operand.vmem [shape: s32[16,1], index: 0, kind: input, shape index: {}]   ;;  %s7922_s1 = inlined_call_operand.vmem [shape: f32[128,64], index: 1, kind: input, shape index: {}]   ;;  %s7923_s2 = inlined_call_operand.vmem [shape: f32[16,64], index: 2, kind: input, shape index: {}]   ;;  %s7924_s3 = inlined_call_operand.vmem [shape: f32[2,1,64], index: 3, kind: input, shape index: {}]   ;;  %s7925_s4 = inlined_call_operand.vmem [shape: f32[2,1,64], index: 4, kind: input, shape index: {}]   ;;  %s7926_s5 = inlined_call_operand.vmem [shape: bf16[2,4,64,16], index: 5, kind: input, shape index: {}]   ;;  %s7927_s6 = inlined_call_operand.vmem [shape: bf16[2,4,64,16], index: 6, kind: input, shape index: {}]   ;;  %s7928_s7 = inlined_call_operand.vmem [shape: bf16[2,4,64,16], index: 7, kind: input, shape index: {}]   ;;  %s7929_s8 = inlined_call_operand.vmem [shape: bf16[2,4,16,64], index: 8, kind: input, shape index: {}]   ;;  %s7930_s9 = inlined_call_operand.vmem [shape: f32[2,1,64], index: 9, kind: input, shape index: {}]   ;;  %s7931_s10 = inlined_call_operand.vmem [shape: f32[2,1,64], index: 10, kind: input, shape index: {}]   ;;  %s7932_s11 = inlined_call_operand.vmem [shape: f32[2,1,64], index: 11, kind: input, shape index: {}]   ;;  %s7933_s12 = inlined_call_operand.vmem [shape: bf16[2,64,256], index: 12, kind: input, shape index: {}]   ;;  %s7934_s13 = inlined_call_operand.vmem [shape: f32[2,1,256], index: 13, kind: input, shape index: {}]   ;;  %s7935_s14 = inlined_call_operand.vmem [shape: bf16[2,256,64], index: 14, kind: input, shape index: {}]   ;;  %s7936_s15 = inlined_call_operand.vmem [shape: f32[2,1,64], index: 15, kind: input, shape index: {}]   ;;  %s7937_s16 = inlined_call_operand.vmem [shape: f32[1,64], index: 16, kind: input, shape index: {}]   ;;  %s7938_s17 = inlined_call_operand.vmem [shape: f32[1,64], index: 17, kind: input, shape index: {}]   ;;  %s7939_s18 = inlined_call_operand.vmem [shape: bf16[64,128], index: 18, kind: input, shape index: {}]   ;;  %s7940_s19 = inlined_call_operand.vmem [shape: f32[1,128], index: 19, kind: input, shape index: {}]   ;;  %s7941_s20 = inlined_call_operand.hbm [shape: f32[16,128], index: 20, kind: output, shape index: {}]  }
   0x1   :  { %7947 = sst [smem:[#allocation5_spill]] %s7921_s0 }
   0x2   :  { %7948 = sst [smem:[#allocation6_spill]] %s7922_s1 }
   0x3   :  { %7949 = sst [smem:[#allocation7_spill]] %s7923_s2 }
   0x4   :  { %7950 = sst [smem:[#allocation8_spill]] %s7924_s3 }
   0x5   :  { %7951 = sst [smem:[#allocation9_spill]] %s7925_s4 }
   0x6   :  { %7952 = sst [smem:[#allocation10_spill]] %s7936_s15 }
   0x7   :  { %s7953_s23 = sld [smem:[#allocation5_spill]]  ;;  %v6663_v2 = vmov 0  }
   0x8   :  { %s7954_s15 = sld [smem:[#allocation6_spill]]  ;;  %6392 = vset.pattern.permute.xlu0 %v6663_v2 }
   0xd   :  { %v67_v0 = vld [vmem:[%s7953_s23] sm:$0xff]  ;;  %v68_v5 = vld [vmem:[%s7953_s23 + $0x8] sm:$0xff] }
   0xe   :  { %v98_v1 = vld [vmem:[%s7954_s15 + $0x78] sm:$0xff]  ;;  %v97_v3 = vld [vmem:[%s7954_s15 + $0x70] sm:$0xff]  ;;  %72 = vperm.xlu0 %6392, %v67_v0   ;;  %v96_v4 = vld [vmem:[%s7954_s15 + $0x68] sm:$0xff] }
   0xf   :  { %5809 = vmatprep.subr.mxu0 %v98_v1  ;;  %v95_v6 = vld [vmem:[%s7954_s15 + $0x60] sm:$0xff]  ;;  %v94_v7 = vld [vmem:[%s7954_s15 + $0x58] sm:$0xff]  ;;  %v93_v8 = vld [vmem:[%s7954_s15 + $0x50] sm:$0xff] }
  0x10   :  { %5810 = vmatpush3.msra.mxu0 %v98_v1  ;;  %v92_v9 = vld [vmem:[%s7954_s15 + $0x48] sm:$0xff]  ;;  %v91_v10 = vld [vmem:[%s7954_s15 + $0x40] sm:$0xff]  ;;  %v90_v11 = vld [vmem:[%s7954_s15 + $0x38] sm:$0xff] }
  0x11   :  { %5811 = vmatprep.subr.mxu0 %v97_v3  ;;  %v89_v12 = vld [vmem:[%s7954_s15 + $0x30] sm:$0xff]  ;;  %v88_v13 = vld [vmem:[%s7954_s15 + $0x28] sm:$0xff]  ;;  %v87_v14 = vld [vmem:[%s7954_s15 + $0x20] sm:$0xff] }
  0x12   :  { %5812 = vmatpush3.msra.mxu0 %v97_v3  ;;  %75 = vperm.xlu0 %6392, %v68_v5   ;;  %v86_v15 = vld [vmem:[%s7954_s15 + $0x18] sm:$0xff]  ;;  %v85_v16 = vld [vmem:[%s7954_s15 + $0x10] sm:$0xff]  ;;  %v84_v17 = vld [vmem:[%s7954_s15 + $0x8] sm:$0xff] }
  0x13   :  { %5813 = vmatprep.subr.mxu0 %v96_v4  ;;  %v83_v18 = vld [vmem:[%s7954_s15] sm:$0xff] }
  0x14   :  { %5814 = vmatpush3.msra.mxu0 %v96_v4 }
  0x15   :  { %5815 = vmatprep.subr.mxu0 %v95_v6 }
  0x16   :  { %5816 = vmatpush3.msra.mxu0 %v95_v6 }
  0x17   :  { %5817 = vmatprep.subr.mxu0 %v94_v7 }
  0x18   :  { %5818 = vmatpush3.msra.mxu0 %v94_v7 }
  0x19   :  { %5819 = vmatprep.subr.mxu0 %v93_v8 }
  0x1a   :  { %5820 = vmatpush3.msra.mxu0 %v93_v8 }
  0x1b   :  { %5821 = vmatprep.subr.mxu0 %v92_v9 }
  0x1c   :  { %5822 = vmatpush3.msra.mxu0 %v92_v9 }
  0x1d   :  { %5823 = vmatprep.subr.mxu0 %v91_v10 }
  0x1e   :  { %5824 = vmatpush3.msra.mxu0 %v91_v10 }
  0x1f   :  { %5825 = vmatprep.subr.mxu0 %v90_v11 }
  0x20   :  { %5826 = vmatpush3.msra.mxu0 %v90_v11 }
  0x21   :  { %5827 = vmatprep.subr.mxu0 %v89_v12 }
  0x22   :  { %5828 = vmatpush3.msra.mxu0 %v89_v12 }
  0x23   :  { %5829 = vmatprep.subr.mxu0 %v88_v13 }
  0x24   :  { %5830 = vmatpush3.msra.mxu0 %v88_v13 }
  0x25   :  { %5831 = vmatprep.subr.mxu0 %v87_v14 }
  0x26   :  { %5832 = vmatpush3.msra.mxu0 %v87_v14 }
  0x27   :  { %5833 = vmatprep.subr.mxu0 %v86_v15 }
  0x28   :  { %5834 = vmatpush3.msra.mxu0 %v86_v15 }
  0x29   :  { %5835 = vmatprep.subr.mxu0 %v85_v16 }
  0x2a   :  { %5836 = vmatpush3.msra.mxu0 %v85_v16 }
  0x2b   :  { %5837 = vmatprep.subr.mxu0 %v84_v17 }
  0x2c   :  { %5838 = vmatpush3.msra.mxu0 %v84_v17 }
  0x2d   :  { %5839 = vmatprep.subr.mxu0 %v83_v18 }
  0x2e   :  { %5840 = vmatpush3.msra.mxu0 %v83_v18 }
  0x2f   :  { %25 = vsyncpa [#allocation3], 0  ;;  %v69_v19 = vlaneseq  ;;  %v6664_v22 = vmov 1.0   ;;  %s7955_s27 = sld [smem:[#allocation7_spill]]  ;;  %vm181_vm2 = vcmask 523264   ;;  %v6393_v41 = vld [vmem:[%s7926_s5 + $0x18] sm:$0xff]  }
  0x30   :  { %v6665_v42 = vmov 0.0   ;;  %v6394_v43 = vld [vmem:[%s7928_s7 + $0x18] sm:$0xff]   ;;  %v6395_v44 = vld [vmem:[%s7926_s5 + $0x10] sm:$0xff]   ;;  %v6397_v46 = vld [vmem:[%s7926_s5 + $0x8] sm:$0xff]   ;;  %vm6666_vm3 = vmmov 0   ;;  %s7956_s29 = sld [smem:[#allocation8_spill]] }
  0x31   :  { %v6832_v20 = vand.u32 127, %v69_v19  ;;  %5844 = vmatprep.subr.bf16.mxu1 %v6665_v42  ;;  %5868 = vmatprep.subr.bf16.mxu0 %v6665_v42  ;;  %v6396_v45 = vld [vmem:[%s7928_s7 + $0x10] sm:$0xff]   ;;  %v6398_v47 = vld [vmem:[%s7928_s7 + $0x8] sm:$0xff]   ;;  %v6399_v48 = vld [vmem:[%s7926_s5] sm:$0xff]   ;;  %s7957_s21 = sld [smem:[#allocation9_spill]]  ;;  %vm578_vm4 = vcmask 1043456  }
  0x32   :  { %5845 = vmatpush3.bf16.msra.mxu1 %v6393_v41  ;;  %v6400_v49 = vld [vmem:[%s7928_s7] sm:$0xff]   ;;  %5852 = vmatprep.mubr.msk.bf16.mxu1 %vm6666_vm3, %v6665_v42  ;;  %v6401_v3 = vld [vmem:[%s7927_s6 + $0x18] sm:$0xff]   ;;  %v6402_v5 = vld [vmem:[%s7927_s6 + $0x10] sm:$0xff]   ;;  %vm457_vm5 = vcmask 130048   ;;  %vm550_vm7 = vcmask 64512   ;;  %s7958_s3 = sld [smem:[#allocation10_spill]] }
  0x33   :  { %5846 = vmatprep.subr.bf16.mxu1 %v6665_v42  ;;  %v6403_v6 = vld [vmem:[%s7927_s6 + $0x8] sm:$0xff]   ;;  %v6404_v7 = vld [vmem:[%s7927_s6] sm:$0xff]  }
  0x35   :  { %v99_v25 = vld [vmem:[%s7955_s27] sm:$0xff] }
  0x36   :  { %5847 = vmatpush3.bf16.msra.mxu1 %v6395_v44  ;;  %v5075_v58 = vld [vmem:[%s7956_s29] ss:$0 sm:$0xff] }
  0x37   :  { %5848 = vmatprep.subr.bf16.mxu1 %v6665_v42  ;;  %v5076_v62 = vld [vmem:[%s7957_s21] ss:$0 sm:$0xff] }
  0x3a   :  { %5849 = vmatpush3.bf16.msra.mxu1 %v6397_v46 }
  0x3b   :  { %5850 = vmatprep.subr.bf16.mxu1 %v6665_v42 }
  0x3e   :  { %5851 = vmatpush3.bf16.msra.mxu1 %v6399_v48 }
  0x3f   :  { %5856 = vmatprep.subr.bf16.mxu1 %v6665_v42 }
  0x89   :  { %v73_v21 = vpop.permute.xlu0 %72 }
  0x8a   :  { %vm77_vm0 = vcmp.eq.s32.totalorder %v6832_v20, %v73_v21 }
  0x8b   :  { %5841 = vmatprep.mubr.msk.f32.mxu0 %vm77_vm0, %v6664_v22 }
  0x8d   :  { %v76_v23 = vpop.permute.xlu0 %75 }
  0x8e   :  { %vm78_vm1 = vcmp.eq.s32.totalorder %v6832_v20, %v76_v23 }
  0x8f   :  { %5842 = vmatmul.mubr.msk.f32.vlgmr.msra.gmra.mxu0 %vm78_vm1, %v6664_v22 }
  0x90   :  { %5869 = vmatpush3.bf16.msra.mxu0 %v6394_v43  ;;  %5876 = vmatprep.mubr.msk.bf16.mxu0 %vm6666_vm3, %v6665_v42 }
  0x91   :  { %5870 = vmatprep.subr.bf16.mxu0 %v6665_v42 }
  0x94   :  { %5871 = vmatpush3.bf16.msra.mxu0 %v6396_v45 }
  0x95   :  { %5872 = vmatprep.subr.bf16.mxu0 %v6665_v42 }
  0x98   :  { %5873 = vmatpush3.bf16.msra.mxu0 %v6398_v47 }
  0x99   :  { %5874 = vmatprep.subr.bf16.mxu0 %v6665_v42 }
  0x9c   :  { %5875 = vmatpush3.bf16.msra.mxu0 %v6400_v49 }
  0x9d   :  { %5892 = vmatprep.subr.bf16.mxu0 %v6665_v42 }
 0x14f   :  { %v5843_v24 = vpop.f32.mrf.mxu0 }
 0x150   :  { %v6841_v28 = vadd.f32 %v5843_v24, %v99_v25 }
 0x151   :  { %v166_v26 = vpop.f32.mrf.mxu0 }
 0x152   :  { %v6839_v27 = vadd.f32 %v166_v26, %v99_v25  ;;  %v185_v30 = vsel %vm181_vm2, %v6841_v28, 0.0 }
 0x154   :  { %v182_v29 = vsel %vm181_vm2, %v6839_v27, 0.0 }
 0x155   :  { %183 = vadd.xlane.f32.xlu1 %v182_v29 }
 0x159   :  { %186 = vadd.xlane.f32.xlu1 %v185_v30 }
 0x1de   :  { %v184_v31 = vpop.xlane.xlu1 %183 }
 0x1df   :  { %v189_v32 = vmul.f32 0.015625, %v184_v31 }
 0x1e1   :  { %v191_v33 = vsub.f32 %v6839_v27, %v189_v32 }
 0x1e2   :  { %v187_v34 = vpop.xlane.xlu1 %186 }
 0x1e3   :  { %v190_v35 = vmul.f32 0.015625, %v187_v34  ;;  %v193_v36 = vmul.f32 %v191_v33, %v191_v33 }
 0x1e5   :  { %v192_v37 = vsub.f32 %v6841_v28, %v190_v35  ;;  %v195_v38 = vsel %vm181_vm2, %v193_v36, 0.0  ;;  %v6940_v36 = vshrl.u32 %v69_v19, 7 }
 0x1e6   :  { %196 = vadd.xlane.f32.xlu0 %v195_v38 }
 0x1e7   :  { %v194_v39 = vmul.f32 %v192_v37, %v192_v37  ;;  %vm177_vm6 = vcmp.le.s32.totalorder %v6832_v20, %v6940_v36 }
 0x1e9   :  { %v198_v40 = vsel %vm181_vm2, %v194_v39, 0.0 }
 0x1ea   :  { %199 = vadd.xlane.f32.xlu1 %v198_v40 }
 0x26f   :  { %v197_v50 = vpop.xlane.xlu0 %196 }
 0x270   :  { %v201_v51 = vmul.f32 0.015625, %v197_v50 }
 0x272   :  { %v203_v52 = vadd.f32 1e-05, %v201_v51 }
 0x273   :  { %v200_v53 = vpop.xlane.xlu1 %199 }
 0x274   :  { %6557 = vrsqrt.f32 %v203_v52  ;;  %v202_v54 = vmul.f32 0.015625, %v200_v53 }
 0x276   :  { %v204_v55 = vadd.f32 1e-05, %v202_v54 }
 0x278   :  { %6559 = vrsqrt.f32 %v204_v55 }
 0x281   :  { %v6558_v56 = vpop.eup %6557 }
 0x282   :  { %v207_v57 = vmul.f32 %v6558_v56, %v191_v33 }
 0x284   :  { %v215_v60 = vmul.f32 %v5075_v58, %v207_v57 }
 0x285   :  { %v6560_v59 = vpop.eup %6559 }
 0x286   :  { %v208_v61 = vmul.f32 %v6560_v59, %v192_v37  ;;  %v223_v0 = vadd.f32 %v5076_v62, %v215_v60  ;;  %v6667_v37 = vmov -1e+30  }
 0x287   :  { %v6944_v38 = vsel %vm177_vm6, 0.0, %v6667_v37 }
 0x288   :  { %v216_v63 = vmul.f32 %v5075_v58, %v208_v61 }
 0x28a   :  { %v224_v1 = vadd.f32 %v5076_v62, %v216_v63 }
 0x28c   :  { %v6898_v4 = vpack.c.bf16 %v224_v1, %v223_v0 }
 0x28e   :  { %5853 = vmatmul.mubr.msk.bf16.vlgmr.msra.gmra.mxu1 %vm181_vm2, %v6898_v4  ;;  %5877 = vmatmul.mubr.msk.bf16.vlgmr.msra.gmra.mxu0 %vm181_vm2, %v6898_v4 }
 0x28f   :  { %5857 = vmatpush3.bf16.msra.mxu1 %v6401_v3  ;;  %5864 = vmatprep.mubr.msk.bf16.mxu1 %vm6666_vm3, %v6665_v42 }
 0x290   :  { %5858 = vmatprep.subr.bf16.mxu1 %v6665_v42  ;;  %5894 = vmatprep.mubr.msk.bf16.mxu0 %vm6666_vm3, %v6665_v42 }
 0x293   :  { %5859 = vmatpush3.bf16.msra.mxu1 %v6402_v5  ;;  %v6405_v5 = vld [vmem:[%s7926_s5 + $0x38] sm:$0xff]  }
 0x294   :  { %5860 = vmatprep.subr.bf16.mxu1 %v6665_v42 }
 0x297   :  { %5861 = vmatpush3.bf16.msra.mxu1 %v6403_v6 }
 0x298   :  { %5862 = vmatprep.subr.bf16.mxu1 %v6665_v42 }
 0x29b   :  { %5863 = vmatpush3.bf16.msra.mxu1 %v6404_v7  ;;  %v6406_v7 = vld [vmem:[%s7926_s5 + $0x30] sm:$0xff]  }
 0x29c   :  { %5880 = vmatprep.subr.bf16.mxu1 %v6665_v42 }
 0x29e   :  { %5865 = vmatmul.mubr.msk.bf16.vlgmr.msra.gmra.mxu1 %vm181_vm2, %v6898_v4 }
 0x29f   :  { %5882 = vmatprep.mubr.msk.bf16.mxu1 %vm6666_vm3, %v6665_v42 }
 0x34e   :  { %v296_v8 = vpop.f32.mrf.mxu1  ;;  %v442_v9 = vpop.f32.mrf.mxu0 }
 0x34f   :  { %v455_v10 = vpack.c.bf16 %v442_v9, %v442_v9  ;;  %v449_v25 = vmul.f32 0.25, %v296_v8  ;;  %v6407_v8 = vld [vmem:[%s7926_s5 + $0x28] sm:$0xff]   ;;  %v6408_v9 = vld [vmem:[%s7926_s5 + $0x20] sm:$0xff]  }
 0x350   :  { %v5854_v11 = vpop.f32.mrf.mxu1  ;;  %v5878_v12 = vpop.f32.mrf.mxu0 }
 0x351   :  { %v580_v13 = vsel %vm578_vm4, %v455_v10, 0  ;;  %v451_v30 = vpack.c.bf16 %v449_v25, %v449_v25  ;;  %v6409_v10 = vld [vmem:[%s7928_s7 + $0x38] sm:$0xff]   ;;  %v6410_v11 = vld [vmem:[%s7928_s7 + $0x30] sm:$0xff]   ;;  %v6411_v12 = vld [vmem:[%s7928_s7 + $0x28] sm:$0xff]  }
 0x352   :  { %v299_v14 = vpop.f32.mrf.mxu1  ;;  %v445_v15 = vpop.f32.mrf.mxu0  ;;  %5893 = vmatpush3.bf16.msra.mxu0 %v580_v13  ;;  %v6412_v13 = vld [vmem:[%s7928_s7 + $0x20] sm:$0xff]  }
 0x353   :  { %5904 = vmatprep.subr.bf16.mxu0 %v6665_v42  ;;  %v450_v32 = vmul.f32 0.25, %v299_v14  ;;  %v456_v33 = vpack.c.bf16 %v445_v15, %v445_v15  ;;  %v6413_v14 = vld [vmem:[%s7929_s8] sm:$0xff]  }
 0x354   :  { %v5855_v16 = vpop.f32.mrf.mxu1  ;;  %v5879_v17 = vpop.f32.mrf.mxu0 }
 0x355   :  { %v452_v34 = vpack.c.bf16 %v450_v32, %v450_v32  ;;  %v626_v35 = vsel %vm578_vm4, %v456_v33, 0 }
 0x35e   :  { %v369_v18 = vpop.f32.mrf.mxu1 }
 0x35f   :  { %v453_v21 = vpack.c.bf16 %v369_v18, %v369_v18 }
 0x360   :  { %v5866_v22 = vpop.f32.mrf.mxu1 }
 0x361   :  { %v462_v23 = vsel %vm457_vm5, %v453_v21, 0  ;;  %v6414_v22 = vld [vmem:[%s7927_s6 + $0x38] sm:$0xff]  }
 0x362   :  { %v372_v24 = vpop.f32.mrf.mxu1  ;;  %5881 = vmatpush3.bf16.xpose.msra.mxu1 %v462_v23 }
 0x363   :  { %5886 = vmatprep.subr.bf16.mxu1 %v6665_v42  ;;  %v454_v29 = vpack.c.bf16 %v372_v24, %v372_v24 }
 0x364   :  { %v5867_v26 = vpop.f32.mrf.mxu1 }
 0x365   :  { %v508_v31 = vsel %vm457_vm5, %v454_v29, 0  ;;  %v6415_v26 = vld [vmem:[%s7927_s6 + $0x30] sm:$0xff]  }
 0x369   :  { %5883 = vmatmul.mubr.msk.bf16.vlgmr.msra.gmra.mxu1 %vm457_vm5, %v451_v30  ;;  %v6416_v30 = vld [vmem:[%s7927_s6 + $0x28] sm:$0xff]  }
 0x36a   :  { %5887 = vmatpush3.bf16.xpose.msra.mxu1 %v508_v31  ;;  %5888 = vmatprep.mubr.msk.bf16.mxu1 %vm6666_vm3, %v6665_v42  ;;  %v6417_v31 = vld [vmem:[%s7927_s6 + $0x20] sm:$0xff]  }
 0x36b   :  { %5898 = vmatprep.subr.bf16.mxu1 %v6665_v42 }
 0x371   :  { %5889 = vmatmul.mubr.msk.bf16.vlgmr.msra.gmra.mxu1 %vm457_vm5, %v452_v34 }
 0x372   :  { %5899 = vmatpush3.bf16.msra.mxu1 %v626_v35  ;;  %5900 = vmatprep.mubr.msk.bf16.mxu1 %vm6666_vm3, %v6665_v42 }
 0x373   :  { %5910 = vmatprep.subr.bf16.mxu1 %v6665_v42 }
 0x429   :  { %v498_v39 = vpop.f32.mrf.mxu1 }
 0x42a   :  { %v499_v40 = vadd.f32 %v498_v39, %v6944_v38 }
 0x42b   :  { %v5884_v41 = vpop.f32.mrf.mxu1 }
 0x42c   :  { %v551_v43 = vsel %vm550_vm7, %v499_v40, -inf }
 0x42d   :  { %552 = vmax.xlane.f32.xlu1 %v551_v43  ;;  %v501_v44 = vpop.f32.mrf.mxu1 }
 0x42f   :  { %v5885_v45 = vpop.f32.mrf.mxu1 }
 0x431   :  { %v544_v46 = vpop.f32.mrf.mxu1 }
 0x432   :  { %v545_v19 = vadd.f32 %v544_v46, %v6944_v38 }
 0x433   :  { %v5890_v47 = vpop.f32.mrf.mxu1 }
 0x434   :  { %v554_v48 = vsel %vm550_vm7, %v545_v19, -inf }
 0x435   :  { %555 = vmax.xlane.f32.xlu1 %v554_v48  ;;  %v547_v20 = vpop.f32.mrf.mxu1 }
 0x437   :  { %v5891_v49 = vpop.f32.mrf.mxu1 }
 0x4b6   :  { %v553_v50 = vpop.xlane.xlu1 %552 }
 0x4b7   :  { %v557_v51 = vsub.f32 %v499_v40, %v553_v50 }
 0x4b9   :  { %v559_v52 = vmul.f32 1.442695, %v557_v51 }
 0x4bb   :  { %6561 = vpow2.f32 %v559_v52 }
 0x4be   :  { %v556_v53 = vpop.xlane.xlu1 %555 }
 0x4bf   :  { %v558_v54 = vsub.f32 %v545_v19, %v556_v53 }
 0x4c1   :  { %v561_v55 = vmul.f32 1.442695, %v558_v54 }
 0x4c3   :  { %6563 = vpow2.f32 %v561_v55 }
 0x4c8   :  { %v6562_v56 = vpop.eup %6561 }
 0x4c9   :  { %v563_v57 = vsel %vm550_vm7, %v6562_v56, 0.0 }
 0x4ca   :  { %564 = vadd.xlane.f32.xlu1 %v563_v57 }
 0x4d0   :  { %v6564_v58 = vpop.eup %6563 }
 0x4d1   :  { %v566_v59 = vsel %vm550_vm7, %v6564_v58, 0.0 }
 0x4d2   :  { %567 = vadd.xlane.f32.xlu1 %v566_v59 }
 0x553   :  { %v565_v60 = vpop.xlane.xlu1 %564 }
 0x554   :  { %6565 = vrcp.f32 %v565_v60 }
 0x55b   :  { %v568_v61 = vpop.xlane.xlu1 %567 }
 0x55c   :  { %6567 = vrcp.f32 %v568_v61 }
 0x561   :  { %v6566_v62 = vpop.eup %6565 }
 0x562   :  { %v571_v63 = vmul.f32 %v6566_v62, %v6562_v56 }
 0x564   :  { %v573_v0 = vpack.c.bf16 %v571_v63, %v571_v63 }
 0x566   :  { %5895 = vmatmul.mubr.msk.bf16.vlgmr.msra.gmra.mxu0 %vm550_vm7, %v573_v0 }
 0x567   :  { %5906 = vmatprep.mubr.msk.bf16.mxu0 %vm6666_vm3, %v6665_v42  ;;  %5905 = vmatpush3.bf16.msra.mxu0 %v6413_v14 }
 0x568   :  { %5922 = vmatprep.subr.bf16.mxu0 %v6665_v42 }
 0x569   :  { %v6568_v1 = vpop.eup %6567 }
 0x56a   :  { %v572_v3 = vmul.f32 %v6568_v1, %v6564_v58 }
 0x56c   :  { %v574_v6 = vpack.c.bf16 %v572_v3, %v572_v3 }
 0x56e   :  { %5901 = vmatmul.mubr.msk.bf16.vlgmr.msra.gmra.mxu1 %vm550_vm7, %v574_v6 }
 0x56f   :  { %5911 = vmatpush3.bf16.msra.mxu1 %v6405_v5  ;;  %5918 = vmatprep.mubr.msk.bf16.mxu1 %vm6666_vm3, %v6665_v42 }
 0x570   :  { %5912 = vmatprep.subr.bf16.mxu1 %v6665_v42 }
 0x573   :  { %5913 = vmatpush3.bf16.msra.mxu1 %v6406_v7 }
 0x574   :  { %5914 = vmatprep.subr.bf16.mxu1 %v6665_v42 }
 0x577   :  { %5915 = vmatpush3.bf16.msra.mxu1 %v6407_v8 }
 0x578   :  { %5916 = vmatprep.subr.bf16.mxu1 %v6665_v42 }
 0x57b   :  { %5917 = vmatpush3.bf16.msra.mxu1 %v6408_v9 }
 0x57c   :  { %5934 = vmatprep.subr.bf16.mxu1 %v6665_v42 }
 0x57e   :  { %5919 = vmatmul.mubr.msk.bf16.vlgmr.msra.gmra.mxu1 %vm181_vm2, %v6898_v4 }
 0x57f   :  { %5935 = vmatpush3.bf16.msra.mxu1 %v6409_v10  ;;  %5942 = vmatprep.mubr.msk.bf16.mxu1 %vm6666_vm3, %v6665_v42 }
 0x580   :  { %5936 = vmatprep.subr.bf16.mxu1 %v6665_v42 }
 0x583   :  { %5937 = vmatpush3.bf16.msra.mxu1 %v6410_v11 }
 0x584   :  { %5938 = vmatprep.subr.bf16.mxu1 %v6665_v42 }
 0x587   :  { %5939 = vmatpush3.bf16.msra.mxu1 %v6411_v12 }
 0x588   :  { %5940 = vmatprep.subr.bf16.mxu1 %v6665_v42 }
 0x58b   :  { %5941 = vmatpush3.bf16.msra.mxu1 %v6412_v13 }
 0x58c   :  { %5958 = vmatprep.subr.bf16.mxu1 %v6665_v42 }
 0x58e   :  { %5943 = vmatmul.mubr.msk.bf16.vlgmr.msra.gmra.mxu1 %vm181_vm2, %v6898_v4 }
 0x58f   :  { %5960 = vmatprep.mubr.msk.bf16.mxu1 %vm6666_vm3, %v6665_v42 }
 0x626   :  { %v616_v15 = vpop.f32.mrf.mxu0 }
 0x628   :  { %v5896_v16 = vpop.f32.mrf.mxu0 }
 0x62a   :  { %v619_v17 = vpop.f32.mrf.mxu0 }
 0x62c   :  { %v5897_v18 = vpop.f32.mrf.mxu0 }
 0x62e   :  { %v662_v21 = vpop.f32.mrf.mxu1 }
 0x62f   :  { %v668_v23 = vpack.c.bf16 %v662_v21, %v616_v15 }
 0x630   :  { %v5902_v24 = vpop.f32.mrf.mxu1 }
 0x631   :  { %5907 = vmatmul.mubr.msk.bf16.vlgmr.msra.gmra.mxu0 %vm457_vm5, %v668_v23 }
 0x632   :  { %5923 = vmatpush3.bf16.msra.mxu0 %v6414_v22  ;;  %v665_v25 = vpop.f32.mrf.mxu1  ;;  %5930 = vmatprep.mubr.msk.bf16.mxu0 %vm6666_vm3, %v6665_v42 }
 0x633   :  { %5924 = vmatprep.subr.bf16.mxu0 %v6665_v42 }
 0x634   :  { %v5903_v29 = vpop.f32.mrf.mxu1 }
 0x636   :  { %5925 = vmatpush3.bf16.msra.mxu0 %v6415_v26 }
 0x637   :  { %5926 = vmatprep.subr.bf16.mxu0 %v6665_v42 }
 0x63a   :  { %5927 = vmatpush3.bf16.msra.mxu0 %v6416_v30 }
 0x63b   :  { %5928 = vmatprep.subr.bf16.mxu0 %v6665_v42 }
 0x63e   :  { %v796_v32 = vpop.f32.mrf.mxu1  ;;  %5929 = vmatpush3.bf16.msra.mxu0 %v6417_v31 }
 0x63f   :  { %5946 = vmatprep.subr.bf16.mxu0 %v6665_v42  ;;  %v951_v52 = vmul.f32 0.25, %v796_v32  ;;  %v6418_v32 = vld [vmem:[%s7926_s5 + $0x58] sm:$0xff]  }
 0x640   :  { %v5920_v33 = vpop.f32.mrf.mxu1 }
 0x641   :  { %5931 = vmatmul.mubr.msk.bf16.vlgmr.msra.gmra.mxu0 %vm181_vm2, %v6898_v4  ;;  %v953_v55 = vpack.c.bf16 %v951_v52, %v951_v52 }
 0x642   :  { %v799_v34 = vpop.f32.mrf.mxu1  ;;  %5948 = vmatprep.mubr.msk.bf16.mxu0 %vm6666_vm3, %v6665_v42 }
 0x643   :  { %v952_v57 = vmul.f32 0.25, %v799_v34  ;;  %v6419_v34 = vld [vmem:[%s7926_s5 + $0x50] sm:$0xff]  }
 0x644   :  { %v5921_v35 = vpop.f32.mrf.mxu1 }
 0x645   :  { %v954_v59 = vpack.c.bf16 %v952_v57, %v952_v57  ;;  %v6420_v35 = vld [vmem:[%s7926_s5 + $0x48] sm:$0xff]   ;;  %v6430_v57 = vld [vmem:[%s7927_s6 + $0x40] sm:$0xff]  }
 0x64e   :  { %v944_v37 = vpop.f32.mrf.mxu1 }
 0x64f   :  { %v957_v39 = vpack.c.bf16 %v944_v37, %v944_v37  ;;  %v6421_v37 = vld [vmem:[%s7926_s5 + $0x40] sm:$0xff]  }
 0x650   :  { %v5944_v40 = vpop.f32.mrf.mxu1 }
 0x651   :  { %v1079_v41 = vsel %vm578_vm4, %v957_v39, 0  ;;  %v6422_v39 = vld [vmem:[%s7928_s7 + $0x58] sm:$0xff]   ;;  %v6423_v40 = vld [vmem:[%s7928_s7 + $0x50] sm:$0xff]  }
 0x652   :  { %v947_v43 = vpop.f32.mrf.mxu1  ;;  %5959 = vmatpush3.bf16.msra.mxu1 %v1079_v41  ;;  %v6424_v41 = vld [vmem:[%s7928_s7 + $0x48] sm:$0xff]  }
 0x653   :  { %5970 = vmatprep.subr.bf16.mxu1 %v6665_v42  ;;  %v958_v58 = vpack.c.bf16 %v947_v43, %v947_v43  ;;  %v6425_v43 = vld [vmem:[%s7928_s7 + $0x40] sm:$0xff]  }
 0x654   :  { %v5945_v44 = vpop.f32.mrf.mxu1 }
 0x655   :  { %v1125_v60 = vsel %vm578_vm4, %v958_v58, 0  ;;  %v6426_v44 = vld [vmem:[%s7929_s8 + $0x8] sm:$0xff]  }
 0x6f1   :  { %v7027_v45 = vpop.f32.mrf.mxu0 }
 0x6f3   :  { %v5908_v46 = vpop.f32.mrf.mxu0 }
 0x6f5   :  { %v7029_v19 = vpop.f32.mrf.mxu0 }
 0x6f7   :  { %v5909_v47 = vpop.f32.mrf.mxu0 }
 0x701   :  { %v870_v48 = vpop.f32.mrf.mxu0 }
 0x702   :  { %v955_v20 = vpack.c.bf16 %v870_v48, %v870_v48 }
 0x703   :  { %v5932_v49 = vpop.f32.mrf.mxu0 }
 0x704   :  { %v963_v50 = vsel %vm457_vm5, %v955_v20, 0 }
 0x705   :  { %v873_v51 = vpop.f32.mrf.mxu0  ;;  %5947 = vmatpush3.bf16.xpose.msra.mxu0 %v963_v50  ;;  %v6427_v50 = vld [vmem:[%s7927_s6 + $0x58] sm:$0xff]  }
 0x706   :  { %5952 = vmatprep.subr.bf16.mxu0 %v6665_v42  ;;  %v956_v54 = vpack.c.bf16 %v873_v51, %v873_v51 }
 0x707   :  { %v5933_v53 = vpop.f32.mrf.mxu0 }
 0x708   :  { %v1009_v56 = vsel %vm457_vm5, %v956_v54, 0  ;;  %v6428_v54 = vld [vmem:[%s7927_s6 + $0x50] sm:$0xff]  }
 0x70c   :  { %5949 = vmatmul.mubr.msk.bf16.vlgmr.msra.gmra.mxu0 %vm457_vm5, %v953_v55 }
 0x70d   :  { %5953 = vmatpush3.bf16.xpose.msra.mxu0 %v1009_v56  ;;  %5954 = vmatprep.mubr.msk.bf16.mxu0 %vm6666_vm3, %v6665_v42  ;;  %v6429_v56 = vld [vmem:[%s7927_s6 + $0x48] sm:$0xff]  }
 0x70e   :  { %5964 = vmatprep.subr.bf16.mxu0 %v6665_v42 }
 0x714   :  { %5955 = vmatmul.mubr.msk.bf16.vlgmr.msra.gmra.mxu0 %vm457_vm5, %v954_v59 }
 0x715   :  { %5965 = vmatpush3.bf16.msra.mxu0 %v1125_v60  ;;  %5966 = vmatprep.mubr.msk.bf16.mxu0 %vm6666_vm3, %v6665_v42 }
 0x716   :  { %5976 = vmatprep.subr.bf16.mxu0 %v6665_v42 }
 0x7cc   :  { %v999_v61 = vpop.f32.mrf.mxu0 }
 0x7cd   :  { %v1000_v62 = vadd.f32 %v999_v61, %v6944_v38 }
 0x7ce   :  { %v5950_v63 = vpop.f32.mrf.mxu0 }
 0x7cf   :  { %v1051_v0 = vsel %vm550_vm7, %v1000_v62, -inf }
 0x7d0   :  { %1052 = vmax.xlane.f32.xlu1 %v1051_v0  ;;  %v1002_v1 = vpop.f32.mrf.mxu0 }
 0x7d2   :  { %v5951_v3 = vpop.f32.mrf.mxu0 }
 0x7d4   :  { %v1045_v5 = vpop.f32.mrf.mxu0 }
 0x7d5   :  { %v1046_v6 = vadd.f32 %v1045_v5, %v6944_v38 }
 0x7d6   :  { %v5956_v7 = vpop.f32.mrf.mxu0 }
 0x7d7   :  { %v1054_v8 = vsel %vm550_vm7, %v1046_v6, -inf }
 0x7d8   :  { %1055 = vmax.xlane.f32.xlu1 %v1054_v8  ;;  %v1048_v9 = vpop.f32.mrf.mxu0 }
 0x7da   :  { %v5957_v10 = vpop.f32.mrf.mxu0 }
 0x859   :  { %v1053_v11 = vpop.xlane.xlu1 %1052 }
 0x85a   :  { %v1057_v12 = vsub.f32 %v1000_v62, %v1053_v11 }
 0x85c   :  { %v1059_v13 = vmul.f32 1.442695, %v1057_v12 }
 0x85e   :  { %6569 = vpow2.f32 %v1059_v13 }
 0x861   :  { %v1056_v14 = vpop.xlane.xlu1 %1055 }
 0x862   :  { %v1058_v15 = vsub.f32 %v1046_v6, %v1056_v14  ;;  %v5098_v6 = vld [vmem:[%s7930_s9] ss:$0 sm:$0xff] }
 0x863   :  { %v727_v7 = vadd.f32 %v5098_v6, %v7027_v45  ;;  %v728_v11 = vadd.f32 %v5098_v6, %v7029_v19  ;;  %v6435_v6 = vld [vmem:[%s7928_s7 + $0x78] sm:$0xff]  }
 0x864   :  { %v1061_v16 = vmul.f32 1.442695, %v1058_v15 }
 0x866   :  { %6571 = vpow2.f32 %v1061_v16 }
 0x86b   :  { %v6570_v17 = vpop.eup %6569 }
 0x86c   :  { %v1063_v18 = vsel %vm550_vm7, %v6570_v17, 0.0 }
 0x86d   :  { %1064 = vadd.xlane.f32.xlu1 %v1063_v18 }
 0x873   :  { %v6572_v21 = vpop.eup %6571 }
 0x874   :  { %v1066_v22 = vsel %vm550_vm7, %v6572_v21, 0.0 }
 0x875   :  { %1067 = vadd.xlane.f32.xlu0 %v1066_v22 }
 0x8f6   :  { %v1065_v23 = vpop.xlane.xlu1 %1064 }
 0x8f7   :  { %6573 = vrcp.f32 %v1065_v23 }
 0x8fe   :  { %v1068_v24 = vpop.xlane.xlu0 %1067 }
 0x8ff   :  { %6575 = vrcp.f32 %v1068_v24 }
 0x904   :  { %v6574_v25 = vpop.eup %6573 }
 0x905   :  { %v1071_v26 = vmul.f32 %v6574_v25, %v6570_v17 }
 0x907   :  { %v1073_v29 = vpack.c.bf16 %v1071_v26, %v1071_v26 }
 0x909   :  { %5961 = vmatmul.mubr.msk.bf16.vlgmr.msra.gmra.mxu1 %vm550_vm7, %v1073_v29 }
 0x90a   :  { %5972 = vmatprep.mubr.msk.bf16.mxu1 %vm6666_vm3, %v6665_v42  ;;  %5971 = vmatpush3.bf16.msra.mxu1 %v6426_v44 }
 0x90b   :  { %5988 = vmatprep.subr.bf16.mxu1 %v6665_v42 }
 0x90c   :  { %v6576_v30 = vpop.eup %6575 }
 0x90d   :  { %v1072_v31 = vmul.f32 %v6576_v30, %v6572_v21 }
 0x90f   :  { %v1074_v33 = vpack.c.bf16 %v1072_v31, %v1072_v31 }
 0x911   :  { %5967 = vmatmul.mubr.msk.bf16.vlgmr.msra.gmra.mxu0 %vm550_vm7, %v1074_v33 }
 0x912   :  { %5977 = vmatpush3.bf16.msra.mxu0 %v6418_v32  ;;  %5984 = vmatprep.mubr.msk.bf16.mxu0 %vm6666_vm3, %v6665_v42 }
 0x913   :  { %5978 = vmatprep.subr.bf16.mxu0 %v6665_v42 }
 0x916   :  { %5979 = vmatpush3.bf16.msra.mxu0 %v6419_v34 }
 0x917   :  { %5980 = vmatprep.subr.bf16.mxu0 %v6665_v42 }
 0x91a   :  { %5981 = vmatpush3.bf16.msra.mxu0 %v6420_v35 }
 0x91b   :  { %5982 = vmatprep.subr.bf16.mxu0 %v6665_v42 }
 0x91e   :  { %5983 = vmatpush3.bf16.msra.mxu0 %v6421_v37 }
 0x91f   :  { %6000 = vmatprep.subr.bf16.mxu0 %v6665_v42 }
 0x921   :  { %5985 = vmatmul.mubr.msk.bf16.vlgmr.msra.gmra.mxu0 %vm181_vm2, %v6898_v4 }
 0x922   :  { %6001 = vmatpush3.bf16.msra.mxu0 %v6422_v39  ;;  %6008 = vmatprep.mubr.msk.bf16.mxu0 %vm6666_vm3, %v6665_v42 }
 0x923   :  { %6002 = vmatprep.subr.bf16.mxu0 %v6665_v42 }
 0x926   :  { %6003 = vmatpush3.bf16.msra.mxu0 %v6423_v40 }
 0x927   :  { %6004 = vmatprep.subr.bf16.mxu0 %v6665_v42 }
 0x92a   :  { %6005 = vmatpush3.bf16.msra.mxu0 %v6424_v41 }
 0x92b   :  { %6006 = vmatprep.subr.bf16.mxu0 %v6665_v42 }
 0x92e   :  { %6007 = vmatpush3.bf16.msra.mxu0 %v6425_v43 }
 0x92f   :  { %6024 = vmatprep.subr.bf16.mxu0 %v6665_v42 }
 0x931   :  { %6009 = vmatmul.mubr.msk.bf16.vlgmr.msra.gmra.mxu0 %vm181_vm2, %v6898_v4 }
 0x932   :  { %6026 = vmatprep.mubr.msk.bf16.mxu0 %vm6666_vm3, %v6665_v42 }
 0x9c9   :  { %v1115_v46 = vpop.f32.mrf.mxu1 }
 0x9cb   :  { %v5962_v47 = vpop.f32.mrf.mxu1 }
 0x9cd   :  { %v1118_v48 = vpop.f32.mrf.mxu1 }
 0x9cf   :  { %v5963_v20 = vpop.f32.mrf.mxu1 }
 0x9d1   :  { %v1161_v49 = vpop.f32.mrf.mxu0 }
 0x9d2   :  { %v1167_v51 = vpack.c.bf16 %v1161_v49, %v1115_v46 }
 0x9d3   :  { %v5968_v52 = vpop.f32.mrf.mxu0 }
 0x9d4   :  { %5973 = vmatmul.mubr.msk.bf16.vlgmr.msra.gmra.mxu1 %vm457_vm5, %v1167_v51 }
 0x9d5   :  { %5989 = vmatpush3.bf16.msra.mxu1 %v6427_v50  ;;  %v1164_v53 = vpop.f32.mrf.mxu0  ;;  %5996 = vmatprep.mubr.msk.bf16.mxu1 %vm6666_vm3, %v6665_v42 }
 0x9d6   :  { %5990 = vmatprep.subr.bf16.mxu1 %v6665_v42 }
 0x9d7   :  { %v5969_v55 = vpop.f32.mrf.mxu0 }
 0x9d9   :  { %5991 = vmatpush3.bf16.msra.mxu1 %v6428_v54 }
 0x9da   :  { %5992 = vmatprep.subr.bf16.mxu1 %v6665_v42 }
 0x9dd   :  { %5993 = vmatpush3.bf16.msra.mxu1 %v6429_v56 }
 0x9de   :  { %5994 = vmatprep.subr.bf16.mxu1 %v6665_v42 }
 0x9e1   :  { %v1290_v58 = vpop.f32.mrf.mxu0  ;;  %5995 = vmatpush3.bf16.msra.mxu1 %v6430_v57 }
 0x9e2   :  { %6012 = vmatprep.subr.bf16.mxu1 %v6665_v42  ;;  %v1445_v22 = vmul.f32 0.25, %v1290_v58 }
 0x9e3   :  { %v5986_v59 = vpop.f32.mrf.mxu0 }
 0x9e4   :  { %5997 = vmatmul.mubr.msk.bf16.vlgmr.msra.gmra.mxu1 %vm181_vm2, %v6898_v4  ;;  %v1447_v24 = vpack.c.bf16 %v1445_v22, %v1445_v22 }
 0x9e5   :  { %v1293_v60 = vpop.f32.mrf.mxu0  ;;  %6014 = vmatprep.mubr.msk.bf16.mxu1 %vm6666_vm3, %v6665_v42 }
 0x9e6   :  { %v1446_v19 = vmul.f32 0.25, %v1293_v60 }
 0x9e7   :  { %v5987_v61 = vpop.f32.mrf.mxu0 }
 0x9e8   :  { %v1448_v29 = vpack.c.bf16 %v1446_v19, %v1446_v19  ;;  %v6443_v19 = vld [vmem:[%s7927_s6 + $0x60] sm:$0xff]  }
 0x9f1   :  { %v1438_v62 = vpop.f32.mrf.mxu0 }
 0x9f2   :  { %v1451_v63 = vpack.c.bf16 %v1438_v62, %v1438_v62 }
 0x9f3   :  { %v6010_v0 = vpop.f32.mrf.mxu0 }
 0x9f4   :  { %v1573_v1 = vsel %vm578_vm4, %v1451_v63, 0  ;;  %v6431_v63 = vld [vmem:[%s7926_s5 + $0x78] sm:$0xff]  }
 0x9f5   :  { %v1441_v3 = vpop.f32.mrf.mxu0  ;;  %6025 = vmatpush3.bf16.msra.mxu0 %v1573_v1  ;;  %v6432_v1 = vld [vmem:[%s7926_s5 + $0x70] sm:$0xff]  }
 0x9f6   :  { %6036 = vmatprep.subr.bf16.mxu0 %v6665_v42  ;;  %v1452_v26 = vpack.c.bf16 %v1441_v3, %v1441_v3  ;;  %v6433_v3 = vld [vmem:[%s7926_s5 + $0x68] sm:$0xff]  }
 0x9f7   :  { %v6011_v5 = vpop.f32.mrf.mxu0 }
 0x9f8   :  { %v1619_v30 = vsel %vm578_vm4, %v1452_v26, 0  ;;  %v6434_v5 = vld [vmem:[%s7926_s5 + $0x60] sm:$0xff]  }
 0xa94   :  { %v1214_v8 = vpop.f32.mrf.mxu1 }
 0xa95   :  { %v7128_v9 = vadd.f32 %v1214_v8, %v727_v7  ;;  %v6436_v7 = vld [vmem:[%s7928_s7 + $0x70] sm:$0xff]   ;;  %v6437_v8 = vld [vmem:[%s7928_s7 + $0x68] sm:$0xff]  }
 0xa96   :  { %v5974_v10 = vpop.f32.mrf.mxu1 }
 0xa97   :  { %v6438_v10 = vld [vmem:[%s7928_s7 + $0x60] sm:$0xff]  }
 0xa98   :  { %v1217_v12 = vpop.f32.mrf.mxu1 }
 0xa99   :  { %v7131_v13 = vadd.f32 %v1217_v12, %v728_v11  ;;  %v6439_v11 = vld [vmem:[%s7929_s8 + $0x10] sm:$0xff]  }
 0xa9a   :  { %v5975_v14 = vpop.f32.mrf.mxu1 }
 0xaa4   :  { %v1364_v15 = vpop.f32.mrf.mxu1 }
 0xaa5   :  { %v1449_v16 = vpack.c.bf16 %v1364_v15, %v1364_v15 }
 0xaa6   :  { %v5998_v17 = vpop.f32.mrf.mxu1 }
 0xaa7   :  { %v1457_v18 = vsel %vm457_vm5, %v1449_v16, 0 }
 0xaa8   :  { %v1367_v21 = vpop.f32.mrf.mxu1  ;;  %6013 = vmatpush3.bf16.xpose.msra.mxu1 %v1457_v18  ;;  %v6440_v18 = vld [vmem:[%s7927_s6 + $0x78] sm:$0xff]  }
 0xaa9   :  { %6018 = vmatprep.subr.bf16.mxu1 %v6665_v42  ;;  %v1450_v23 = vpack.c.bf16 %v1367_v21, %v1367_v21 }
 0xaaa   :  { %v5999_v45 = vpop.f32.mrf.mxu1 }
 0xaab   :  { %v1503_v25 = vsel %vm457_vm5, %v1450_v23, 0  ;;  %v6441_v23 = vld [vmem:[%s7927_s6 + $0x70] sm:$0xff]  }
 0xaaf   :  { %6015 = vmatmul.mubr.msk.bf16.vlgmr.msra.gmra.mxu1 %vm457_vm5, %v1447_v24 }
 0xab0   :  { %6019 = vmatpush3.bf16.xpose.msra.mxu1 %v1503_v25  ;;  %6020 = vmatprep.mubr.msk.bf16.mxu1 %vm6666_vm3, %v6665_v42  ;;  %v6442_v25 = vld [vmem:[%s7927_s6 + $0x68] sm:$0xff]  }
 0xab1   :  { %6030 = vmatprep.subr.bf16.mxu1 %v6665_v42 }
 0xab7   :  { %6021 = vmatmul.mubr.msk.bf16.vlgmr.msra.gmra.mxu1 %vm457_vm5, %v1448_v29 }
 0xab8   :  { %6031 = vmatpush3.bf16.msra.mxu1 %v1619_v30  ;;  %6032 = vmatprep.mubr.msk.bf16.mxu1 %vm6666_vm3, %v6665_v42 }
 0xab9   :  { %6042 = vmatprep.subr.bf16.mxu1 %v6665_v42 }
 0xb6f   :  { %v1493_v31 = vpop.f32.mrf.mxu1 }
 0xb70   :  { %v1494_v32 = vadd.f32 %v1493_v31, %v6944_v38 }
 0xb71   :  { %v6016_v33 = vpop.f32.mrf.mxu1 }
 0xb72   :  { %v1545_v34 = vsel %vm550_vm7, %v1494_v32, -inf }
 0xb73   :  { %1546 = vmax.xlane.f32.xlu1 %v1545_v34  ;;  %v1496_v35 = vpop.f32.mrf.mxu1 }
 0xb75   :  { %v6017_v37 = vpop.f32.mrf.mxu1 }
 0xb77   :  { %v1539_v39 = vpop.f32.mrf.mxu1 }
 0xb78   :  { %v1540_v40 = vadd.f32 %v1539_v39, %v6944_v38 }
 0xb79   :  { %v6022_v41 = vpop.f32.mrf.mxu1 }
 0xb7a   :  { %v1548_v43 = vsel %vm550_vm7, %v1540_v40, -inf }
 0xb7b   :  { %1549 = vmax.xlane.f32.xlu0 %v1548_v43  ;;  %v1542_v44 = vpop.f32.mrf.mxu1 }
 0xb7d   :  { %v6023_v46 = vpop.f32.mrf.mxu1 }
 0xbfc   :  { %v1547_v47 = vpop.xlane.xlu1 %1546 }
 0xbfd   :  { %v1551_v48 = vsub.f32 %v1494_v32, %v1547_v47 }
 0xbff   :  { %v1553_v20 = vmul.f32 1.442695, %v1551_v48 }
 0xc01   :  { %6577 = vpow2.f32 %v1553_v20 }
 0xc04   :  { %v1550_v49 = vpop.xlane.xlu0 %1549 }
 0xc05   :  { %v1552_v50 = vsub.f32 %v1540_v40, %v1550_v49 }
 0xc07   :  { %v1555_v51 = vmul.f32 1.442695, %v1552_v50 }
 0xc09   :  { %6579 = vpow2.f32 %v1555_v51 }
 0xc0e   :  { %v6578_v52 = vpop.eup %6577 }
 0xc0f   :  { %v1557_v53 = vsel %vm550_vm7, %v6578_v52, 0.0 }
 0xc10   :  { %1558 = vadd.xlane.f32.xlu1 %v1557_v53 }
 0xc16   :  { %v6580_v54 = vpop.eup %6579 }
 0xc17   :  { %v1560_v55 = vsel %vm550_vm7, %v6580_v54, 0.0 }
 0xc18   :  { %1561 = vadd.xlane.f32.xlu0 %v1560_v55 }
 0xc99   :  { %v1559_v56 = vpop.xlane.xlu1 %1558 }
 0xc9a   :  { %6581 = vrcp.f32 %v1559_v56 }
 0xca1   :  { %v1562_v57 = vpop.xlane.xlu0 %1561 }
 0xca2   :  { %6583 = vrcp.f32 %v1562_v57 }
 0xca7   :  { %v6582_v58 = vpop.eup %6581 }
 0xca8   :  { %v1565_v59 = vmul.f32 %v6582_v58, %v6578_v52 }
 0xcaa   :  { %v1567_v60 = vpack.c.bf16 %v1565_v59, %v1565_v59 }
 0xcac   :  { %6027 = vmatmul.mubr.msk.bf16.vlgmr.msra.gmra.mxu0 %vm550_vm7, %v1567_v60 }
 0xcad   :  { %6038 = vmatprep.mubr.msk.bf16.mxu0 %vm6666_vm3, %v6665_v42  ;;  %6037 = vmatpush3.bf16.msra.mxu0 %v6439_v11 }
 0xcae   :  { %6054 = vmatprep.subr.bf16.mxu0 %v6665_v42 }
 0xcaf   :  { %v6584_v61 = vpop.eup %6583 }
 0xcb0   :  { %v1566_v62 = vmul.f32 %v6584_v61, %v6580_v54 }
 0xcb2   :  { %v1568_v0 = vpack.c.bf16 %v1566_v62, %v1566_v62 }
 0xcb4   :  { %6033 = vmatmul.mubr.msk.bf16.vlgmr.msra.gmra.mxu1 %vm550_vm7, %v1568_v0 }
 0xcb5   :  { %6043 = vmatpush3.bf16.msra.mxu1 %v6431_v63  ;;  %6050 = vmatprep.mubr.msk.bf16.mxu1 %vm6666_vm3, %v6665_v42 }
 0xcb6   :  { %6044 = vmatprep.subr.bf16.mxu1 %v6665_v42 }
 0xcb9   :  { %6045 = vmatpush3.bf16.msra.mxu1 %v6432_v1 }
 0xcba   :  { %6046 = vmatprep.subr.bf16.mxu1 %v6665_v42 }
 0xcbd   :  { %6047 = vmatpush3.bf16.msra.mxu1 %v6433_v3 }
 0xcbe   :  { %6048 = vmatprep.subr.bf16.mxu1 %v6665_v42 }
 0xcc1   :  { %6049 = vmatpush3.bf16.msra.mxu1 %v6434_v5 }
 0xcc2   :  { %6066 = vmatprep.subr.bf16.mxu1 %v6665_v42 }
 0xcc4   :  { %6051 = vmatmul.mubr.msk.bf16.vlgmr.msra.gmra.mxu1 %vm181_vm2, %v6898_v4 }
 0xcc5   :  { %6067 = vmatpush3.bf16.msra.mxu1 %v6435_v6  ;;  %6074 = vmatprep.mubr.msk.bf16.mxu1 %vm6666_vm3, %v6665_v42 }
 0xcc6   :  { %6068 = vmatprep.subr.bf16.mxu1 %v6665_v42 }
 0xcc9   :  { %6069 = vmatpush3.bf16.msra.mxu1 %v6436_v7 }
 0xcca   :  { %6070 = vmatprep.subr.bf16.mxu1 %v6665_v42 }
 0xccd   :  { %6071 = vmatpush3.bf16.msra.mxu1 %v6437_v8 }
 0xcce   :  { %6072 = vmatprep.subr.bf16.mxu1 %v6665_v42 }
 0xcd1   :  { %6073 = vmatpush3.bf16.msra.mxu1 %v6438_v10 }
 0xcd2   :  { %6090 = vmatprep.subr.bf16.mxu1 %v6665_v42 }
 0xcd4   :  { %6075 = vmatmul.mubr.msk.bf16.vlgmr.msra.gmra.mxu1 %vm181_vm2, %v6898_v4 }
 0xcd5   :  { %6092 = vmatprep.mubr.msk.bf16.mxu1 %vm6666_vm3, %v6665_v42 }
 0xd6c   :  { %v1609_v12 = vpop.f32.mrf.mxu0 }
 0xd6e   :  { %v6028_v14 = vpop.f32.mrf.mxu0 }
 0xd70   :  { %v1612_v15 = vpop.f32.mrf.mxu0 }
 0xd72   :  { %v6029_v16 = vpop.f32.mrf.mxu0 }
 0xd74   :  { %v1655_v17 = vpop.f32.mrf.mxu1 }
 0xd75   :  { %v1661_v21 = vpack.c.bf16 %v1655_v17, %v1609_v12 }
 0xd76   :  { %v6034_v22 = vpop.f32.mrf.mxu1 }
 0xd77   :  { %6039 = vmatmul.mubr.msk.bf16.vlgmr.msra.gmra.mxu0 %vm457_vm5, %v1661_v21 }
 0xd78   :  { %6055 = vmatpush3.bf16.msra.mxu0 %v6440_v18  ;;  %v1658_v45 = vpop.f32.mrf.mxu1  ;;  %6062 = vmatprep.mubr.msk.bf16.mxu0 %vm6666_vm3, %v6665_v42 }
 0xd79   :  { %6056 = vmatprep.subr.bf16.mxu0 %v6665_v42 }
 0xd7a   :  { %v6035_v24 = vpop.f32.mrf.mxu1 }
 0xd7c   :  { %6057 = vmatpush3.bf16.msra.mxu0 %v6441_v23 }
 0xd7d   :  { %6058 = vmatprep.subr.bf16.mxu0 %v6665_v42 }
 0xd80   :  { %6059 = vmatpush3.bf16.msra.mxu0 %v6442_v25 }
 0xd81   :  { %6060 = vmatprep.subr.bf16.mxu0 %v6665_v42 }
 0xd84   :  { %v1784_v26 = vpop.f32.mrf.mxu1  ;;  %6061 = vmatpush3.bf16.msra.mxu0 %v6443_v19 }
 0xd85   :  { %6078 = vmatprep.subr.bf16.mxu0 %v6665_v42  ;;  %v1939_v51 = vmul.f32 0.25, %v1784_v26 }
 0xd86   :  { %v6052_v29 = vpop.f32.mrf.mxu1 }
 0xd87   :  { %6063 = vmatmul.mubr.msk.bf16.vlgmr.msra.gmra.mxu0 %vm181_vm2, %v6898_v4 }
 0xd88   :  { %v1787_v30 = vpop.f32.mrf.mxu1  ;;  %6080 = vmatprep.mubr.msk.bf16.mxu0 %vm6666_vm3, %v6665_v42 }
 0xd8a   :  { %v6053_v31 = vpop.f32.mrf.mxu1 }
 0xd94   :  { %v1932_v32 = vpop.f32.mrf.mxu1 }
 0xd95   :  { %v1945_v33 = vpack.c.bf16 %v1932_v32, %v1932_v32 }
 0xd96   :  { %v6076_v34 = vpop.f32.mrf.mxu1 }
 0xd97   :  { %v2067_v35 = vsel %vm578_vm4, %v1945_v33, 0 }
 0xd98   :  { %v1935_v37 = vpop.f32.mrf.mxu1  ;;  %6091 = vmatpush3.bf16.msra.mxu1 %v2067_v35 }
 0xd99   :  { %6102 = vmatprep.subr.bf16.mxu1 %v6665_v42  ;;  %v1946_v55 = vpack.c.bf16 %v1935_v37, %v1935_v37 }
 0xd9a   :  { %v6077_v39 = vpop.f32.mrf.mxu1 }
 0xd9b   :  { %v2113_v57 = vsel %vm578_vm4, %v1946_v55, 0 }
 0xe37   :  { %v1708_v40 = vpop.f32.mrf.mxu0 }
 0xe38   :  { %v7227_v41 = vadd.f32 %v1708_v40, %v7128_v9  ;;  %v1941_v9 = vpack.c.bf16 %v1939_v51, %v1939_v51 }
 0xe39   :  { %v6040_v4 = vpop.f32.mrf.mxu0 }
 0xe3b   :  { %v1711_v43 = vpop.f32.mrf.mxu0 }
 0xe3c   :  { %v7230_v44 = vadd.f32 %v1711_v43, %v7131_v13  ;;  %v1940_v13 = vmul.f32 0.25, %v1787_v30  ;;  %v6444_v30 = vld [vmem:[%s7929_s8 + $0x18] sm:$0xff]  }
 0xe3d   :  { %v6041_v46 = vpop.f32.mrf.mxu0 }
 0xe3e   :  { %v1942_v56 = vpack.c.bf16 %v1940_v13, %v1940_v13 }
 0xe47   :  { %v1858_v47 = vpop.f32.mrf.mxu0 }
 0xe48   :  { %v1943_v48 = vpack.c.bf16 %v1858_v47, %v1858_v47 }
 0xe49   :  { %v6064_v20 = vpop.f32.mrf.mxu0 }
 0xe4a   :  { %v1951_v49 = vsel %vm457_vm5, %v1943_v48, 0 }
 0xe4b   :  { %v1861_v50 = vpop.f32.mrf.mxu0  ;;  %6079 = vmatpush3.bf16.xpose.msra.mxu0 %v1951_v49 }
 0xe4c   :  { %6084 = vmatprep.subr.bf16.mxu0 %v6665_v42  ;;  %v1944_v53 = vpack.c.bf16 %v1861_v50, %v1861_v50 }
 0xe4d   :  { %v6065_v52 = vpop.f32.mrf.mxu0 }
 0xe4e   :  { %v1997_v54 = vsel %vm457_vm5, %v1944_v53, 0 }
 0xe52   :  { %6081 = vmatmul.mubr.msk.bf16.vlgmr.msra.gmra.mxu0 %vm457_vm5, %v1941_v9 }
 0xe53   :  { %6085 = vmatpush3.bf16.xpose.msra.mxu0 %v1997_v54  ;;  %6086 = vmatprep.mubr.msk.bf16.mxu0 %vm6666_vm3, %v6665_v42 }
 0xe54   :  { %6096 = vmatprep.subr.bf16.mxu0 %v6665_v42 }
 0xe5a   :  { %6087 = vmatmul.mubr.msk.bf16.vlgmr.msra.gmra.mxu0 %vm457_vm5, %v1942_v56 }
 0xe5b   :  { %6097 = vmatpush3.bf16.msra.mxu0 %v2113_v57  ;;  %6098 = vmatprep.mubr.msk.bf16.mxu0 %vm6666_vm3, %v6665_v42 }
 0xf12   :  { %v1987_v58 = vpop.f32.mrf.mxu0 }
 0xf13   :  { %v1988_v59 = vadd.f32 %v1987_v58, %v6944_v38  ;;  %v6447_v58 = vld [vmem:[%s7933_s12 + $0x34] ss:$8 sps:$4 sm:$0xff]  }
 0xf14   :  { %v6082_v60 = vpop.f32.mrf.mxu0  ;;  %2329 = vmatprep.subr.bf16.mxu0 %v6447_v58 }
 0xf15   :  { %v2039_v61 = vsel %vm550_vm7, %v1988_v59, -inf  ;;  %v6450_v60 = vld [vmem:[%s7933_s12 + $0x24] ss:$8 sps:$4 sm:$0xff]  }
 0xf16   :  { %2040 = vmax.xlane.f32.xlu1 %v2039_v61  ;;  %v1990_v62 = vpop.f32.mrf.mxu0  ;;  %v6448_v61 = vld [vmem:[%s7933_s12 + $0x20] ss:$8 sps:$4 sm:$0xff]  }
 0xf17   :  { %v6453_v62 = vld [vmem:[%s7933_s12 + $0x14] ss:$8 sps:$4 sm:$0xff]  }
 0xf18   :  { %v6083_v63 = vpop.f32.mrf.mxu0 }
 0xf19   :  { %v6451_v63 = vld [vmem:[%s7933_s12 + $0x10] ss:$8 sps:$4 sm:$0xff]  }
 0xf1a   :  { %v2033_v0 = vpop.f32.mrf.mxu0 }
 0xf1b   :  { %v2034_v1 = vadd.f32 %v2033_v0, %v6944_v38  ;;  %v6456_v0 = vld [vmem:[%s7933_s12 + $0x4] ss:$8 sps:$4 sm:$0xff]  }
 0xf1c   :  { %v6088_v3 = vpop.f32.mrf.mxu0 }
 0xf1d   :  { %v2042_v5 = vsel %vm550_vm7, %v2034_v1, -inf  ;;  %v6457_v3 = vld [vmem:[%s7935_s14 + $0x78] sm:$0xff]  }
 0xf1e   :  { %2043 = vmax.xlane.f32.xlu0 %v2042_v5  ;;  %v2036_v6 = vpop.f32.mrf.mxu0  ;;  %v6458_v5 = vld [vmem:[%s7935_s14 + $0x38] sm:$0xff]  }
 0xf1f   :  { %v6459_v6 = vld [vmem:[%s7935_s14 + $0x70] sm:$0xff]  }
 0xf20   :  { %v6089_v7 = vpop.f32.mrf.mxu0 }
 0xf21   :  { %v6460_v7 = vld [vmem:[%s7935_s14 + $0x30] sm:$0xff]  }
 0xf9f   :  { %v2041_v8 = vpop.xlane.xlu1 %2040 }
 0xfa0   :  { %v2045_v10 = vsub.f32 %v1988_v59, %v2041_v8  ;;  %v6445_v59 = vld [vmem:[%s7933_s12 + $0x30] ss:$8 sps:$4 sm:$0xff]   ;;  %v6461_v8 = vld [vmem:[%s7935_s14 + $0x68] sm:$0xff]  }
 0xfa2   :  { %v2047_v11 = vmul.f32 1.442695, %v2045_v10  ;;  %v6462_v10 = vld [vmem:[%s7935_s14 + $0x28] sm:$0xff]  }
 0xfa4   :  { %6585 = vpow2.f32 %v2047_v11  ;;  %v6463_v11 = vld [vmem:[%s7935_s14 + $0x60] sm:$0xff]  }
 0xfa7   :  { %v2044_v12 = vpop.xlane.xlu0 %2043 }
 0xfa8   :  { %v2046_v14 = vsub.f32 %v2034_v1, %v2044_v12  ;;  %v6454_v1 = vld [vmem:[%s7933_s12] ss:$8 sps:$4 sm:$0xff]  }
 0xfa9   :  { %v6464_v12 = vld [vmem:[%s7935_s14 + $0x20] sm:$0xff]  }
 0xfaa   :  { %v2049_v15 = vmul.f32 1.442695, %v2046_v14  ;;  %v6465_v14 = vld [vmem:[%s7935_s14 + $0x58] sm:$0xff]  }
 0xfac   :  { %6587 = vpow2.f32 %v2049_v15  ;;  %v6466_v15 = vld [vmem:[%s7935_s14 + $0x18] sm:$0xff]  }
 0xfb1   :  { %v6586_v16 = vpop.eup %6585 }
 0xfb2   :  { %v2051_v17 = vsel %vm550_vm7, %v6586_v16, 0.0 }
 0xfb3   :  { %2052 = vadd.xlane.f32.xlu1 %v2051_v17 }
 0xfb9   :  { %v6588_v18 = vpop.eup %6587 }
 0xfba   :  { %v2054_v21 = vsel %vm550_vm7, %v6588_v18, 0.0 }
 0xfbb   :  { %2055 = vadd.xlane.f32.xlu0 %v2054_v21 }
0x103c   :  { %v2053_v22 = vpop.xlane.xlu1 %2052 }
0x103d   :  { %6589 = vrcp.f32 %v2053_v22 }
0x1044   :  { %v2056_v45 = vpop.xlane.xlu0 %2055 }
0x1045   :  { %6591 = vrcp.f32 %v2056_v45 }
0x104a   :  { %v6590_v23 = vpop.eup %6589 }
0x104b   :  { %v2059_v24 = vmul.f32 %v6590_v23, %v6586_v16 }
0x104d   :  { %v2061_v25 = vpack.c.bf16 %v2059_v24, %v2059_v24 }
0x104f   :  { %6093 = vmatmul.mubr.msk.bf16.vlgmr.msra.gmra.mxu1 %vm550_vm7, %v2061_v25  ;;  %v5240_v25 = vld [vmem:[%s7931_s10] ss:$0 sm:$0xff] }
0x1050   :  { %6104 = vmatprep.mubr.msk.bf16.mxu1 %vm6666_vm3, %v6665_v42  ;;  %6103 = vmatpush3.bf16.msra.mxu1 %v6444_v30  ;;  %v5241_v30 = vld [vmem:[%s7932_s11] ss:$0 sm:$0xff] }
0x1051   :  { %5660 = vmatprep.subr.bf16.mxu1 %v6457_v3 }
0x1052   :  { %v6592_v19 = vpop.eup %6591 }
0x1053   :  { %v2060_v26 = vmul.f32 %v6592_v19, %v6588_v18 }
0x1055   :  { %v2062_v29 = vpack.c.bf16 %v2060_v26, %v2060_v26 }
0x1057   :  { %6099 = vmatmul.mubr.msk.bf16.vlgmr.msra.gmra.mxu0 %vm550_vm7, %v2062_v29 }
0x1058   :  { %2353 = vmatprep.mubr.bf16.mxu0 %v6663_v2  ;;  %2330 = vmatpush1.bf16.msra.mxu0 %v6445_v59 }
0x1059   :  { %2331 = vmatprep.subr.bf16.mxu0 %v6450_v60 }
0x105c   :  { %2332 = vmatpush1.bf16.msra.mxu0 %v6448_v61  ;;  %v5251_v61 = vld [vmem:[%s7958_s3] ss:$0 sm:$0xff] }
0x105d   :  { %2333 = vmatprep.subr.bf16.mxu0 %v6453_v62 }
0x1060   :  { %2334 = vmatpush1.bf16.msra.mxu0 %v6451_v63 }
0x1061   :  { %2335 = vmatprep.subr.bf16.mxu0 %v6456_v0 }
0x1064   :  { %2336 = vmatpush1.bf16.msra.mxu0 %v6454_v1 }
0x1065   :  { %6108 = vmatprep.subr.bf16.mxu0 %v6665_v42 }
0x110f   :  { %v2103_v31 = vpop.f32.mrf.mxu1 }
0x1111   :  { %v6094_v32 = vpop.f32.mrf.mxu1 }
0x1113   :  { %v2106_v33 = vpop.f32.mrf.mxu1 }
0x1115   :  { %v6095_v34 = vpop.f32.mrf.mxu1 }
0x1117   :  { %v2149_v35 = vpop.f32.mrf.mxu0 }
0x1118   :  { %v2155_v37 = vpack.c.bf16 %v2149_v35, %v2103_v31  ;;  %v6467_v35 = vld [vmem:[%s7935_s14 + $0x50] sm:$0xff]  }
0x1119   :  { %v6100_v39 = vpop.f32.mrf.mxu0 }
0x111a   :  { %6105 = vmatmul.mubr.msk.bf16.vlgmr.msra.gmra.mxu1 %vm457_vm5, %v2155_v37  ;;  %v6468_v37 = vld [vmem:[%s7935_s14 + $0x10] sm:$0xff]   ;;  %v6469_v39 = vld [vmem:[%s7935_s14 + $0x48] sm:$0xff]  }
0x111b   :  { %v2152_v40 = vpop.f32.mrf.mxu0  ;;  %5661 = vmatpush3.bf16.msra.mxu1 %v6458_v5 }
0x111c   :  { %5662 = vmatprep.subr.bf16.mxu1 %v6459_v6  ;;  %v6470_v40 = vld [vmem:[%s7935_s14 + $0x8] sm:$0xff]  }
0x111d   :  { %v6101_v4 = vpop.f32.mrf.mxu0 }
0x111e   :  { %v6471_v4 = vld [vmem:[%s7935_s14 + $0x40] sm:$0xff]  }
0x111f   :  { %5663 = vmatpush3.bf16.msra.mxu1 %v6460_v7 }
0x1120   :  { %5664 = vmatprep.subr.bf16.mxu1 %v6461_v8 }
0x1123   :  { %5665 = vmatpush3.bf16.msra.mxu1 %v6462_v10 }
0x1124   :  { %5666 = vmatprep.subr.bf16.mxu1 %v6463_v11 }
0x1127   :  { %5667 = vmatpush3.bf16.msra.mxu1 %v6464_v12 }
0x1128   :  { %5668 = vmatprep.subr.bf16.mxu1 %v6465_v14 }
0x112b   :  { %5669 = vmatpush3.bf16.msra.mxu1 %v6466_v15 }
0x112c   :  { %5670 = vmatprep.subr.bf16.mxu1 %v6467_v35 }
0x112f   :  { %5671 = vmatpush3.bf16.msra.mxu1 %v6468_v37 }
0x1130   :  { %5672 = vmatprep.subr.bf16.mxu1 %v6469_v39 }
0x1133   :  { %5673 = vmatpush3.bf16.msra.mxu1 %v6470_v40 }
0x1134   :  { %5674 = vmatprep.subr.bf16.mxu1 %v6471_v4  ;;  %v5270_v4 = vld [vmem:[%s7956_s29 + $0x1] ss:$0 sm:$0xff] }
0x11da   :  { %v2202_v43 = vpop.f32.mrf.mxu1 }
0x11db   :  { %v2209_v46 = vadd.f32 %v2202_v43, %v7227_v41  ;;  %v6472_v43 = vld [vmem:[%s7935_s14] sm:$0xff]  }
0x11dc   :  { %v6106_v47 = vpop.f32.mrf.mxu1  ;;  %5675 = vmatpush3.bf16.msra.mxu1 %v6472_v43 }
0x11dd   :  { %v7260_v48 = vadd.f32 %v2209_v46, %v6839_v27  ;;  %6132 = vmatprep.subr.bf16.mxu1 %v6665_v42  ;;  %v2274_v46 = vsub.s32 1, %v6940_v36  ;;  %v2270_v47 = vsub.s32 0, %v6940_v36  ;;  %v5517_v36 = vld [vmem:[%s7958_s3 + $0x1] ss:$0 sm:$0xff] }
0x11de   :  { %v2205_v20 = vpop.f32.mrf.mxu1 }
0x11df   :  { %v2210_v49 = vadd.f32 %v2205_v20, %v7230_v44  ;;  %v2215_v50 = vsel %vm181_vm2, %v7260_v48, 0.0  ;;  %v2266_v20 = vld [vmem:[%s7934_s13] sm:$0x3] }
0x11e0   :  { %2216 = vadd.xlane.f32.xlu1 %v2215_v50  ;;  %v6107_v51 = vpop.f32.mrf.mxu1  ;;  %v2275_v50 = vrot.slane %v2266_v20, %v2274_v46 }
0x11e1   :  { %v7266_v52 = vadd.f32 %v2210_v49, %v6841_v28  ;;  %v2271_v51 = vrot.slane %v2266_v20, %v2270_v47 }
0x11e3   :  { %v2218_v53 = vsel %vm181_vm2, %v7266_v52, 0.0 }
0x11e4   :  { %2219 = vadd.xlane.f32.xlu0 %v2218_v53 }
0x1269   :  { %v2217_v41 = vpop.xlane.xlu1 %2216 }
0x126a   :  { %v2221_v9 = vmul.f32 0.015625, %v2217_v41 }
0x126c   :  { %v2223_v27 = vsub.f32 %v7260_v48, %v2221_v9 }
0x126d   :  { %v2220_v54 = vpop.xlane.xlu0 %2219 }
0x126e   :  { %v2222_v13 = vmul.f32 0.015625, %v2220_v54  ;;  %v2225_v55 = vmul.f32 %v2223_v27, %v2223_v27 }
0x1270   :  { %v2224_v44 = vsub.f32 %v7266_v52, %v2222_v13  ;;  %v2227_v56 = vsel %vm181_vm2, %v2225_v55, 0.0 }
0x1271   :  { %2228 = vadd.xlane.f32.xlu1 %v2227_v56 }
0x1272   :  { %v2226_v57 = vmul.f32 %v2224_v44, %v2224_v44 }
0x1274   :  { %v2230_v28 = vsel %vm181_vm2, %v2226_v57, 0.0 }
0x1275   :  { %2231 = vadd.xlane.f32.xlu0 %v2230_v28 }
0x12fa   :  { %v2229_v16 = vpop.xlane.xlu1 %2228 }
0x12fb   :  { %v2233_v17 = vmul.f32 0.015625, %v2229_v16 }
0x12fd   :  { %v2235_v18 = vadd.f32 1e-05, %v2233_v17 }
0x12fe   :  { %v2232_v21 = vpop.xlane.xlu0 %2231 }
0x12ff   :  { %6593 = vrsqrt.f32 %v2235_v18  ;;  %v2234_v22 = vmul.f32 0.015625, %v2232_v21 }
0x1301   :  { %v2236_v45 = vadd.f32 1e-05, %v2234_v22 }
0x1303   :  { %6595 = vrsqrt.f32 %v2236_v45  ;;  %v6473_v45 = vld [vmem:[%s7926_s5 + $0x98] sm:$0xff]  }
0x130c   :  { %v6594_v23 = vpop.eup %6593 }
0x130d   :  { %v2239_v24 = vmul.f32 %v6594_v23, %v2223_v27  ;;  %v6474_v23 = vld [vmem:[%s7928_s7 + $0x98] sm:$0xff]  }
0x130f   :  { %v2247_v29 = vmul.f32 %v5240_v25, %v2239_v24  ;;  %v6475_v24 = vld [vmem:[%s7926_s5 + $0x90] sm:$0xff]  }
0x1310   :  { %v6596_v19 = vpop.eup %6595 }
0x1311   :  { %v2240_v26 = vmul.f32 %v6596_v19, %v2224_v44  ;;  %v2255_v32 = vadd.f32 %v5241_v30, %v2247_v29  ;;  %v6477_v19 = vld [vmem:[%s7926_s5 + $0x88] sm:$0xff]   ;;  %v6479_v29 = vld [vmem:[%s7926_s5 + $0x80] sm:$0xff]  }
0x1313   :  { %v2248_v31 = vmul.f32 %v5240_v25, %v2240_v26  ;;  %v6476_v25 = vld [vmem:[%s7928_s7 + $0x90] sm:$0xff]   ;;  %v6478_v26 = vld [vmem:[%s7928_s7 + $0x88] sm:$0xff]  }
0x1315   :  { %v2256_v33 = vadd.f32 %v5241_v30, %v2248_v31  ;;  %v6480_v30 = vld [vmem:[%s7928_s7 + $0x80] sm:$0xff]  }
0x1317   :  { %v2257_v34 = vpack.c.bf16 %v2256_v33, %v2255_v32 }
0x1319   :  { %5250 = vmatmul.mubr.msk.bf16.vlgmr.msra.gmra.mxu0 %vm181_vm2, %v2257_v34 }
0x131a   :  { %6116 = vmatprep.mubr.msk.bf16.mxu0 %vm6666_vm3, %v6665_v42  ;;  %6109 = vmatpush3.bf16.msra.mxu0 %v6473_v45 }
0x131b   :  { %6110 = vmatprep.subr.bf16.mxu0 %v6665_v42 }
0x131e   :  { %6111 = vmatpush3.bf16.msra.mxu0 %v6475_v24 }
0x131f   :  { %6112 = vmatprep.subr.bf16.mxu0 %v6665_v42 }
0x1322   :  { %6113 = vmatpush3.bf16.msra.mxu0 %v6477_v19 }
0x1323   :  { %6114 = vmatprep.subr.bf16.mxu0 %v6665_v42 }
0x1326   :  { %6115 = vmatpush3.bf16.msra.mxu0 %v6479_v29 }
0x1327   :  { %6120 = vmatprep.subr.bf16.mxu0 %v6665_v42 }
0x13d9   :  { %v2355_v49 = vpop.f32.mrf.mxu0 }
0x13da   :  { %v2356_v54 = vadd.f32 %v2355_v49, %v2271_v51 }
0x13db   :  { %v2357_v53 = vpop.f32.mrf.mxu0 }
0x13dc   :  { %v2358_v9 = vadd.f32 %v2357_v53, %v2275_v50  ;;  %v2364_v28 = vmax.f32 %v2356_v54, 0.0  ;;  %v6482_v54 = vld [vmem:[%s7927_s6 + $0x90] sm:$0xff]  }
0x13dd   :  { %v2359_v41 = vpop.f32.mrf.mxu0 }
0x13de   :  { %v2360_v27 = vadd.f32 %v2359_v41, %v2271_v51  ;;  %v2365_v56 = vmax.f32 %v2358_v9, 0.0  ;;  %v6481_v9 = vld [vmem:[%s7927_s6 + $0x98] sm:$0xff]  }
0x13df   :  { %v2361_v13 = vpop.f32.mrf.mxu0 }
0x13e0   :  { %v2362_v55 = vadd.f32 %v2361_v13, %v2275_v50  ;;  %v2366_v44 = vmax.f32 %v2360_v27, 0.0  ;;  %v5271_v50 = vld [vmem:[%s7957_s21 + $0x1] ss:$0 sm:$0xff]  ;;  %v6483_v13 = vld [vmem:[%s7927_s6 + $0x88] sm:$0xff]  }
0x13e2   :  { %v2367_v57 = vmax.f32 %v2362_v55, 0.0  ;;  %v2368_v59 = vpack.c.bf16 %v2366_v44, %v2364_v28  ;;  %v6484_v55 = vld [vmem:[%s7927_s6 + $0x80] sm:$0xff]  }
0x13e4   :  { %v2369_v58 = vpack.c.bf16 %v2367_v57, %v2365_v56 }
0x13e6   :  { %2537 = vmatprep.mubr.bf16.mxu1 %v2369_v58 }
0x13e7   :  { %2538 = vmatmul.mubr.bf16.vlgmr.msra.gmra.mxu1 %v2368_v59 }
0x13e8   :  { %6140 = vmatprep.mubr.msk.bf16.mxu1 %vm6666_vm3, %v6665_v42  ;;  %6133 = vmatpush3.bf16.msra.mxu1 %v6474_v23 }
0x13e9   :  { %6134 = vmatprep.subr.bf16.mxu1 %v6665_v42 }
0x13ec   :  { %6135 = vmatpush3.bf16.msra.mxu1 %v6476_v25 }
0x13ed   :  { %6136 = vmatprep.subr.bf16.mxu1 %v6665_v42 }
0x13f0   :  { %6137 = vmatpush3.bf16.msra.mxu1 %v6478_v26 }
0x13f1   :  { %6138 = vmatprep.subr.bf16.mxu1 %v6665_v42 }
0x13f4   :  { %6139 = vmatpush3.bf16.msra.mxu1 %v6480_v30 }
0x13f5   :  { %6150 = vmatprep.subr.bf16.mxu1 %v6665_v42 }
0x14a7   :  { %v5676_v60 = vpop.f32.mrf.mxu1 }
0x14a9   :  { %v5677_v62 = vpop.f32.mrf.mxu1 }
0x14aa   :  { %v5678_v63 = vadd.f32 %v5677_v62, %v5676_v60 }
0x14ab   :  { %v5679_v0 = vpop.f32.mrf.mxu1 }
0x14ac   :  { %v2540_v1 = vadd.f32 %v5678_v63, %v5251_v61 }
0x14ad   :  { %v5680_v3 = vpop.f32.mrf.mxu1 }
0x14ae   :  { %v7372_v5 = vadd.f32 %v2540_v1, %v7260_v48  ;;  %v5681_v6 = vadd.f32 %v5680_v3, %v5679_v0 }
0x14b0   :  { %v2543_v7 = vadd.f32 %v5681_v6, %v5251_v61  ;;  %v2552_v8 = vsel %vm181_vm2, %v7372_v5, 0.0 }
0x14b1   :  { %2553 = vadd.xlane.f32.xlu1 %v2552_v8 }
0x14b2   :  { %v7377_v10 = vadd.f32 %v2543_v7, %v7266_v52 }
0x14b4   :  { %v2555_v11 = vsel %vm181_vm2, %v7377_v10, 0.0 }
0x14b5   :  { %2556 = vadd.xlane.f32.xlu0 %v2555_v11 }
0x153a   :  { %v2554_v12 = vpop.xlane.xlu1 %2553 }
0x153b   :  { %v2558_v14 = vmul.f32 0.015625, %v2554_v12 }
0x153d   :  { %v2560_v15 = vsub.f32 %v7372_v5, %v2558_v14 }
0x153e   :  { %v2557_v16 = vpop.xlane.xlu0 %2556 }
0x153f   :  { %v2559_v48 = vmul.f32 0.015625, %v2557_v16  ;;  %v2562_v17 = vmul.f32 %v2560_v15, %v2560_v15 }
0x1541   :  { %v2561_v18 = vsub.f32 %v7377_v10, %v2559_v48  ;;  %v2564_v21 = vsel %vm181_vm2, %v2562_v17, 0.0 }
0x1542   :  { %2565 = vadd.xlane.f32.xlu1 %v2564_v21 }
0x1543   :  { %v2563_v22 = vmul.f32 %v2561_v18, %v2561_v18 }
0x1545   :  { %v2567_v52 = vsel %vm181_vm2, %v2563_v22, 0.0 }
0x1546   :  { %2568 = vadd.xlane.f32.xlu0 %v2567_v52 }
0x15cb   :  { %v2566_v31 = vpop.xlane.xlu1 %2565 }
0x15cc   :  { %v2570_v32 = vmul.f32 0.015625, %v2566_v31 }
0x15ce   :  { %v2572_v33 = vadd.f32 1e-05, %v2570_v32 }
0x15cf   :  { %v2569_v34 = vpop.xlane.xlu0 %2568 }
0x15d0   :  { %6597 = vrsqrt.f32 %v2572_v33  ;;  %v2571_v35 = vmul.f32 0.015625, %v2569_v34 }
0x15d2   :  { %v2573_v37 = vadd.f32 1e-05, %v2571_v35 }
0x15d4   :  { %6599 = vrsqrt.f32 %v2573_v37 }
0x15dd   :  { %v6598_v39 = vpop.eup %6597 }
0x15de   :  { %v2576_v40 = vmul.f32 %v6598_v39, %v2560_v15 }
0x15e0   :  { %v2584_v20 = vmul.f32 %v5270_v4, %v2576_v40 }
0x15e1   :  { %v6600_v43 = vpop.eup %6599 }
0x15e2   :  { %v2577_v49 = vmul.f32 %v6600_v43, %v2561_v18  ;;  %v2592_v53 = vadd.f32 %v5271_v50, %v2584_v20 }
0x15e4   :  { %v2585_v51 = vmul.f32 %v5270_v4, %v2577_v49 }
0x15e6   :  { %v2593_v41 = vadd.f32 %v5271_v50, %v2585_v51 }
0x15e8   :  { %v7426_v27 = vpack.c.bf16 %v2593_v41, %v2592_v53 }
0x15ea   :  { %6117 = vmatmul.mubr.msk.bf16.vlgmr.msra.gmra.mxu0 %vm181_vm2, %v7426_v27  ;;  %6141 = vmatmul.mubr.msk.bf16.vlgmr.msra.gmra.mxu1 %vm181_vm2, %v7426_v27 }
0x15eb   :  { %6121 = vmatpush3.bf16.msra.mxu0 %v6481_v9  ;;  %6128 = vmatprep.mubr.msk.bf16.mxu0 %vm6666_vm3, %v6665_v42 }
0x15ec   :  { %6122 = vmatprep.subr.bf16.mxu0 %v6665_v42  ;;  %6152 = vmatprep.mubr.msk.bf16.mxu1 %vm6666_vm3, %v6665_v42 }
0x15ef   :  { %6123 = vmatpush3.bf16.msra.mxu0 %v6482_v54 }
0x15f0   :  { %6124 = vmatprep.subr.bf16.mxu0 %v6665_v42 }
0x15f3   :  { %6125 = vmatpush3.bf16.msra.mxu0 %v6483_v13  ;;  %v6485_v13 = vld [vmem:[%s7926_s5 + $0xb8] sm:$0xff]  }
0x15f4   :  { %6126 = vmatprep.subr.bf16.mxu0 %v6665_v42 }
0x15f7   :  { %6127 = vmatpush3.bf16.msra.mxu0 %v6484_v55 }
0x15f8   :  { %6144 = vmatprep.subr.bf16.mxu0 %v6665_v42 }
0x15fa   :  { %6129 = vmatmul.mubr.msk.bf16.vlgmr.msra.gmra.mxu0 %vm181_vm2, %v7426_v27 }
0x15fb   :  { %6146 = vmatprep.mubr.msk.bf16.mxu0 %vm6666_vm3, %v6665_v42 }
0x16aa   :  { %v2667_v44 = vpop.f32.mrf.mxu0  ;;  %v2815_v56 = vpop.f32.mrf.mxu1 }
0x16ab   :  { %v2822_v6 = vmul.f32 0.25, %v2667_v44  ;;  %v2828_v11 = vpack.c.bf16 %v2815_v56, %v2815_v56  ;;  %v6486_v44 = vld [vmem:[%s7926_s5 + $0xb0] sm:$0xff]   ;;  %v6487_v56 = vld [vmem:[%s7926_s5 + $0xa8] sm:$0xff]  }
0x16ac   :  { %v6118_v57 = vpop.f32.mrf.mxu0  ;;  %v6142_v28 = vpop.f32.mrf.mxu1 }
0x16ad   :  { %v2824_v14 = vpack.c.bf16 %v2822_v6, %v2822_v6  ;;  %v2950_v16 = vsel %vm578_vm4, %v2828_v11, 0  ;;  %v6488_v57 = vld [vmem:[%s7926_s5 + $0xa0] sm:$0xff]   ;;  %v6489_v28 = vld [vmem:[%s7928_s7 + $0xb8] sm:$0xff]  }
0x16ae   :  { %v2670_v58 = vpop.f32.mrf.mxu0  ;;  %v2818_v59 = vpop.f32.mrf.mxu1 }
0x16af   :  { %v2823_v15 = vmul.f32 0.25, %v2670_v58  ;;  %v2829_v48 = vpack.c.bf16 %v2818_v59, %v2818_v59  ;;  %v6490_v58 = vld [vmem:[%s7928_s7 + $0xb0] sm:$0xff]   ;;  %v6491_v59 = vld [vmem:[%s7928_s7 + $0xa8] sm:$0xff]  }
0x16b0   :  { %v6119_v60 = vpop.f32.mrf.mxu0  ;;  %v6143_v61 = vpop.f32.mrf.mxu1 }
0x16b1   :  { %v2825_v17 = vpack.c.bf16 %v2823_v15, %v2823_v15  ;;  %v2996_v18 = vsel %vm578_vm4, %v2829_v48, 0  ;;  %v6492_v60 = vld [vmem:[%s7928_s7 + $0xa0] sm:$0xff]   ;;  %v6496_v15 = vld [vmem:[%s7927_s6 + $0xa8] sm:$0xff]  }
0x16b2   :  { %v6493_v61 = vld [vmem:[%s7929_s8 + $0x20] sm:$0xff]  }
0x16ba   :  { %v2741_v62 = vpop.f32.mrf.mxu0 }
0x16bb   :  { %v2826_v63 = vpack.c.bf16 %v2741_v62, %v2741_v62 }
0x16bc   :  { %v6130_v0 = vpop.f32.mrf.mxu0 }
0x16bd   :  { %v2834_v1 = vsel %vm457_vm5, %v2826_v63, 0 }
0x16be   :  { %v2744_v3 = vpop.f32.mrf.mxu0  ;;  %6145 = vmatpush3.bf16.xpose.msra.mxu0 %v2834_v1 }
0x16bf   :  { %v2827_v7 = vpack.c.bf16 %v2744_v3, %v2744_v3  ;;  %6156 = vmatprep.subr.bf16.mxu0 %v6665_v42  ;;  %v6494_v3 = vld [vmem:[%s7927_s6 + $0xb8] sm:$0xff]  }
0x16c0   :  { %v6131_v8 = vpop.f32.mrf.mxu0 }
0x16c1   :  { %v2880_v12 = vsel %vm457_vm5, %v2827_v7, 0 }
0x16c2   :  { %6151 = vmatpush3.bf16.xpose.msra.mxu1 %v2880_v12  ;;  %v6495_v12 = vld [vmem:[%s7927_s6 + $0xb0] sm:$0xff]  }
0x16c3   :  { %6162 = vmatprep.subr.bf16.mxu1 %v6665_v42 }
0x16c5   :  { %6147 = vmatmul.mubr.msk.bf16.vlgmr.msra.gmra.mxu0 %vm457_vm5, %v2824_v14 }
0x16c6   :  { %6157 = vmatpush3.bf16.msra.mxu0 %v2950_v16  ;;  %6158 = vmatprep.mubr.msk.bf16.mxu0 %vm6666_vm3, %v6665_v42  ;;  %v6497_v16 = vld [vmem:[%s7927_s6 + $0xa0] sm:$0xff]  }
0x16c7   :  { %6168 = vmatprep.subr.bf16.mxu0 %v6665_v42 }
0x16c9   :  { %6153 = vmatmul.mubr.msk.bf16.vlgmr.msra.gmra.mxu1 %vm457_vm5, %v2825_v17 }
0x16ca   :  { %6163 = vmatpush3.bf16.msra.mxu1 %v2996_v18  ;;  %6164 = vmatprep.mubr.msk.bf16.mxu1 %vm6666_vm3, %v6665_v42 }
0x16cb   :  { %6174 = vmatprep.subr.bf16.mxu1 %v6665_v42 }
0x1785   :  { %v2870_v21 = vpop.f32.mrf.mxu0 }
0x1786   :  { %v2871_v22 = vadd.f32 %v2870_v21, %v6944_v38 }
0x1787   :  { %v6148_v52 = vpop.f32.mrf.mxu0 }
0x1788   :  { %v2922_v45 = vsel %vm550_vm7, %v2871_v22, -inf }
0x1789   :  { %v2916_v23 = vpop.f32.mrf.mxu1  ;;  %2923 = vmax.xlane.f32.xlu1 %v2922_v45  ;;  %v2873_v24 = vpop.f32.mrf.mxu0 }
0x178a   :  { %v2917_v25 = vadd.f32 %v2916_v23, %v6944_v38 }
0x178b   :  { %v6149_v19 = vpop.f32.mrf.mxu0  ;;  %v6154_v26 = vpop.f32.mrf.mxu1 }
0x178c   :  { %v2925_v29 = vsel %vm550_vm7, %v2917_v25, -inf }
0x178d   :  { %2926 = vmax.xlane.f32.xlu0 %v2925_v29  ;;  %v2919_v30 = vpop.f32.mrf.mxu1 }
0x178f   :  { %v6155_v31 = vpop.f32.mrf.mxu1 }
0x1812   :  { %v2924_v32 = vpop.xlane.xlu1 %2923 }
0x1813   :  { %v2928_v33 = vsub.f32 %v2871_v22, %v2924_v32 }
0x1815   :  { %v2930_v34 = vmul.f32 1.442695, %v2928_v33 }
0x1816   :  { %v2927_v35 = vpop.xlane.xlu0 %2926 }
0x1817   :  { %6601 = vpow2.f32 %v2930_v34  ;;  %v2929_v37 = vsub.f32 %v2917_v25, %v2927_v35 }
0x1819   :  { %v2932_v39 = vmul.f32 1.442695, %v2929_v37 }
0x181b   :  { %6603 = vpow2.f32 %v2932_v39 }
0x1824   :  { %v6602_v40 = vpop.eup %6601 }
0x1825   :  { %v2934_v4 = vsel %vm550_vm7, %v6602_v40, 0.0 }
0x1826   :  { %2935 = vadd.xlane.f32.xlu1 %v2934_v4 }
0x1828   :  { %v6604_v43 = vpop.eup %6603 }
0x1829   :  { %v2937_v20 = vsel %vm550_vm7, %v6604_v43, 0.0 }
0x182a   :  { %2938 = vadd.xlane.f32.xlu0 %v2937_v20 }
0x18af   :  { %v2936_v49 = vpop.xlane.xlu1 %2935 }
0x18b0   :  { %6605 = vrcp.f32 %v2936_v49 }
0x18b3   :  { %v2939_v50 = vpop.xlane.xlu0 %2938 }
0x18b4   :  { %6607 = vrcp.f32 %v2939_v50 }
0x18bd   :  { %v6606_v51 = vpop.eup %6605 }
0x18be   :  { %v2942_v53 = vmul.f32 %v6606_v51, %v6602_v40 }
0x18c0   :  { %v2944_v41 = vpack.c.bf16 %v2942_v53, %v2942_v53 }
0x18c1   :  { %v6608_v9 = vpop.eup %6607 }
0x18c2   :  { %6159 = vmatmul.mubr.msk.bf16.vlgmr.msra.gmra.mxu0 %vm550_vm7, %v2944_v41  ;;  %v2943_v54 = vmul.f32 %v6608_v9, %v6604_v43 }
0x18c3   :  { %6170 = vmatprep.mubr.msk.bf16.mxu0 %vm6666_vm3, %v6665_v42  ;;  %6169 = vmatpush3.bf16.msra.mxu0 %v6493_v61 }
0x18c4   :  { %v2945_v55 = vpack.c.bf16 %v2943_v54, %v2943_v54  ;;  %6186 = vmatprep.subr.bf16.mxu0 %v6665_v42 }
0x18c6   :  { %6165 = vmatmul.mubr.msk.bf16.vlgmr.msra.gmra.mxu1 %vm550_vm7, %v2945_v55 }
0x18c7   :  { %6175 = vmatpush3.bf16.msra.mxu1 %v6485_v13  ;;  %6182 = vmatprep.mubr.msk.bf16.mxu1 %vm6666_vm3, %v6665_v42 }
0x18c8   :  { %6176 = vmatprep.subr.bf16.mxu1 %v6665_v42 }
0x18cb   :  { %6177 = vmatpush3.bf16.msra.mxu1 %v6486_v44 }
0x18cc   :  { %6178 = vmatprep.subr.bf16.mxu1 %v6665_v42 }
0x18cf   :  { %6179 = vmatpush3.bf16.msra.mxu1 %v6487_v56 }
0x18d0   :  { %6180 = vmatprep.subr.bf16.mxu1 %v6665_v42 }
0x18d3   :  { %6181 = vmatpush3.bf16.msra.mxu1 %v6488_v57 }
0x18d4   :  { %6198 = vmatprep.subr.bf16.mxu1 %v6665_v42 }
0x18d6   :  { %6183 = vmatmul.mubr.msk.bf16.vlgmr.msra.gmra.mxu1 %vm181_vm2, %v7426_v27 }
0x18d7   :  { %6199 = vmatpush3.bf16.msra.mxu1 %v6489_v28  ;;  %6206 = vmatprep.mubr.msk.bf16.mxu1 %vm6666_vm3, %v6665_v42 }
0x18d8   :  { %6200 = vmatprep.subr.bf16.mxu1 %v6665_v42 }
0x18db   :  { %6201 = vmatpush3.bf16.msra.mxu1 %v6490_v58 }
0x18dc   :  { %6202 = vmatprep.subr.bf16.mxu1 %v6665_v42 }
0x18df   :  { %6203 = vmatpush3.bf16.msra.mxu1 %v6491_v59 }
0x18e0   :  { %6204 = vmatprep.subr.bf16.mxu1 %v6665_v42 }
0x18e3   :  { %6205 = vmatpush3.bf16.msra.mxu1 %v6492_v60 }
0x18e4   :  { %6222 = vmatprep.subr.bf16.mxu1 %v6665_v42 }
0x18e6   :  { %6207 = vmatmul.mubr.msk.bf16.vlgmr.msra.gmra.mxu1 %vm181_vm2, %v7426_v27 }
0x18e7   :  { %6224 = vmatprep.mubr.msk.bf16.mxu1 %vm6666_vm3, %v6665_v42 }
0x1982   :  { %v2986_v62 = vpop.f32.mrf.mxu0 }
0x1984   :  { %v6160_v63 = vpop.f32.mrf.mxu0 }
0x1986   :  { %v2989_v0 = vpop.f32.mrf.mxu0  ;;  %v3032_v1 = vpop.f32.mrf.mxu1 }
0x1987   :  { %v3038_v6 = vpack.c.bf16 %v3032_v1, %v2986_v62 }
0x1988   :  { %v6161_v7 = vpop.f32.mrf.mxu0  ;;  %v6166_v8 = vpop.f32.mrf.mxu1 }
0x1989   :  { %6171 = vmatmul.mubr.msk.bf16.vlgmr.msra.gmra.mxu0 %vm457_vm5, %v3038_v6 }
0x198a   :  { %6187 = vmatpush3.bf16.msra.mxu0 %v6494_v3  ;;  %v3035_v11 = vpop.f32.mrf.mxu1  ;;  %6194 = vmatprep.mubr.msk.bf16.mxu0 %vm6666_vm3, %v6665_v42 }
0x198b   :  { %6188 = vmatprep.subr.bf16.mxu0 %v6665_v42 }
0x198c   :  { %v6167_v14 = vpop.f32.mrf.mxu1 }
0x198e   :  { %6189 = vmatpush3.bf16.msra.mxu0 %v6495_v12 }
0x198f   :  { %6190 = vmatprep.subr.bf16.mxu0 %v6665_v42 }
0x1992   :  { %6191 = vmatpush3.bf16.msra.mxu0 %v6496_v15 }
0x1993   :  { %6192 = vmatprep.subr.bf16.mxu0 %v6665_v42 }
0x1996   :  { %v3167_v48 = vpop.f32.mrf.mxu1  ;;  %6193 = vmatpush3.bf16.msra.mxu0 %v6497_v16 }
0x1997   :  { %6210 = vmatprep.subr.bf16.mxu0 %v6665_v42  ;;  %v3322_v37 = vmul.f32 0.25, %v3167_v48 }
0x1998   :  { %v6184_v17 = vpop.f32.mrf.mxu1 }
0x1999   :  { %6195 = vmatmul.mubr.msk.bf16.vlgmr.msra.gmra.mxu0 %vm181_vm2, %v7426_v27  ;;  %v3324_v4 = vpack.c.bf16 %v3322_v37, %v3322_v37  ;;  %v6507_v37 = vld [vmem:[%s7927_s6 + $0xd8] sm:$0xff]  }
0x199a   :  { %v3170_v18 = vpop.f32.mrf.mxu1  ;;  %6212 = vmatprep.mubr.msk.bf16.mxu0 %vm6666_vm3, %v6665_v42 }
0x199b   :  { %v3323_v20 = vmul.f32 0.25, %v3170_v18  ;;  %v6498_v18 = vld [vmem:[%s7926_s5 + $0xd8] sm:$0xff]  }
0x199c   :  { %v6185_v21 = vpop.f32.mrf.mxu1 }
0x199d   :  { %v3325_v50 = vpack.c.bf16 %v3323_v20, %v3323_v20 }
0x19a6   :  { %v3315_v22 = vpop.f32.mrf.mxu1 }
0x19a7   :  { %v3328_v52 = vpack.c.bf16 %v3315_v22, %v3315_v22  ;;  %v6499_v22 = vld [vmem:[%s7926_s5 + $0xd0] sm:$0xff]  }
0x19a8   :  { %v6208_v45 = vpop.f32.mrf.mxu1 }
0x19a9   :  { %v3450_v23 = vsel %vm578_vm4, %v3328_v52, 0  ;;  %v6500_v52 = vld [vmem:[%s7926_s5 + $0xc8] sm:$0xff]   ;;  %v6501_v45 = vld [vmem:[%s7926_s5 + $0xc0] sm:$0xff]  }
0x19aa   :  { %v3318_v24 = vpop.f32.mrf.mxu1  ;;  %6223 = vmatpush3.bf16.msra.mxu1 %v3450_v23  ;;  %v6502_v23 = vld [vmem:[%s7928_s7 + $0xd8] sm:$0xff]  }
0x19ab   :  { %6234 = vmatprep.subr.bf16.mxu1 %v6665_v42  ;;  %v3329_v49 = vpack.c.bf16 %v3318_v24, %v3318_v24  ;;  %v6503_v24 = vld [vmem:[%s7928_s7 + $0xd0] sm:$0xff]  }
0x19ac   :  { %v6209_v25 = vpop.f32.mrf.mxu1 }
0x19ad   :  { %v3496_v51 = vsel %vm578_vm4, %v3329_v49, 0  ;;  %v6504_v25 = vld [vmem:[%s7928_s7 + $0xc8] sm:$0xff]  }
0x19ae   :  { %v6509_v49 = vld [vmem:[%s7927_s6 + $0xc8] sm:$0xff]  }
0x1a49   :  { %v7548_v19 = vpop.f32.mrf.mxu0 }
0x1a4b   :  { %v6172_v26 = vpop.f32.mrf.mxu0 }
0x1a4c   :  { %v6505_v26 = vld [vmem:[%s7928_s7 + $0xc0] sm:$0xff]  }
0x1a4d   :  { %v7550_v29 = vpop.f32.mrf.mxu0 }
0x1a4f   :  { %v6173_v30 = vpop.f32.mrf.mxu0 }
0x1a50   :  { %v6506_v30 = vld [vmem:[%s7929_s8 + $0x28] sm:$0xff]  }
0x1a59   :  { %v3241_v31 = vpop.f32.mrf.mxu0 }
0x1a5a   :  { %v3326_v32 = vpack.c.bf16 %v3241_v31, %v3241_v31 }
0x1a5b   :  { %v6196_v33 = vpop.f32.mrf.mxu0 }
0x1a5c   :  { %v3334_v34 = vsel %vm457_vm5, %v3326_v32, 0 }
0x1a5d   :  { %v3244_v35 = vpop.f32.mrf.mxu0  ;;  %6211 = vmatpush3.bf16.xpose.msra.mxu0 %v3334_v34 }
0x1a5e   :  { %6216 = vmatprep.subr.bf16.mxu0 %v6665_v42  ;;  %v3327_v40 = vpack.c.bf16 %v3244_v35, %v3244_v35 }
0x1a5f   :  { %v6197_v39 = vpop.f32.mrf.mxu0 }
0x1a60   :  { %v3380_v43 = vsel %vm457_vm5, %v3327_v40, 0 }
0x1a64   :  { %6213 = vmatmul.mubr.msk.bf16.vlgmr.msra.gmra.mxu0 %vm457_vm5, %v3324_v4 }
0x1a65   :  { %6217 = vmatpush3.bf16.xpose.msra.mxu0 %v3380_v43  ;;  %6218 = vmatprep.mubr.msk.bf16.mxu0 %vm6666_vm3, %v6665_v42  ;;  %v6508_v43 = vld [vmem:[%s7927_s6 + $0xd0] sm:$0xff]  }
0x1a66   :  { %6228 = vmatprep.subr.bf16.mxu0 %v6665_v42 }
0x1a6c   :  { %6219 = vmatmul.mubr.msk.bf16.vlgmr.msra.gmra.mxu0 %vm457_vm5, %v3325_v50  ;;  %v6510_v50 = vld [vmem:[%s7927_s6 + $0xc0] sm:$0xff]  }
0x1a6d   :  { %6229 = vmatpush3.bf16.msra.mxu0 %v3496_v51  ;;  %6230 = vmatprep.mubr.msk.bf16.mxu0 %vm6666_vm3, %v6665_v42 }
0x1a6e   :  { %6240 = vmatprep.subr.bf16.mxu0 %v6665_v42 }
0x1b24   :  { %v3370_v53 = vpop.f32.mrf.mxu0 }
0x1b25   :  { %v3371_v41 = vadd.f32 %v3370_v53, %v6944_v38 }
0x1b26   :  { %v6214_v9 = vpop.f32.mrf.mxu0 }
0x1b27   :  { %v3422_v54 = vsel %vm550_vm7, %v3371_v41, -inf }
0x1b28   :  { %3423 = vmax.xlane.f32.xlu1 %v3422_v54  ;;  %v3373_v13 = vpop.f32.mrf.mxu0 }
0x1b2a   :  { %v6215_v55 = vpop.f32.mrf.mxu0 }
0x1b2c   :  { %v3416_v44 = vpop.f32.mrf.mxu0 }
0x1b2d   :  { %v3417_v56 = vadd.f32 %v3416_v44, %v6944_v38 }
0x1b2e   :  { %v6220_v57 = vpop.f32.mrf.mxu0 }
0x1b2f   :  { %v3425_v28 = vsel %vm550_vm7, %v3417_v56, -inf }
0x1b30   :  { %3426 = vmax.xlane.f32.xlu0 %v3425_v28  ;;  %v3419_v58 = vpop.f32.mrf.mxu0  ;;  %v5320_v28 = vld [vmem:[%s7930_s9 + $0x1] ss:$0 sm:$0xff] }
0x1b31   :  { %v3098_v58 = vadd.f32 %v5320_v28, %v7548_v19 }
0x1b32   :  { %v6221_v59 = vpop.f32.mrf.mxu0 }
0x1bb1   :  { %v3424_v60 = vpop.xlane.xlu1 %3423 }
0x1bb2   :  { %v3428_v61 = vsub.f32 %v3371_v41, %v3424_v60 }
0x1bb4   :  { %v3430_v62 = vmul.f32 1.442695, %v3428_v61 }
0x1bb6   :  { %6609 = vpow2.f32 %v3430_v62  ;;  %v3099_v62 = vadd.f32 %v5320_v28, %v7550_v29  ;;  %v6513_v28 = vld [vmem:[%s7926_s5 + $0xe8] sm:$0xff]  }
0x1bb9   :  { %v3427_v63 = vpop.xlane.xlu0 %3426 }
0x1bba   :  { %v3429_v0 = vsub.f32 %v3417_v56, %v3427_v63 }
0x1bbc   :  { %v3432_v1 = vmul.f32 1.442695, %v3429_v0 }
0x1bbe   :  { %6611 = vpow2.f32 %v3432_v1 }
0x1bc3   :  { %v6610_v3 = vpop.eup %6609 }
0x1bc4   :  { %v3434_v6 = vsel %vm550_vm7, %v6610_v3, 0.0 }
0x1bc5   :  { %3435 = vadd.xlane.f32.xlu1 %v3434_v6 }
0x1bcb   :  { %v6612_v7 = vpop.eup %6611 }
0x1bcc   :  { %v3437_v8 = vsel %vm550_vm7, %v6612_v7, 0.0 }
0x1bcd   :  { %3438 = vadd.xlane.f32.xlu0 %v3437_v8 }
0x1c4e   :  { %v3436_v11 = vpop.xlane.xlu1 %3435 }
0x1c4f   :  { %6613 = vrcp.f32 %v3436_v11 }
0x1c56   :  { %v3439_v12 = vpop.xlane.xlu0 %3438 }
0x1c57   :  { %6615 = vrcp.f32 %v3439_v12 }
0x1c5c   :  { %v6614_v14 = vpop.eup %6613 }
0x1c5d   :  { %v3442_v15 = vmul.f32 %v6614_v14, %v6610_v3 }
0x1c5f   :  { %v3444_v16 = vpack.c.bf16 %v3442_v15, %v3442_v15 }
0x1c61   :  { %6225 = vmatmul.mubr.msk.bf16.vlgmr.msra.gmra.mxu1 %vm550_vm7, %v3444_v16 }
0x1c62   :  { %6236 = vmatprep.mubr.msk.bf16.mxu1 %vm6666_vm3, %v6665_v42  ;;  %6235 = vmatpush3.bf16.msra.mxu1 %v6506_v30 }
0x1c63   :  { %6252 = vmatprep.subr.bf16.mxu1 %v6665_v42 }
0x1c64   :  { %v6616_v48 = vpop.eup %6615 }
0x1c65   :  { %v3443_v17 = vmul.f32 %v6616_v48, %v6612_v7 }
0x1c67   :  { %v3445_v21 = vpack.c.bf16 %v3443_v17, %v3443_v17 }
0x1c69   :  { %6231 = vmatmul.mubr.msk.bf16.vlgmr.msra.gmra.mxu0 %vm550_vm7, %v3445_v21 }
0x1c6a   :  { %6241 = vmatpush3.bf16.msra.mxu0 %v6498_v18  ;;  %6248 = vmatprep.mubr.msk.bf16.mxu0 %vm6666_vm3, %v6665_v42 }
0x1c6b   :  { %6242 = vmatprep.subr.bf16.mxu0 %v6665_v42 }
0x1c6e   :  { %6243 = vmatpush3.bf16.msra.mxu0 %v6499_v22 }
0x1c6f   :  { %6244 = vmatprep.subr.bf16.mxu0 %v6665_v42 }
0x1c72   :  { %6245 = vmatpush3.bf16.msra.mxu0 %v6500_v52 }
0x1c73   :  { %6246 = vmatprep.subr.bf16.mxu0 %v6665_v42 }
0x1c76   :  { %6247 = vmatpush3.bf16.msra.mxu0 %v6501_v45 }
0x1c77   :  { %6264 = vmatprep.subr.bf16.mxu0 %v6665_v42 }
0x1c79   :  { %6249 = vmatmul.mubr.msk.bf16.vlgmr.msra.gmra.mxu0 %vm181_vm2, %v7426_v27 }
0x1c7a   :  { %6265 = vmatpush3.bf16.msra.mxu0 %v6502_v23  ;;  %6272 = vmatprep.mubr.msk.bf16.mxu0 %vm6666_vm3, %v6665_v42 }
0x1c7b   :  { %6266 = vmatprep.subr.bf16.mxu0 %v6665_v42 }
0x1c7e   :  { %6267 = vmatpush3.bf16.msra.mxu0 %v6503_v24 }
0x1c7f   :  { %6268 = vmatprep.subr.bf16.mxu0 %v6665_v42 }
0x1c82   :  { %6269 = vmatpush3.bf16.msra.mxu0 %v6504_v25 }
0x1c83   :  { %6270 = vmatprep.subr.bf16.mxu0 %v6665_v42 }
0x1c86   :  { %6271 = vmatpush3.bf16.msra.mxu0 %v6505_v26 }
0x1c87   :  { %6288 = vmatprep.subr.bf16.mxu0 %v6665_v42 }
0x1c89   :  { %6273 = vmatmul.mubr.msk.bf16.vlgmr.msra.gmra.mxu0 %vm181_vm2, %v7426_v27 }
0x1c8a   :  { %6290 = vmatprep.mubr.msk.bf16.mxu0 %vm6666_vm3, %v6665_v42 }
0x1d21   :  { %v3486_v31 = vpop.f32.mrf.mxu1 }
0x1d23   :  { %v6226_v32 = vpop.f32.mrf.mxu1 }
0x1d25   :  { %v3489_v33 = vpop.f32.mrf.mxu1 }
0x1d27   :  { %v6227_v34 = vpop.f32.mrf.mxu1 }
0x1d29   :  { %v3532_v35 = vpop.f32.mrf.mxu0 }
0x1d2a   :  { %v3538_v39 = vpack.c.bf16 %v3532_v35, %v3486_v31 }
0x1d2b   :  { %v6232_v40 = vpop.f32.mrf.mxu0 }
0x1d2c   :  { %6237 = vmatmul.mubr.msk.bf16.vlgmr.msra.gmra.mxu1 %vm457_vm5, %v3538_v39 }
0x1d2d   :  { %6253 = vmatpush3.bf16.msra.mxu1 %v6507_v37  ;;  %v3535_v4 = vpop.f32.mrf.mxu0  ;;  %6260 = vmatprep.mubr.msk.bf16.mxu1 %vm6666_vm3, %v6665_v42 }
0x1d2e   :  { %6254 = vmatprep.subr.bf16.mxu1 %v6665_v42 }
0x1d2f   :  { %v6233_v20 = vpop.f32.mrf.mxu0 }
0x1d31   :  { %6255 = vmatpush3.bf16.msra.mxu1 %v6508_v43 }
0x1d32   :  { %6256 = vmatprep.subr.bf16.mxu1 %v6665_v42 }
0x1d35   :  { %6257 = vmatpush3.bf16.msra.mxu1 %v6509_v49 }
0x1d36   :  { %6258 = vmatprep.subr.bf16.mxu1 %v6665_v42 }
0x1d39   :  { %v3661_v51 = vpop.f32.mrf.mxu0  ;;  %6259 = vmatpush3.bf16.msra.mxu1 %v6510_v50 }
0x1d3a   :  { %6276 = vmatprep.subr.bf16.mxu1 %v6665_v42  ;;  %v3816_v12 = vmul.f32 0.25, %v3661_v51 }
0x1d3b   :  { %v6250_v53 = vpop.f32.mrf.mxu0 }
0x1d3c   :  { %6261 = vmatmul.mubr.msk.bf16.vlgmr.msra.gmra.mxu1 %vm181_vm2, %v7426_v27  ;;  %v3818_v15 = vpack.c.bf16 %v3816_v12, %v3816_v12  ;;  %v6520_v12 = vld [vmem:[%s7927_s6 + $0xf8] sm:$0xff]  }
0x1d3d   :  { %v3664_v41 = vpop.f32.mrf.mxu0  ;;  %6278 = vmatprep.mubr.msk.bf16.mxu1 %vm6666_vm3, %v6665_v42 }
0x1d3e   :  { %v3817_v29 = vmul.f32 0.25, %v3664_v41 }
0x1d3f   :  { %v6251_v9 = vpop.f32.mrf.mxu0 }
0x1d40   :  { %v3819_v17 = vpack.c.bf16 %v3817_v29, %v3817_v29 }
0x1d49   :  { %v3809_v54 = vpop.f32.mrf.mxu0 }
0x1d4a   :  { %v3822_v13 = vpack.c.bf16 %v3809_v54, %v3809_v54 }
0x1d4b   :  { %v6274_v55 = vpop.f32.mrf.mxu0 }
0x1d4c   :  { %v3944_v44 = vsel %vm578_vm4, %v3822_v13, 0 }
0x1d4d   :  { %v3812_v56 = vpop.f32.mrf.mxu0  ;;  %6289 = vmatpush3.bf16.msra.mxu0 %v3944_v44  ;;  %v6511_v44 = vld [vmem:[%s7926_s5 + $0xf8] sm:$0xff]  }
0x1d4e   :  { %6300 = vmatprep.subr.bf16.mxu0 %v6665_v42  ;;  %v3823_v48 = vpack.c.bf16 %v3812_v56, %v3812_v56 }
0x1d4f   :  { %v6275_v57 = vpop.f32.mrf.mxu0 }
0x1d50   :  { %v3990_v18 = vsel %vm578_vm4, %v3823_v48, 0  ;;  %v6512_v57 = vld [vmem:[%s7926_s5 + $0xf0] sm:$0xff]   ;;  %v6522_v48 = vld [vmem:[%s7927_s6 + $0xe8] sm:$0xff]  }
0x1dec   :  { %v3585_v59 = vpop.f32.mrf.mxu1 }
0x1ded   :  { %v7649_v60 = vadd.f32 %v3585_v59, %v3098_v58  ;;  %v6514_v58 = vld [vmem:[%s7926_s5 + $0xe0] sm:$0xff]   ;;  %v6515_v59 = vld [vmem:[%s7928_s7 + $0xf8] sm:$0xff]  }
0x1dee   :  { %v6238_v61 = vpop.f32.mrf.mxu1 }
0x1def   :  { %v6516_v61 = vld [vmem:[%s7928_s7 + $0xf0] sm:$0xff]  }
0x1df0   :  { %v3588_v63 = vpop.f32.mrf.mxu1 }
0x1df1   :  { %v7652_v0 = vadd.f32 %v3588_v63, %v3099_v62  ;;  %v6517_v62 = vld [vmem:[%s7928_s7 + $0xe8] sm:$0xff]   ;;  %v6518_v63 = vld [vmem:[%s7928_s7 + $0xe0] sm:$0xff]  }
0x1df2   :  { %v6239_v1 = vpop.f32.mrf.mxu1 }
0x1df3   :  { %v6519_v1 = vld [vmem:[%s7929_s8 + $0x30] sm:$0xff]  }
0x1dfc   :  { %v3735_v3 = vpop.f32.mrf.mxu1 }
0x1dfd   :  { %v3820_v6 = vpack.c.bf16 %v3735_v3, %v3735_v3 }
0x1dfe   :  { %v6262_v7 = vpop.f32.mrf.mxu1 }
0x1dff   :  { %v3828_v8 = vsel %vm457_vm5, %v3820_v6, 0 }
0x1e00   :  { %v3738_v11 = vpop.f32.mrf.mxu1  ;;  %6277 = vmatpush3.bf16.xpose.msra.mxu1 %v3828_v8 }
0x1e01   :  { %6282 = vmatprep.subr.bf16.mxu1 %v6665_v42  ;;  %v3821_v14 = vpack.c.bf16 %v3738_v11, %v3738_v11 }
0x1e02   :  { %v6263_v19 = vpop.f32.mrf.mxu1 }
0x1e03   :  { %v3874_v16 = vsel %vm457_vm5, %v3821_v14, 0 }
0x1e07   :  { %6279 = vmatmul.mubr.msk.bf16.vlgmr.msra.gmra.mxu1 %vm457_vm5, %v3818_v15 }
0x1e08   :  { %6283 = vmatpush3.bf16.xpose.msra.mxu1 %v3874_v16  ;;  %6284 = vmatprep.mubr.msk.bf16.mxu1 %vm6666_vm3, %v6665_v42  ;;  %v6521_v16 = vld [vmem:[%s7927_s6 + $0xf0] sm:$0xff]  }
0x1e09   :  { %6294 = vmatprep.subr.bf16.mxu1 %v6665_v42 }
0x1e0f   :  { %6285 = vmatmul.mubr.msk.bf16.vlgmr.msra.gmra.mxu1 %vm457_vm5, %v3819_v17  ;;  %v6523_v17 = vld [vmem:[%s7927_s6 + $0xe0] sm:$0xff]  }
0x1e10   :  { %6295 = vmatpush3.bf16.msra.mxu1 %v3990_v18  ;;  %6296 = vmatprep.mubr.msk.bf16.mxu1 %vm6666_vm3, %v6665_v42 }
0x1e11   :  { %6306 = vmatprep.subr.bf16.mxu1 %v6665_v42 }
0x1ec7   :  { %v3864_v21 = vpop.f32.mrf.mxu1 }
0x1ec8   :  { %v3865_v22 = vadd.f32 %v3864_v21, %v6944_v38 }
0x1ec9   :  { %v6280_v52 = vpop.f32.mrf.mxu1 }
0x1eca   :  { %v3916_v45 = vsel %vm550_vm7, %v3865_v22, -inf }
0x1ecb   :  { %3917 = vmax.xlane.f32.xlu1 %v3916_v45  ;;  %v3867_v23 = vpop.f32.mrf.mxu1 }
0x1ecd   :  { %v6281_v24 = vpop.f32.mrf.mxu1 }
0x1ecf   :  { %v3910_v25 = vpop.f32.mrf.mxu1 }
0x1ed0   :  { %v3911_v26 = vadd.f32 %v3910_v25, %v6944_v38 }
0x1ed1   :  { %v6286_v30 = vpop.f32.mrf.mxu1 }
0x1ed2   :  { %v3919_v31 = vsel %vm550_vm7, %v3911_v26, -inf }
0x1ed3   :  { %3920 = vmax.xlane.f32.xlu0 %v3919_v31  ;;  %v3913_v32 = vpop.f32.mrf.mxu1 }
0x1ed5   :  { %v6287_v33 = vpop.f32.mrf.mxu1 }
0x1f54   :  { %v3918_v34 = vpop.xlane.xlu1 %3917 }
0x1f55   :  { %v3922_v35 = vsub.f32 %v3865_v22, %v3918_v34 }
0x1f57   :  { %v3924_v37 = vmul.f32 1.442695, %v3922_v35 }
0x1f59   :  { %6617 = vpow2.f32 %v3924_v37 }
0x1f5c   :  { %v3921_v39 = vpop.xlane.xlu0 %3920 }
0x1f5d   :  { %v3923_v40 = vsub.f32 %v3911_v26, %v3921_v39 }
0x1f5f   :  { %v3926_v4 = vmul.f32 1.442695, %v3923_v40 }
0x1f61   :  { %6619 = vpow2.f32 %v3926_v4 }
0x1f66   :  { %v6618_v43 = vpop.eup %6617 }
0x1f67   :  { %v3928_v20 = vsel %vm550_vm7, %v6618_v43, 0.0 }
0x1f68   :  { %3929 = vadd.xlane.f32.xlu1 %v3928_v20 }
0x1f6e   :  { %v6620_v49 = vpop.eup %6619 }
0x1f6f   :  { %v3931_v50 = vsel %vm550_vm7, %v6620_v49, 0.0 }
0x1f70   :  { %3932 = vadd.xlane.f32.xlu0 %v3931_v50 }
0x1ff1   :  { %v3930_v51 = vpop.xlane.xlu1 %3929 }
0x1ff2   :  { %6621 = vrcp.f32 %v3930_v51 }
0x1ff9   :  { %v3933_v53 = vpop.xlane.xlu0 %3932 }
0x1ffa   :  { %6623 = vrcp.f32 %v3933_v53 }
0x1fff   :  { %v6622_v41 = vpop.eup %6621 }
0x2000   :  { %v3936_v9 = vmul.f32 %v6622_v41, %v6618_v43 }
0x2002   :  { %v3938_v54 = vpack.c.bf16 %v3936_v9, %v3936_v9 }
0x2004   :  { %6291 = vmatmul.mubr.msk.bf16.vlgmr.msra.gmra.mxu0 %vm550_vm7, %v3938_v54 }
0x2005   :  { %6302 = vmatprep.mubr.msk.bf16.mxu0 %vm6666_vm3, %v6665_v42  ;;  %6301 = vmatpush3.bf16.msra.mxu0 %v6519_v1 }
0x2006   :  { %6318 = vmatprep.subr.bf16.mxu0 %v6665_v42 }
0x2007   :  { %v6624_v13 = vpop.eup %6623 }
0x2008   :  { %v3937_v55 = vmul.f32 %v6624_v13, %v6620_v49 }
0x200a   :  { %v3939_v56 = vpack.c.bf16 %v3937_v55, %v3937_v55 }
0x200c   :  { %6297 = vmatmul.mubr.msk.bf16.vlgmr.msra.gmra.mxu1 %vm550_vm7, %v3939_v56 }
0x200d   :  { %6307 = vmatpush3.bf16.msra.mxu1 %v6511_v44  ;;  %6314 = vmatprep.mubr.msk.bf16.mxu1 %vm6666_vm3, %v6665_v42 }
0x200e   :  { %6308 = vmatprep.subr.bf16.mxu1 %v6665_v42 }
0x2011   :  { %6309 = vmatpush3.bf16.msra.mxu1 %v6512_v57 }
0x2012   :  { %6310 = vmatprep.subr.bf16.mxu1 %v6665_v42 }
0x2015   :  { %6311 = vmatpush3.bf16.msra.mxu1 %v6513_v28 }
0x2016   :  { %6312 = vmatprep.subr.bf16.mxu1 %v6665_v42 }
0x2019   :  { %6313 = vmatpush3.bf16.msra.mxu1 %v6514_v58 }
0x201a   :  { %6330 = vmatprep.subr.bf16.mxu1 %v6665_v42 }
0x201c   :  { %6315 = vmatmul.mubr.msk.bf16.vlgmr.msra.gmra.mxu1 %vm181_vm2, %v7426_v27 }
0x201d   :  { %6331 = vmatpush3.bf16.msra.mxu1 %v6515_v59  ;;  %6338 = vmatprep.mubr.msk.bf16.mxu1 %vm6666_vm3, %v6665_v42 }
0x201e   :  { %6332 = vmatprep.subr.bf16.mxu1 %v6665_v42 }
0x2021   :  { %6333 = vmatpush3.bf16.msra.mxu1 %v6516_v61 }
0x2022   :  { %6334 = vmatprep.subr.bf16.mxu1 %v6665_v42 }
0x2025   :  { %6335 = vmatpush3.bf16.msra.mxu1 %v6517_v62 }
0x2026   :  { %6336 = vmatprep.subr.bf16.mxu1 %v6665_v42 }
0x2029   :  { %6337 = vmatpush3.bf16.msra.mxu1 %v6518_v63 }
0x202a   :  { %6354 = vmatprep.subr.bf16.mxu1 %v6665_v42 }
0x202c   :  { %6339 = vmatmul.mubr.msk.bf16.vlgmr.msra.gmra.mxu1 %vm181_vm2, %v7426_v27 }
0x202d   :  { %6356 = vmatprep.mubr.msk.bf16.mxu1 %vm6666_vm3, %v6665_v42 }
0x20c4   :  { %v3980_v3 = vpop.f32.mrf.mxu0 }
0x20c6   :  { %v6292_v6 = vpop.f32.mrf.mxu0 }
0x20c8   :  { %v3983_v7 = vpop.f32.mrf.mxu0 }
0x20ca   :  { %v6293_v8 = vpop.f32.mrf.mxu0 }
0x20cc   :  { %v4026_v11 = vpop.f32.mrf.mxu1 }
0x20cd   :  { %v4032_v19 = vpack.c.bf16 %v4026_v11, %v3980_v3 }
0x20ce   :  { %v6298_v14 = vpop.f32.mrf.mxu1 }
0x20cf   :  { %6303 = vmatmul.mubr.msk.bf16.vlgmr.msra.gmra.mxu0 %vm457_vm5, %v4032_v19 }
0x20d0   :  { %6319 = vmatpush3.bf16.msra.mxu0 %v6520_v12  ;;  %v4029_v15 = vpop.f32.mrf.mxu1  ;;  %6326 = vmatprep.mubr.msk.bf16.mxu0 %vm6666_vm3, %v6665_v42 }
0x20d1   :  { %6320 = vmatprep.subr.bf16.mxu0 %v6665_v42 }
0x20d2   :  { %v6299_v29 = vpop.f32.mrf.mxu1 }
0x20d4   :  { %6321 = vmatpush3.bf16.msra.mxu0 %v6521_v16 }
0x20d5   :  { %6322 = vmatprep.subr.bf16.mxu0 %v6665_v42 }
0x20d8   :  { %6323 = vmatpush3.bf16.msra.mxu0 %v6522_v48 }
0x20d9   :  { %6324 = vmatprep.subr.bf16.mxu0 %v6665_v42 }
0x20dc   :  { %v4155_v18 = vpop.f32.mrf.mxu1  ;;  %6325 = vmatpush3.bf16.msra.mxu0 %v6523_v17 }
0x20dd   :  { %6342 = vmatprep.subr.bf16.mxu0 %v6665_v42  ;;  %v4310_v20 = vmul.f32 0.25, %v4155_v18 }
0x20de   :  { %v6316_v21 = vpop.f32.mrf.mxu1 }
0x20df   :  { %6327 = vmatmul.mubr.msk.bf16.vlgmr.msra.gmra.mxu0 %vm181_vm2, %v7426_v27 }
0x20e0   :  { %v4158_v22 = vpop.f32.mrf.mxu1  ;;  %6344 = vmatprep.mubr.msk.bf16.mxu0 %vm6666_vm3, %v6665_v42 }
0x20e2   :  { %v6317_v52 = vpop.f32.mrf.mxu1 }
0x20e3   :  { %v6524_v52 = vld [vmem:[%s7929_s8 + $0x38] sm:$0xff]  }
0x20ec   :  { %v4303_v45 = vpop.f32.mrf.mxu1 }
0x20ed   :  { %v4316_v23 = vpack.c.bf16 %v4303_v45, %v4303_v45 }
0x20ee   :  { %v6340_v24 = vpop.f32.mrf.mxu1 }
0x20ef   :  { %v4438_v25 = vsel %vm578_vm4, %v4316_v23, 0 }
0x20f0   :  { %v4306_v26 = vpop.f32.mrf.mxu1  ;;  %6355 = vmatpush3.bf16.msra.mxu1 %v4438_v25 }
0x20f1   :  { %6366 = vmatprep.subr.bf16.mxu1 %v6665_v42  ;;  %v4317_v53 = vpack.c.bf16 %v4306_v26, %v4306_v26 }
0x20f2   :  { %v6341_v30 = vpop.f32.mrf.mxu1 }
0x20f3   :  { %v4484_v9 = vsel %vm578_vm4, %v4317_v53, 0 }
0x218f   :  { %v4079_v31 = vpop.f32.mrf.mxu0 }
0x2190   :  { %v7748_v32 = vadd.f32 %v4079_v31, %v7649_v60  ;;  %v4312_v60 = vpack.c.bf16 %v4310_v20, %v4310_v20 }
0x2191   :  { %v6304_v27 = vpop.f32.mrf.mxu0 }
0x2193   :  { %v4082_v33 = vpop.f32.mrf.mxu0 }
0x2194   :  { %v7751_v34 = vadd.f32 %v4082_v33, %v7652_v0  ;;  %v4311_v0 = vmul.f32 0.25, %v4158_v22 }
0x2195   :  { %v6305_v35 = vpop.f32.mrf.mxu0 }
0x2196   :  { %v4313_v41 = vpack.c.bf16 %v4311_v0, %v4311_v0 }
0x219f   :  { %v4229_v37 = vpop.f32.mrf.mxu0 }
0x21a0   :  { %v4314_v39 = vpack.c.bf16 %v4229_v37, %v4229_v37 }
0x21a1   :  { %v6328_v40 = vpop.f32.mrf.mxu0 }
0x21a2   :  { %v4322_v4 = vsel %vm457_vm5, %v4314_v39, 0 }
0x21a3   :  { %v4232_v43 = vpop.f32.mrf.mxu0  ;;  %6343 = vmatpush3.bf16.xpose.msra.mxu0 %v4322_v4 }
0x21a4   :  { %6348 = vmatprep.subr.bf16.mxu0 %v6665_v42  ;;  %v4315_v50 = vpack.c.bf16 %v4232_v43, %v4232_v43 }
0x21a5   :  { %v6329_v49 = vpop.f32.mrf.mxu0 }
0x21a6   :  { %v4368_v51 = vsel %vm457_vm5, %v4315_v50, 0 }
0x21aa   :  { %6345 = vmatmul.mubr.msk.bf16.vlgmr.msra.gmra.mxu0 %vm457_vm5, %v4312_v60 }
0x21ab   :  { %6349 = vmatpush3.bf16.xpose.msra.mxu0 %v4368_v51  ;;  %6350 = vmatprep.mubr.msk.bf16.mxu0 %vm6666_vm3, %v6665_v42 }
0x21ac   :  { %6360 = vmatprep.subr.bf16.mxu0 %v6665_v42 }
0x21b2   :  { %6351 = vmatmul.mubr.msk.bf16.vlgmr.msra.gmra.mxu0 %vm457_vm5, %v4313_v41 }
0x21b3   :  { %6361 = vmatpush3.bf16.msra.mxu0 %v4484_v9  ;;  %6362 = vmatprep.mubr.msk.bf16.mxu0 %vm6666_vm3, %v6665_v42 }
0x226a   :  { %v4358_v54 = vpop.f32.mrf.mxu0 }
0x226b   :  { %v4359_v13 = vadd.f32 %v4358_v54, %v6944_v38  ;;  %v6527_v54 = vld [vmem:[%s7933_s12 + $0x74] ss:$8 sps:$4 sm:$0xff]  }
0x226c   :  { %v6346_v55 = vpop.f32.mrf.mxu0  ;;  %4704 = vmatprep.subr.bf16.mxu0 %v6527_v54 }
0x226d   :  { %v4410_v44 = vsel %vm550_vm7, %v4359_v13, -inf  ;;  %v6530_v55 = vld [vmem:[%s7933_s12 + $0x64] ss:$8 sps:$4 sm:$0xff]  }
0x226e   :  { %4411 = vmax.xlane.f32.xlu1 %v4410_v44  ;;  %v4361_v56 = vpop.f32.mrf.mxu0  ;;  %v6528_v44 = vld [vmem:[%s7933_s12 + $0x60] ss:$8 sps:$4 sm:$0xff]  }
0x226f   :  { %v6533_v56 = vld [vmem:[%s7933_s12 + $0x54] ss:$8 sps:$4 sm:$0xff]  }
0x2270   :  { %v6347_v57 = vpop.f32.mrf.mxu0 }
0x2271   :  { %v6531_v57 = vld [vmem:[%s7933_s12 + $0x50] ss:$8 sps:$4 sm:$0xff]  }
0x2272   :  { %v4404_v28 = vpop.f32.mrf.mxu0 }
0x2273   :  { %v4405_v58 = vadd.f32 %v4404_v28, %v6944_v38  ;;  %v6534_v28 = vld [vmem:[%s7933_s12 + $0x40] ss:$8 sps:$4 sm:$0xff]  }
0x2274   :  { %v6352_v59 = vpop.f32.mrf.mxu0 }
0x2275   :  { %v4413_v61 = vsel %vm550_vm7, %v4405_v58, -inf  ;;  %v6537_v59 = vld [vmem:[%s7935_s14 + $0xf8] sm:$0xff]  }
0x2276   :  { %4414 = vmax.xlane.f32.xlu0 %v4413_v61  ;;  %v4407_v62 = vpop.f32.mrf.mxu0  ;;  %v6538_v61 = vld [vmem:[%s7935_s14 + $0xb8] sm:$0xff]  }
0x2277   :  { %v6539_v62 = vld [vmem:[%s7935_s14 + $0xf0] sm:$0xff]  }
0x2278   :  { %v6353_v63 = vpop.f32.mrf.mxu0 }
0x2279   :  { %v6540_v63 = vld [vmem:[%s7935_s14 + $0xb0] sm:$0xff]  }
0x22f7   :  { %v4412_v1 = vpop.xlane.xlu1 %4411 }
0x22f8   :  { %v4416_v3 = vsub.f32 %v4359_v13, %v4412_v1  ;;  %v6525_v13 = vld [vmem:[%s7933_s12 + $0x70] ss:$8 sps:$4 sm:$0xff]   ;;  %v6541_v1 = vld [vmem:[%s7935_s14 + $0xe8] sm:$0xff]  }
0x22fa   :  { %v4418_v6 = vmul.f32 1.442695, %v4416_v3  ;;  %v6542_v3 = vld [vmem:[%s7935_s14 + $0xa8] sm:$0xff]  }
0x22fc   :  { %6625 = vpow2.f32 %v4418_v6  ;;  %v6543_v6 = vld [vmem:[%s7935_s14 + $0xe0] sm:$0xff]  }
0x22ff   :  { %v4415_v7 = vpop.xlane.xlu0 %4414 }
0x2300   :  { %v4417_v8 = vsub.f32 %v4405_v58, %v4415_v7  ;;  %v6536_v58 = vld [vmem:[%s7933_s12 + $0x44] ss:$8 sps:$4 sm:$0xff]  }
0x2301   :  { %v6544_v7 = vld [vmem:[%s7935_s14 + $0xa0] sm:$0xff]  }
0x2302   :  { %v4420_v11 = vmul.f32 1.442695, %v4417_v8  ;;  %v6545_v8 = vld [vmem:[%s7935_s14 + $0xd8] sm:$0xff]  }
0x2304   :  { %6627 = vpow2.f32 %v4420_v11  ;;  %v6546_v11 = vld [vmem:[%s7935_s14 + $0x98] sm:$0xff]  }
0x2309   :  { %v6626_v12 = vpop.eup %6625 }
0x230a   :  { %v4422_v19 = vsel %vm550_vm7, %v6626_v12, 0.0 }
0x230b   :  { %4423 = vadd.xlane.f32.xlu1 %v4422_v19 }
0x2311   :  { %v6628_v14 = vpop.eup %6627 }
0x2312   :  { %v4425_v38 = vsel %vm550_vm7, %v6628_v14, 0.0 }
0x2313   :  { %4426 = vadd.xlane.f32.xlu0 %v4425_v38 }
0x2394   :  { %v4424_v15 = vpop.xlane.xlu1 %4423 }
0x2395   :  { %6629 = vrcp.f32 %v4424_v15 }
0x239c   :  { %v4427_v16 = vpop.xlane.xlu0 %4426 }
0x239d   :  { %6631 = vrcp.f32 %v4427_v16 }
0x23a2   :  { %v6630_v29 = vpop.eup %6629 }
0x23a3   :  { %v4430_v48 = vmul.f32 %v6630_v29, %v6626_v12 }
0x23a5   :  { %v4432_v17 = vpack.c.bf16 %v4430_v48, %v4430_v48 }
0x23a7   :  { %6357 = vmatmul.mubr.msk.bf16.vlgmr.msra.gmra.mxu1 %vm550_vm7, %v4432_v17  ;;  %v5464_v17 = vld [vmem:[%s7931_s10 + $0x1] ss:$0 sm:$0xff] }
0x23a8   :  { %6368 = vmatprep.mubr.msk.bf16.mxu1 %vm6666_vm3, %v6665_v42  ;;  %6367 = vmatpush3.bf16.msra.mxu1 %v6524_v52  ;;  %v5465_v52 = vld [vmem:[%s7932_s11 + $0x1] ss:$0 sm:$0xff] }
0x23a9   :  { %5782 = vmatprep.subr.bf16.mxu1 %v6537_v59 }
0x23aa   :  { %v6632_v18 = vpop.eup %6631 }
0x23ab   :  { %v4431_v21 = vmul.f32 %v6632_v18, %v6628_v14 }
0x23ad   :  { %v4433_v22 = vpack.c.bf16 %v4431_v21, %v4431_v21 }
0x23af   :  { %6363 = vmatmul.mubr.msk.bf16.vlgmr.msra.gmra.mxu0 %vm550_vm7, %v4433_v22 }
0x23b0   :  { %4728 = vmatprep.mubr.bf16.mxu0 %v6663_v2  ;;  %4705 = vmatpush1.bf16.msra.mxu0 %v6525_v13 }
0x23b1   :  { %4706 = vmatprep.subr.bf16.mxu0 %v6530_v55 }
0x23b4   :  { %4707 = vmatpush1.bf16.msra.mxu0 %v6528_v44 }
0x23b5   :  { %4708 = vmatprep.subr.bf16.mxu0 %v6533_v56 }
0x23b8   :  { %4709 = vmatpush1.bf16.msra.mxu0 %v6531_v57 }
0x23b9   :  { %4710 = vmatprep.subr.bf16.mxu0 %v6536_v58 }
0x23bc   :  { %4711 = vmatpush1.bf16.msra.mxu0 %v6534_v28 }
0x23bd   :  { %6372 = vmatprep.subr.bf16.mxu0 %v6665_v42 }
0x2467   :  { %v4474_v45 = vpop.f32.mrf.mxu1 }
0x2469   :  { %v6358_v23 = vpop.f32.mrf.mxu1 }
0x246b   :  { %v4477_v24 = vpop.f32.mrf.mxu1 }
0x246d   :  { %v6359_v25 = vpop.f32.mrf.mxu1 }
0x246f   :  { %v4520_v26 = vpop.f32.mrf.mxu0 }
0x2470   :  { %v4526_v30 = vpack.c.bf16 %v4520_v26, %v4474_v45  ;;  %v6547_v26 = vld [vmem:[%s7935_s14 + $0xd0] sm:$0xff]  }
0x2471   :  { %v6364_v31 = vpop.f32.mrf.mxu0 }
0x2472   :  { %6369 = vmatmul.mubr.msk.bf16.vlgmr.msra.gmra.mxu1 %vm457_vm5, %v4526_v30  ;;  %v6548_v30 = vld [vmem:[%s7935_s14 + $0x90] sm:$0xff]   ;;  %v6549_v31 = vld [vmem:[%s7935_s14 + $0xc8] sm:$0xff]  }
0x2473   :  { %v4523_v27 = vpop.f32.mrf.mxu0  ;;  %5783 = vmatpush3.bf16.msra.mxu1 %v6538_v61 }
0x2474   :  { %5784 = vmatprep.subr.bf16.mxu1 %v6539_v62  ;;  %v6550_v27 = vld [vmem:[%s7935_s14 + $0x88] sm:$0xff]  }
0x2475   :  { %v6365_v33 = vpop.f32.mrf.mxu0 }
0x2476   :  { %v6551_v33 = vld [vmem:[%s7935_s14 + $0xc0] sm:$0xff]  }
0x2477   :  { %5785 = vmatpush3.bf16.msra.mxu1 %v6540_v63 }
0x2478   :  { %5786 = vmatprep.subr.bf16.mxu1 %v6541_v1 }
0x247b   :  { %5787 = vmatpush3.bf16.msra.mxu1 %v6542_v3 }
0x247c   :  { %5788 = vmatprep.subr.bf16.mxu1 %v6543_v6 }
0x247f   :  { %5789 = vmatpush3.bf16.msra.mxu1 %v6544_v7 }
0x2480   :  { %5790 = vmatprep.subr.bf16.mxu1 %v6545_v8 }
0x2483   :  { %5791 = vmatpush3.bf16.msra.mxu1 %v6546_v11 }
0x2484   :  { %5792 = vmatprep.subr.bf16.mxu1 %v6547_v26 }
0x2487   :  { %5793 = vmatpush3.bf16.msra.mxu1 %v6548_v30 }
0x2488   :  { %5794 = vmatprep.subr.bf16.mxu1 %v6549_v31 }
0x248b   :  { %5795 = vmatpush3.bf16.msra.mxu1 %v6550_v27  ;;  %v5536_v27 = vld [vmem:[%s7940_s19] ss:$0 sm:$0xff] }
0x248c   :  { %5796 = vmatprep.subr.bf16.mxu1 %v6551_v33 }
0x2532   :  { %v4573_v35 = vpop.f32.mrf.mxu1 }
0x2533   :  { %v4580_v37 = vadd.f32 %v4573_v35, %v7748_v32  ;;  %v6552_v35 = vld [vmem:[%s7935_s14 + $0x80] sm:$0xff]  }
0x2534   :  { %v6370_v2 = vpop.f32.mrf.mxu1  ;;  %5797 = vmatpush3.bf16.msra.mxu1 %v6552_v35 }
0x2535   :  { %v7781_v39 = vadd.f32 %v4580_v37, %v7372_v5  ;;  %v5474_v37 = vld [vmem:[%s7934_s13 + $0x2] sm:$0x3] }
0x2536   :  { %v4576_v40 = vpop.f32.mrf.mxu1 }
0x2537   :  { %v4581_v4 = vadd.f32 %v4576_v40, %v7751_v34  ;;  %v4588_v43 = vsel %vm181_vm2, %v7781_v39, 0.0  ;;  %v4650_v40 = vrot.slane %v5474_v37, %v2274_v46 }
0x2538   :  { %4589 = vadd.xlane.f32.xlu1 %v4588_v43  ;;  %v6371_v20 = vpop.f32.mrf.mxu1 }
0x2539   :  { %v7787_v49 = vadd.f32 %v4581_v4, %v7377_v10  ;;  %v4646_v4 = vrot.slane %v5474_v37, %v2270_v47 }
0x253b   :  { %v4591_v50 = vsel %vm181_vm2, %v7787_v49, 0.0 }
0x253c   :  { %4592 = vadd.xlane.f32.xlu0 %v4591_v50 }
0x25c1   :  { %v4590_v32 = vpop.xlane.xlu1 %4589 }
0x25c2   :  { %v4594_v60 = vmul.f32 0.015625, %v4590_v32 }
0x25c4   :  { %v4596_v5 = vsub.f32 %v7781_v39, %v4594_v60 }
0x25c5   :  { %v4593_v51 = vpop.xlane.xlu0 %4592 }
0x25c6   :  { %v4595_v0 = vmul.f32 0.015625, %v4593_v51  ;;  %v4598_v53 = vmul.f32 %v4596_v5, %v4596_v5 }
0x25c8   :  { %v4597_v34 = vsub.f32 %v7787_v49, %v4595_v0  ;;  %v4600_v41 = vsel %vm181_vm2, %v4598_v53, 0.0 }
0x25c9   :  { %4601 = vadd.xlane.f32.xlu1 %v4600_v41 }
0x25ca   :  { %v4599_v9 = vmul.f32 %v4597_v34, %v4597_v34 }
0x25cc   :  { %v4603_v10 = vsel %vm181_vm2, %v4599_v9, 0.0 }
0x25cd   :  { %4604 = vadd.xlane.f32.xlu0 %v4603_v10 }
0x2652   :  { %v4602_v12 = vpop.xlane.xlu1 %4601 }
0x2653   :  { %v4606_v19 = vmul.f32 0.015625, %v4602_v12 }
0x2655   :  { %v4608_v14 = vadd.f32 1e-05, %v4606_v19  ;;  %v6554_v19 = vld [vmem:[%s7939_s18 + $0x10] sm:$0xff]  }
0x2656   :  { %v4605_v38 = vpop.xlane.xlu0 %4604 }
0x2657   :  { %6633 = vrsqrt.f32 %v4608_v14  ;;  %v4607_v15 = vmul.f32 0.015625, %v4605_v38  ;;  %v6555_v14 = vld [vmem:[%s7939_s18 + $0x8] sm:$0xff]   ;;  %v6556_v38 = vld [vmem:[%s7939_s18] sm:$0xff]  }
0x2659   :  { %v4609_v16 = vadd.f32 1e-05, %v4607_v15 }
0x265b   :  { %6635 = vrsqrt.f32 %v4609_v16 }
0x2664   :  { %v6634_v29 = vpop.eup %6633 }
0x2665   :  { %v4612_v48 = vmul.f32 %v6634_v29, %v4596_v5 }
0x2667   :  { %v4620_v21 = vmul.f32 %v5464_v17, %v4612_v48 }
0x2668   :  { %v6636_v18 = vpop.eup %6635 }
0x2669   :  { %v4613_v22 = vmul.f32 %v6636_v18, %v4597_v34  ;;  %v4628_v23 = vadd.f32 %v5465_v52, %v4620_v21 }
0x266b   :  { %v4621_v45 = vmul.f32 %v5464_v17, %v4613_v22 }
0x266d   :  { %v4629_v24 = vadd.f32 %v5465_v52, %v4621_v45  ;;  %v5534_v52 = vld [vmem:[%s7937_s16] ss:$0 sm:$0xff]  ;;  %s6668_s16 = smov [#allocation2]  }
0x266e   :  { %s5060_s27 = sshll.u32 %s6668_s16, 4  ;;  %s5061_s27 = int_to_ptr.vmem [resolvable:$true] %s5060_s27 }
0x266f   :  { %v4630_v25 = vpack.c.bf16 %v4629_v24, %v4628_v23  ;;  %v5535_v24 = vld [vmem:[%s7938_s17] ss:$0 sm:$0xff]  ;;  %s6641_s17 = scalar_lea.vmem %s5061_s27, 256  ;;  %p6646_p1 = scmp.lt.s32.totalorder %s5061_s27, %s5061_s27 }
0x2670   :  { %p6642_p0 = scmp.ne.s32.totalorder %s5061_s27, %s6641_s17  ;;  %p6647_p2 = scmp.lt.s32.totalorder %s6641_s17, %s6641_s17 }
0x2671   :  { %5483 = vmatmul.mubr.msk.bf16.vlgmr.msra.gmra.mxu0 %vm181_vm2, %v4630_v25 }
0x2672   :  { %6380 = vmatprep.mubr.msk.bf16.mxu0 %vm6666_vm3, %v6665_v42  ;;  %p6648_p3 = por %p6647_p2, %p6646_p1 }
0x2674   :  { %p6649_p4 = pnand %p6648_p3, %p6642_p0 }
0x2731   :  { %v4730_v2 = vpop.f32.mrf.mxu0 }
0x2732   :  { %v4731_v60 = vadd.f32 %v4730_v2, %v4646_v4 }
0x2733   :  { %v4732_v43 = vpop.f32.mrf.mxu0 }
0x2734   :  { %v4733_v50 = vadd.f32 %v4732_v43, %v4650_v40  ;;  %v4739_v41 = vmax.f32 %v4731_v60, 0.0 }
0x2735   :  { %v4734_v20 = vpop.f32.mrf.mxu0 }
0x2736   :  { %v4735_v32 = vadd.f32 %v4734_v20, %v4646_v4  ;;  %v4740_v53 = vmax.f32 %v4733_v50, 0.0 }
0x2737   :  { %v4736_v5 = vpop.f32.mrf.mxu0 }
0x2738   :  { %v4737_v51 = vadd.f32 %v4736_v5, %v4650_v40  ;;  %v4741_v0 = vmax.f32 %v4735_v32, 0.0 }
0x273a   :  { %v4742_v34 = vmax.f32 %v4737_v51, 0.0  ;;  %v4743_v10 = vpack.c.bf16 %v4741_v0, %v4739_v41 }
0x273c   :  { %v4744_v9 = vpack.c.bf16 %v4742_v34, %v4740_v53 }
0x273e   :  { %4914 = vmatprep.mubr.bf16.mxu1 %v4744_v9 }
0x273f   :  { %4915 = vmatmul.mubr.bf16.vlgmr.msra.gmra.mxu1 %v4743_v10 }
0x27ff   :  { %v5798_v54 = vpop.f32.mrf.mxu1 }
0x2801   :  { %v5799_v46 = vpop.f32.mrf.mxu1 }
0x2802   :  { %v5800_v47 = vadd.f32 %v5799_v46, %v5798_v54 }
0x2803   :  { %v5801_v13 = vpop.f32.mrf.mxu1 }
0x2804   :  { %v4917_v55 = vadd.f32 %v5800_v47, %v5517_v36 }
0x2805   :  { %v5802_v44 = vpop.f32.mrf.mxu1 }
0x2806   :  { %v5803_v56 = vadd.f32 %v5802_v44, %v5801_v13  ;;  %v4923_v57 = vadd.f32 %v4917_v55, %v7781_v39 }
0x2808   :  { %v4920_v28 = vadd.f32 %v5803_v56, %v5517_v36  ;;  %v4927_v58 = vsel %vm181_vm2, %v4923_v57, 0.0 }
0x2809   :  { %4928 = vadd.xlane.f32.xlu1 %v4927_v58 }
0x280a   :  { %v4924_v59 = vadd.f32 %v4920_v28, %v7787_v49  ;;  %v6553_v49 = vld [vmem:[%s7939_s18 + $0x18] sm:$0xff]  }
0x280b   :  { %6373 = vmatpush3.bf16.msra.mxu0 %v6553_v49 }
0x280c   :  { %v4930_v61 = vsel %vm181_vm2, %v4924_v59, 0.0  ;;  %6374 = vmatprep.subr.bf16.mxu0 %v6665_v42 }
0x280d   :  { %4931 = vadd.xlane.f32.xlu0 %v4930_v61 }
0x280f   :  { %6375 = vmatpush3.bf16.msra.mxu0 %v6554_v19 }
0x2810   :  { %6376 = vmatprep.subr.bf16.mxu0 %v6665_v42 }
0x2813   :  { %6377 = vmatpush3.bf16.msra.mxu0 %v6555_v14 }
0x2814   :  { %6378 = vmatprep.subr.bf16.mxu0 %v6665_v42 }
0x2817   :  { %6379 = vmatpush3.bf16.msra.mxu0 %v6556_v38 }
0x2892   :  { %v4929_v62 = vpop.xlane.xlu1 %4928 }
0x2893   :  { %v4933_v63 = vmul.f32 0.015625, %v4929_v62 }
0x2895   :  { %v4935_v1 = vsub.f32 %v4923_v57, %v4933_v63 }
0x2896   :  { %v4932_v3 = vpop.xlane.xlu0 %4931 }
0x2897   :  { %v4934_v6 = vmul.f32 0.015625, %v4932_v3  ;;  %v4937_v7 = vmul.f32 %v4935_v1, %v4935_v1 }
0x2899   :  { %v4936_v8 = vsub.f32 %v4924_v59, %v4934_v6  ;;  %v4939_v11 = vsel %vm181_vm2, %v4937_v7, 0.0 }
0x289a   :  { %4940 = vadd.xlane.f32.xlu1 %v4939_v11 }
0x289b   :  { %v4938_v39 = vmul.f32 %v4936_v8, %v4936_v8 }
0x289d   :  { %v4942_v12 = vsel %vm181_vm2, %v4938_v39, 0.0 }
0x289e   :  { %4943 = vadd.xlane.f32.xlu0 %v4942_v12 }
0x2923   :  { %v4941_v15 = vpop.xlane.xlu1 %4940 }
0x2924   :  { %v4945_v16 = vmul.f32 0.015625, %v4941_v15 }
0x2926   :  { %v4947_v29 = vadd.f32 1e-05, %v4945_v16 }
0x2927   :  { %v4944_v48 = vpop.xlane.xlu0 %4943 }
0x2928   :  { %6637 = vrsqrt.f32 %v4947_v29  ;;  %v4946_v17 = vmul.f32 0.015625, %v4944_v48 }
0x292a   :  { %v4948_v18 = vadd.f32 1e-05, %v4946_v17 }
0x292c   :  { %6639 = vrsqrt.f32 %v4948_v18 }
0x2935   :  { %v6638_v21 = vpop.eup %6637 }
0x2936   :  { %v4951_v22 = vmul.f32 %v6638_v21, %v4935_v1 }
0x2938   :  { %v4959_v45 = vmul.f32 %v5534_v52, %v4951_v22 }
0x2939   :  { %v6640_v42 = vpop.eup %6639 }
0x293a   :  { %v4952_v23 = vmul.f32 %v6640_v42, %v4936_v8  ;;  %v4967_v26 = vadd.f32 %v5535_v24, %v4959_v45 }
0x293c   :  { %v4960_v25 = vmul.f32 %v5534_v52, %v4952_v23 }
0x293e   :  { %v4968_v30 = vadd.f32 %v5535_v24, %v4960_v25 }
0x2940   :  { %v4969_v31 = vpack.c.bf16 %v4968_v30, %v4967_v26 }
0x2942   :  { %6381 = vmatmul.mubr.msk.bf16.vlgmr.msra.gmra.mxu0 %vm181_vm2, %v4969_v31 }
0x2a02   :  { %v5046_v33 = vpop.f32.mrf.mxu0 }
0x2a03   :  { %v5047_v35 = vadd.f32 %v5536_v27, %v5046_v33 }
0x2a04   :  { %v6382_v37 = vpop.f32.mrf.mxu0 }
0x2a05   :  { %5053 = vst [vmem:[#allocation2] sm:$0xff] %v5047_v35 }
0x2a06   :  { %v5049_v2 = vpop.f32.mrf.mxu0 }
0x2a07   :  { %v5050_v40 = vadd.f32 %v5536_v27, %v5049_v2 }
0x2a08   :  { %v6383_v4 = vpop.f32.mrf.mxu0 }
0x2a09   :  { %5054 = vst [vmem:[#allocation2 + $0x8] sm:$0xff] %v5050_v40 }
0x2a0a   :  { %6652 = shalt.err (!%p6649_p4)
}
0x2a0b   :  { %s6669_s11 = smov 128   ;;  %s6670_s19 = smov 8  }
0x2a0c   :  { %5066 = dma.vmem_to_hbm [thread:$0]  %s5061_s27, 256, %s7941_s20, [#allocation3], %s6669_s11, %s6669_s11, %s6670_s19  }
0x2a0d   :  { %6661 = dma.done.wait [#allocation3], 256  }
0x2a0e   :  { %6662 = vsyncadd [#allocation3], 4294967040 }
0x2a0f   :  { %5070 = vsyncpa [#allocation3], 1 }

</bundles_post_ra>
